<compile_context>
chip_gen: v7x
topology: tpu7x:2x2x1
jax: 0.10.0
libtpu: 0.0.40
codegen_flags: <defaults>
</compile_context>

<pallas_src>
import jax
import jax.numpy as jnp
from jax.experimental import pallas as pl
from jax.experimental.pallas import tpu as pltpu

_BN_EPS = 1e-3                     # _BATCH_NORM_PARAMS['eps']
_VMEM_LIMIT = 48 * 1024 * 1024     # generous but safe on v5e/v6e/v7x


def _round_up(x, m):
    return (x + m - 1) // m * m


def _cpad(c):
    # lane-dense internal channel count
    return _round_up(c, 128)


def _folds(cin, k):
    # stem special-case: fold the k*k taps into the contraction dim
    return k * k * cin <= 128


def _same_pads(k, stride, rate):
    if stride == 1:
        pad = (k - 1) * rate // 2          # torch Conv2d symmetric padding
        return pad, pad
    keff = k + (k - 1) * (rate - 1)        # fixed_padding + VALID conv
    pad_total = keff - 1
    return pad_total // 2, pad_total - pad_total // 2


# ------------------------------------------------------------------ kernels

def _make_conv_kernel(k, s, rate, n, wo, cinp, coutp):
    """Conv + fused BN-statistics kernel for one layer configuration.

    refs = [k*s activation row-slabs] + [weight] + [y, bn_sum, bn_ssq].
    Grid = (Ho,), marked "arbitrary" because bn_sum / bn_ssq are revisited
    accumulator outputs (constant index_map)."""
    nslabs = k * s

    def kernel(*refs):
        slab_refs = refs[:nslabs]
        w_ref = refs[nslabs]
        y_ref, sum_ref, ssq_ref = refs[nslabs + 1], refs[nslabs + 2], refs[nslabs + 3]
        h = pl.program_id(0)

        accs = [jnp.zeros((wo, coutp), jnp.float32) for _ in range(n)]
        for ki in range(k):
            for kj in range(k):
                phase = (kj * rate) % s
                off = (kj * rate) // s
                xr = slab_refs[ki * s + phase]
                wt = w_ref[ki * k + kj]                       # [cinp, coutp] bf16
                for b in range(n):
                    xb = xr[b, 0, off:off + wo, :]            # [wo, cinp] bf16
                    accs[b] = accs[b] + jnp.dot(
                        xb, wt, preferred_element_type=jnp.float32)

        tot_s = jnp.zeros((1, coutp), jnp.float32)
        tot_q = jnp.zeros((1, coutp), jnp.float32)
        for b in range(n):
            y_ref[b, 0] = accs[b].astype(y_ref.dtype)         # bf16 raw conv out
            tot_s = tot_s + jnp.sum(accs[b], axis=0, keepdims=True)
            tot_q = tot_q + jnp.sum(accs[b] * accs[b], axis=0, keepdims=True)

        @pl.when(h == 0)
        def _():
            sum_ref[...] = jnp.zeros_like(sum_ref)
            ssq_ref[...] = jnp.zeros_like(ssq_ref)

        sum_ref[...] += tot_s
        ssq_ref[...] += tot_q

    return kernel


def _affine_relu_kernel(y_ref, scale_ref, shift_ref, o_ref):
    # y*scale + shift  ==  gamma*(y-mean)*rsqrt(var+eps) + beta, fused ReLU.
    y = y_ref[...].astype(jnp.float32)
    o = jnp.maximum(y * scale_ref[0] + shift_ref[0], 0.0)
    o_ref[...] = o.astype(o_ref.dtype)


# ------------------------------------------------------------ pallas_call(s)

def _conv_bnstats(phases, w, k, s, rate, n, ho, wo, wph, cinp, coutp):
    """Runs the conv kernel.  `phases` are the s column-phase views of the
    padded activation; the same phase array is passed once per tap row with a
    different row index_map (H block = 1 -> element-level row offsets)."""
    kernel = _make_conv_kernel(k, s, rate, n, wo, cinp, coutp)

    def row_map(ki):
        return lambda h: (0, h * s + ki * rate, 0, 0)

    in_specs, operands = [], []
    for ki in range(k):
        for p in range(s):
            in_specs.append(pl.BlockSpec((n, 1, wph, cinp), row_map(ki)))
            operands.append(phases[p])
    # whole per-layer weight stays VMEM-resident (constant index_map).
    in_specs.append(pl.BlockSpec((k * k, cinp, coutp), lambda h: (0, 0, 0)))
    operands.append(w)

    return pl.pallas_call(
        kernel,
        out_shape=(jax.ShapeDtypeStruct((n, ho, wo, coutp), jnp.bfloat16),
                   jax.ShapeDtypeStruct((1, coutp), jnp.float32),
                   jax.ShapeDtypeStruct((1, coutp), jnp.float32)),
        grid=(ho,),
        in_specs=in_specs,
        out_specs=(pl.BlockSpec((n, 1, wo, coutp), lambda h: (0, h, 0, 0)),
                   pl.BlockSpec((1, coutp), lambda h: (0, 0)),
                   pl.BlockSpec((1, coutp), lambda h: (0, 0))),
        compiler_params=pltpu.CompilerParams(
            dimension_semantics=("arbitrary",),
            vmem_limit_bytes=_VMEM_LIMIT),
    )(*operands)


def _pick_row_tile(ho, n, wo):
    # biggest divisor of Ho keeping ~<=2048 rows per affine block
    cap = max(1, 2048 // max(1, n * wo))
    th = 1
    for d in range(1, ho + 1):
        if ho % d == 0 and d <= cap:
            th = d
    return th


def _affine_relu(y, scale, shift):
    n, ho, wo, c = y.shape
    th = _pick_row_tile(ho, n, wo)
    return pl.pallas_call(
        _affine_relu_kernel,
        out_shape=jax.ShapeDtypeStruct((n, ho, wo, c), jnp.bfloat16),
        grid=(ho // th,),
        in_specs=[pl.BlockSpec((n, th, wo, c), lambda i: (0, i, 0, 0)),
                  pl.BlockSpec((1, c), lambda i: (0, 0)),
                  pl.BlockSpec((1, c), lambda i: (0, 0))],
        out_specs=pl.BlockSpec((n, th, wo, c), lambda i: (0, i, 0, 0)),
        compiler_params=pltpu.CompilerParams(
            dimension_semantics=("parallel",),
            vmem_limit_bytes=_VMEM_LIMIT),
    )(y, scale, shift)


# ------------------------------------------------------- data preparation

def _phase_views(x, k, stride, rate):
    """Pad (SAME) and split into `stride` column-phase views so every
    in-kernel column tap is a contiguous static slice."""
    n, h, wd, c = x.shape
    pad_beg, pad_end = _same_pads(k, stride, rate)
    xp = jnp.pad(x.astype(jnp.bfloat16),
                 ((0, 0), (pad_beg, pad_end), (pad_beg, pad_end), (0, 0)))
    hp, wp = h + pad_beg + pad_end, wd + pad_beg + pad_end
    span = (k - 1) * rate + 1
    ho = (hp - span) // stride + 1
    wo = (wp - span) // stride + 1
    wph = -(-wp // stride)
    wextra = wph * stride - wp
    if wextra:
        xp = jnp.pad(xp, ((0, 0), (0, 0), (0, wextra), (0, 0)))
    phases = [xp[:, :, p::stride, :] for p in range(stride)]
    return phases, ho, wo, wph


def _stem_im2col(x, k, stride, rate, kdim):
    """Stem (Cin=3): fold the k*k taps into the contraction: [N,Ho,Wo,kdim]."""
    n, h, wd, c = x.shape
    pad_beg, pad_end = _same_pads(k, stride, rate)
    xp = jnp.pad(x, ((0, 0), (pad_beg, pad_end), (pad_beg, pad_end), (0, 0)))
    hp, wp = h + pad_beg + pad_end, wd + pad_beg + pad_end
    span = (k - 1) * rate + 1
    ho = (hp - span) // stride + 1
    wo = (wp - span) // stride + 1
    cols = []
    for ki in range(k):
        for kj in range(k):
            sl = xp[:, ki * rate: ki * rate + (ho - 1) * stride + 1: stride,
                       kj * rate: kj * rate + (wo - 1) * stride + 1: stride, :]
            cols.append(sl)
    xim = jnp.concatenate(cols, axis=-1)                 # [N, Ho, Wo, k*k*c]
    if kdim > k * k * c:
        xim = jnp.pad(xim, ((0, 0), (0, 0), (0, 0), (0, kdim - k * k * c)))
    return xim.astype(jnp.bfloat16), ho, wo


# --------------------------------------------------------------- conv layer

def conv2d_same(x_nhwc, params, cin, k, stride, rate=1):
    """Conv2dSame unit: SAME conv (no bias) -> BatchNorm (train mode) -> ReLU."""
    w, gamma, beta = params
    n = x_nhwc.shape[0]
    coutp = w.shape[2]

    if _folds(cin, k):
        xim, ho, wo = _stem_im2col(x_nhwc, k, stride, rate, kdim=w.shape[1])
        phases, kk, ss, rr, wph, cinp = [xim], 1, 1, 1, wo, w.shape[1]
    else:
        phases, ho, wo, wph = _phase_views(x_nhwc, k, stride, rate)
        kk, ss, rr, cinp = k, stride, rate, w.shape[1]

    y, bsum, bssq = _conv_bnstats(phases, w, kk, ss, rr, n, ho, wo, wph,
                                  cinp, coutp)

    # Training-mode BatchNorm2d statistics over N*Ho*Wo (biased variance).
    # NOTE: E[x^2]-E[x]^2 in f32 from the in-kernel f32 accumulator; clamped.
    pcnt = float(n * ho * wo)
    mean = bsum[0] / pcnt
    var = jnp.maximum(bssq[0] / pcnt - mean * mean, 0.0)
    scale = gamma * jax.lax.rsqrt(var + _BN_EPS)
    shift = beta - mean * scale

    return _affine_relu(y, scale[None, :], shift[None, :])


# ------------------------------------------------------- model construction

# Entry flow of Xception: Conv2dSame(3,32,3,s2), Conv2dSame(32,64,3,s1).
_ENTRY = [(3, 32, 3, 2), (32, 64, 3, 1)]
# Synthetic StackBlocksDense (output_stride=None -> rate=1, nominal strides);
# first block's output is the low_level_features (128 channels).
_BLOCKS = [[(64, 128, 3, 2)], [(128, 256, 3, 2)]]


def _init_unit(key, cin, cout, k, cin_pad, cout_pad):
    kw, kg, kb = jax.random.split(key, 3)
    w = 0.05 * jax.random.normal(kw, (k * k, cin, cout), jnp.float32)
    if _folds(cin, k):
        kdim = _round_up(k * k * cin, 32)
        wp = jnp.zeros((1, kdim, cout_pad), jnp.float32)
        wp = wp.at[0, :k * k * cin, :cout].set(w.reshape(k * k * cin, cout))
    else:
        wp = jnp.zeros((k * k, cin_pad, cout_pad), jnp.float32)
        wp = wp.at[:, :cin, :cout].set(w)
    gamma = jnp.zeros((cout_pad,), jnp.float32).at[:cout].set(
        1.0 + 0.1 * jax.random.normal(kg, (cout,), jnp.float32))
    beta = jnp.zeros((cout_pad,), jnp.float32).at[:cout].set(
        0.1 * jax.random.normal(kb, (cout,), jnp.float32))
    # bf16 weights (MXU peak dtype); accumulation stays in f32 in-kernel.
    return (wp.astype(jnp.bfloat16), gamma, beta)


def init_xception_params(key):
    units = _ENTRY + [u for blk in _BLOCKS for u in blk]
    keys = jax.random.split(key, len(units))
    params, prev_pad = [], 3           # raw RGB input is not channel-padded
    for kk, (cin, cout, k, _s) in zip(keys, units):
        cout_pad = _cpad(cout)
        params.append(_init_unit(kk, cin, cout, k, prev_pad, cout_pad))
        prev_pad = cout_pad
    n_entry = len(_ENTRY)
    return {"entry": params[:n_entry], "blocks": params[n_entry:]}


@jax.jit
def xception_forward(params, x_nchw):
    x = jnp.transpose(x_nchw, (0, 2, 3, 1)).astype(jnp.float32)   # NCHW->NHWC
    # self._layers[0], self._layers[1]
    for (cin, _cout, k, s), prm in zip(_ENTRY, params["entry"]):
        x = conv2d_same(x, prm, cin, k, s)
    # self._layers[2] : StackBlocksDense._blocks (Sequential of units)
    units = [u for blk in _BLOCKS for u in blk]
    low, low_c = None, None
    for idx, ((cin, cout, k, s), prm) in enumerate(zip(units, params["blocks"])):
        x = conv2d_same(x, prm, cin, k, s)
        if idx == 0:
            low, low_c = x, cout                       # _blocks[0](x2)
    # self._layers[3] : AdaptiveAvgPool2d((1,1)) -> global spatial mean.
    last_c = units[-1][1]
    pooled = jnp.mean(x.astype(jnp.float32), axis=(1, 2))[:, :last_c]
    output = pooled[:, :, None, None]                  # NCHW [N, C, 1, 1]
    low_level_features = jnp.transpose(
        low[..., :low_c].astype(jnp.float32), (0, 3, 1, 2))        # NCHW
    # TODO(synk): Dropout2d + logits 1x1 conv (only when num_classes is set)
    #             are not exercised (num_classes=None, global_pool=True).
    return output, low_level_features


if __name__ == "__main__":
    key = jax.random.PRNGKey(0)
    k_param, k_x = jax.random.split(key)
    params = init_xception_params(k_param)
    x = jax.random.normal(k_x, (2, 3, 16, 16), jnp.float32)   # NCHW, 3 chans
    out, low = xception_forward(params, x)
    jax.block_until_ready((out, low))
    assert out.shape == (2, 256, 1, 1), out.shape
    assert low.shape == (2, 128, 4, 4), low.shape
    assert bool(jnp.all(jnp.isfinite(out))) and bool(jnp.all(jnp.isfinite(low)))
    print("KERNEL_OK")
</pallas_src>

<mosaic_0001>
module attributes {stable_mosaic.version = 11 : i64} {
  func.func @_affine_relu_kernel(%arg0: i32, %arg1: memref<2x8x8x128xbf16, #tpu.memory_space<vmem>>, %arg2: memref<1x128xf32, #tpu.memory_space<vmem>>, %arg3: memref<1x128xf32, #tpu.memory_space<vmem>>, %arg4: memref<2x8x8x128xbf16, #tpu.memory_space<vmem>>) attributes {dimension_semantics = [#tpu.dimension_semantics<parallel>], iteration_bounds = array<i64: 1>, scalar_prefetch = 0 : i64, scratch_operands = 0 : i64, tpu.core_type = #tpu.core_type<tc>, window_params = [{transform_indices = @transform_0, window_bounds = array<i64: 2, 8, 8, 128>}, {pipeline_mode = #tpu.pipeline_mode<synchronous>, transform_indices = @transform_1, window_bounds = array<i64: 1, 128>}, {pipeline_mode = #tpu.pipeline_mode<synchronous>, transform_indices = @transform_2, window_bounds = array<i64: 1, 128>}, {transform_indices = @transform_3, window_bounds = array<i64: 2, 8, 8, 128>}]} {
    %c0 = arith.constant 0 : index
    %c0_0 = arith.constant 0 : index
    %c0_1 = arith.constant 0 : index
    %c0_2 = arith.constant 0 : index
    %0 = vector.load %arg1[%c0, %c0_0, %c0_1, %c0_2] : memref<2x8x8x128xbf16, #tpu.memory_space<vmem>>, vector<2x8x8x128xbf16>
    %1 = arith.extf %0 : vector<2x8x8x128xbf16> to vector<2x8x8x128xf32>
    %c0_3 = arith.constant 0 : index
    %c0_4 = arith.constant 0 : index
    %2 = vector.load %arg2[%c0_3, %c0_4] : memref<1x128xf32, #tpu.memory_space<vmem>>, vector<1x128xf32>
    %3 = vector.shape_cast %2 : vector<1x128xf32> to vector<128xf32>
    %4 = vector.shape_cast %3 : vector<128xf32> to vector<1x1x1x128xf32>
    %5 = vector.broadcast %4 : vector<1x1x1x128xf32> to vector<2x8x8x128xf32>
    %6 = arith.mulf %1, %5 : vector<2x8x8x128xf32>
    %c0_5 = arith.constant 0 : index
    %c0_6 = arith.constant 0 : index
    %7 = vector.load %arg3[%c0_5, %c0_6] : memref<1x128xf32, #tpu.memory_space<vmem>>, vector<1x128xf32>
    %8 = vector.shape_cast %7 : vector<1x128xf32> to vector<128xf32>
    %9 = vector.shape_cast %8 : vector<128xf32> to vector<1x1x1x128xf32>
    %10 = vector.broadcast %9 : vector<1x1x1x128xf32> to vector<2x8x8x128xf32>
    %11 = arith.addf %6, %10 : vector<2x8x8x128xf32>
    %cst = arith.constant 0.000000e+00 : f32
    %12 = vector.broadcast %cst : f32 to vector<2x8x8x128xf32>
    %13 = arith.maximumf %11, %12 : vector<2x8x8x128xf32>
    %14 = arith.truncf %13 : vector<2x8x8x128xf32> to vector<2x8x8x128xbf16>
    %c0_7 = arith.constant 0 : index
    %c0_8 = arith.constant 0 : index
    %c0_9 = arith.constant 0 : index
    %c0_10 = arith.constant 0 : index
    %15 = vector.load %arg4[%c0_7, %c0_8, %c0_9, %c0_10] : memref<2x8x8x128xbf16, #tpu.memory_space<vmem>>, vector<2x8x8x128xbf16>
    tpu.vector_store %arg4[%c0_7, %c0_8, %c0_9, %c0_10], %14 {strides = array<i32>} : memref<2x8x8x128xbf16, #tpu.memory_space<vmem>>, vector<2x8x8x128xbf16>,
    return
  }
  func.func @transform_0(%arg0: i32) -> (i32, i32, i32, i32) {
    %c0_i32 = arith.constant 0 : i32
    %c0_i32_0 = arith.constant 0 : i32
    %c0_i32_1 = arith.constant 0 : i32
    %c0_i32_2 = arith.constant 0 : i32
    return %c0_i32, %arg0, %c0_i32_0, %c0_i32_1 : i32, i32, i32, i32
  }
  func.func @transform_1(%arg0: i32) -> (i32, i32) {
    %c0_i32 = arith.constant 0 : i32
    %c0_i32_0 = arith.constant 0 : i32
    %c0_i32_1 = arith.constant 0 : i32
    return %c0_i32, %c0_i32_0 : i32, i32
  }
  func.func @transform_2(%arg0: i32) -> (i32, i32) {
    %c0_i32 = arith.constant 0 : i32
    %c0_i32_0 = arith.constant 0 : i32
    %c0_i32_1 = arith.constant 0 : i32
    return %c0_i32, %c0_i32_0 : i32, i32
  }
  func.func @transform_3(%arg0: i32) -> (i32, i32, i32, i32) {
    %c0_i32 = arith.constant 0 : i32
    %c0_i32_0 = arith.constant 0 : i32
    %c0_i32_1 = arith.constant 0 : i32
    %c0_i32_2 = arith.constant 0 : i32
    return %c0_i32, %arg0, %c0_i32_0, %c0_i32_1 : i32, i32, i32, i32
  }
}

module attributes {stable_mosaic.version = 11 : i64} {
  func.func @kernel(%arg0: i32, %arg1: memref<2x1x8x32xbf16, #tpu.memory_space<vmem>>, %arg2: memref<1x32x128xbf16, #tpu.memory_space<vmem>>, %arg3: memref<2x1x8x128xbf16, #tpu.memory_space<vmem>>, %arg4: memref<1x128xf32, #tpu.memory_space<vmem>>, %arg5: memref<1x128xf32, #tpu.memory_space<vmem>>) attributes {dimension_semantics = [#tpu.dimension_semantics<arbitrary>], iteration_bounds = array<i64: 8>, scalar_prefetch = 0 : i64, scratch_operands = 0 : i64, tpu.core_type = #tpu.core_type<tc>, window_params = [{transform_indices = @transform_0, window_bounds = array<i64: 2, 1, 8, 32>}, {pipeline_mode = #tpu.pipeline_mode<synchronous>, transform_indices = @transform_1, window_bounds = array<i64: 1, 32, 128>}, {transform_indices = @transform_2, window_bounds = array<i64: 2, 1, 8, 128>}, {pipeline_mode = #tpu.pipeline_mode<synchronous>, transform_indices = @transform_3, window_bounds = array<i64: 1, 128>}, {pipeline_mode = #tpu.pipeline_mode<synchronous>, transform_indices = @transform_4, window_bounds = array<i64: 1, 128>}]} {
    %cst = arith.constant 0.000000e+00 : f32
    %0 = vector.broadcast %cst : f32 to vector<8x128xf32>
    %cst_0 = arith.constant 0.000000e+00 : f32
    %1 = vector.broadcast %cst_0 : f32 to vector<8x128xf32>
    %c0 = arith.constant 0 : index
    %c0_1 = arith.constant 0 : index
    %c0_2 = arith.constant 0 : index
    %2 = vector.load %arg2[%c0, %c0_1, %c0_2] : memref<1x32x128xbf16, #tpu.memory_space<vmem>>, vector<1x32x128xbf16>
    %3 = vector.shape_cast %2 : vector<1x32x128xbf16> to vector<32x128xbf16>
    %c0_3 = arith.constant 0 : index
    %c0_4 = arith.constant 0 : index
    %c0_5 = arith.constant 0 : index
    %c0_6 = arith.constant 0 : index
    %4 = vector.load %arg1[%c0_3, %c0_4, %c0_5, %c0_6] : memref<2x1x8x32xbf16, #tpu.memory_space<vmem>>, vector<1x1x8x32xbf16>
    %5 = vector.shape_cast %4 : vector<1x1x8x32xbf16> to vector<8x32xbf16>
    %cst_7 = arith.constant dense<0.000000e+00> : vector<8x128xf32>
    %6 = tpu.matmul %5, %3, %cst_7 {dimension_numbers = #tpu.dot_dimension_numbers<[1], [0], [0], [1], [0, 0, 1, 1], [], []>} : vector<8x32xbf16>, vector<32x128xbf16>, vector<8x128xf32> -> vector<8x128xf32>
    %7 = arith.addf %0, %6 : vector<8x128xf32>
    %c1 = arith.constant 1 : index
    %c0_8 = arith.constant 0 : index
    %c0_9 = arith.constant 0 : index
    %c0_10 = arith.constant 0 : index
    %8 = vector.load %arg1[%c1, %c0_8, %c0_9, %c0_10] : memref<2x1x8x32xbf16, #tpu.memory_space<vmem>>, vector<1x1x8x32xbf16>
    %9 = vector.shape_cast %8 : vector<1x1x8x32xbf16> to vector<8x32xbf16>
    %cst_11 = arith.constant dense<0.000000e+00> : vector<8x128xf32>
    %10 = tpu.matmul %9, %3, %cst_11 {dimension_numbers = #tpu.dot_dimension_numbers<[1], [0], [0], [1], [0, 0, 1, 1], [], []>} : vector<8x32xbf16>, vector<32x128xbf16>, vector<8x128xf32> -> vector<8x128xf32>
    %11 = arith.addf %1, %10 : vector<8x128xf32>
    %cst_12 = arith.constant 0.000000e+00 : f32
    %12 = vector.broadcast %cst_12 : f32 to vector<1x128xf32>
    %cst_13 = arith.constant 0.000000e+00 : f32
    %13 = vector.broadcast %cst_13 : f32 to vector<1x128xf32>
    %14 = arith.truncf %7 : vector<8x128xf32> to vector<8x128xbf16>
    %c0_14 = arith.constant 0 : index
    %c0_15 = arith.constant 0 : index
    %c0_16 = arith.constant 0 : index
    %c0_17 = arith.constant 0 : index
    %15 = vector.load %arg3[%c0_14, %c0_15, %c0_16, %c0_17] : memref<2x1x8x128xbf16, #tpu.memory_space<vmem>>, vector<1x1x8x128xbf16>
    %16 = vector.shape_cast %15 : vector<1x1x8x128xbf16> to vector<8x128xbf16>
    %17 = vector.shape_cast %14 : vector<8x128xbf16> to vector<1x1x8x128xbf16>
    tpu.vector_store %arg3[%c0_14, %c0_15, %c0_16, %c0_17], %17 {strides = array<i32>} : memref<2x1x8x128xbf16, #tpu.memory_space<vmem>>, vector<1x1x8x128xbf16>,
    %cst_18 = arith.constant dense<0.000000e+00> : vector<128xf32>
    %18 = vector.multi_reduction <add>, %7, %cst_18 [0] : vector<8x128xf32> to vector<128xf32>
    %19 = vector.shape_cast %18 : vector<128xf32> to vector<1x128xf32>
    %20 = arith.addf %12, %19 : vector<1x128xf32>
    %21 = arith.mulf %7, %7 : vector<8x128xf32>
    %cst_19 = arith.constant dense<0.000000e+00> : vector<128xf32>
    %22 = vector.multi_reduction <add>, %21, %cst_19 [0] : vector<8x128xf32> to vector<128xf32>
    %23 = vector.shape_cast %22 : vector<128xf32> to vector<1x128xf32>
    %24 = arith.addf %13, %23 : vector<1x128xf32>
    %25 = arith.truncf %11 : vector<8x128xf32> to vector<8x128xbf16>
    %c1_20 = arith.constant 1 : index
    %c0_21 = arith.constant 0 : index
    %c0_22 = arith.constant 0 : index
    %c0_23 = arith.constant 0 : index
    %26 = vector.load %arg3[%c1_20, %c0_21, %c0_22, %c0_23] : memref<2x1x8x128xbf16, #tpu.memory_space<vmem>>, vector<1x1x8x128xbf16>
    %27 = vector.shape_cast %26 : vector<1x1x8x128xbf16> to vector<8x128xbf16>
    %28 = vector.shape_cast %25 : vector<8x128xbf16> to vector<1x1x8x128xbf16>
    tpu.vector_store %arg3[%c1_20, %c0_21, %c0_22, %c0_23], %28 {strides = array<i32>} : memref<2x1x8x128xbf16, #tpu.memory_space<vmem>>, vector<1x1x8x128xbf16>,
    %cst_24 = arith.constant dense<0.000000e+00> : vector<128xf32>
    %29 = vector.multi_reduction <add>, %11, %cst_24 [0] : vector<8x128xf32> to vector<128xf32>
    %30 = vector.shape_cast %29 : vector<128xf32> to vector<1x128xf32>
    %31 = arith.addf %20, %30 : vector<1x128xf32>
    %32 = arith.mulf %11, %11 : vector<8x128xf32>
    %cst_25 = arith.constant dense<0.000000e+00> : vector<128xf32>
    %33 = vector.multi_reduction <add>, %32, %cst_25 [0] : vector<8x128xf32> to vector<128xf32>
    %34 = vector.shape_cast %33 : vector<128xf32> to vector<1x128xf32>
    %35 = arith.addf %24, %34 : vector<1x128xf32>
    %c0_i32 = arith.constant 0 : i32
    %36 = arith.cmpi eq, %arg0, %c0_i32 : i32
    %37 = arith.extui %36 : i1 to i32
    %c0_i32_26 = arith.constant 0 : i32
    %38 = arith.cmpi ne, %37, %c0_i32_26 : i32
    scf.if %38 {
      %cst_35 = arith.constant 0.000000e+00 : f32
      %45 = vector.broadcast %cst_35 : f32 to vector<1x128xf32>
      %c0_36 = arith.constant 0 : index
      %c0_37 = arith.constant 0 : index
      %46 = vector.load %arg4[%c0_36, %c0_37] : memref<1x128xf32, #tpu.memory_space<vmem>>, vector<1x128xf32>
      tpu.vector_store %arg4[%c0_36, %c0_37], %45 {strides = array<i32>} : memref<1x128xf32, #tpu.memory_space<vmem>>, vector<1x128xf32>,
      %cst_38 = arith.constant 0.000000e+00 : f32
      %47 = vector.broadcast %cst_38 : f32 to vector<1x128xf32>
      %c0_39 = arith.constant 0 : index
      %c0_40 = arith.constant 0 : index
      %48 = vector.load %arg5[%c0_39, %c0_40] : memref<1x128xf32, #tpu.memory_space<vmem>>, vector<1x128xf32>
      tpu.vector_store %arg5[%c0_39, %c0_40], %47 {strides = array<i32>} : memref<1x128xf32, #tpu.memory_space<vmem>>, vector<1x128xf32>,
    } else {
    }
    %c0_27 = arith.constant 0 : index
    %c0_28 = arith.constant 0 : index
    %39 = vector.load %arg4[%c0_27, %c0_28] : memref<1x128xf32, #tpu.memory_space<vmem>>, vector<1x128xf32>
    %40 = arith.addf %39, %31 : vector<1x128xf32>
    %c0_29 = arith.constant 0 : index
    %c0_30 = arith.constant 0 : index
    %41 = vector.load %arg4[%c0_29, %c0_30] : memref<1x128xf32, #tpu.memory_space<vmem>>, vector<1x128xf32>
    tpu.vector_store %arg4[%c0_29, %c0_30], %40 {strides = array<i32>} : memref<1x128xf32, #tpu.memory_space<vmem>>, vector<1x128xf32>,
    %c0_31 = arith.constant 0 : index
    %c0_32 = arith.constant 0 : index
    %42 = vector.load %arg5[%c0_31, %c0_32] : memref<1x128xf32, #tpu.memory_space<vmem>>, vector<1x128xf32>
    %43 = arith.addf %42, %35 : vector<1x128xf32>
    %c0_33 = arith.constant 0 : index
    %c0_34 = arith.constant 0 : index
    %44 = vector.load %arg5[%c0_33, %c0_34] : memref<1x128xf32, #tpu.memory_space<vmem>>, vector<1x128xf32>
    tpu.vector_store %arg5[%c0_33, %c0_34], %43 {strides = array<i32>} : memref<1x128xf32, #tpu.memory_space<vmem>>, vector<1x128xf32>,
    return
  }
  func.func @transform_0(%arg0: i32) -> (i32, i32, i32, i32) {
    %c1_i32 = arith.constant 1 : i32
    %0 = arith.muli %arg0, %c1_i32 : i32
    %c0_i32 = arith.constant 0 : i32
    %1 = arith.addi %0, %c0_i32 : i32
    %c0_i32_0 = arith.constant 0 : i32
    %c0_i32_1 = arith.constant 0 : i32
    %c0_i32_2 = arith.constant 0 : i32
    %c0_i32_3 = arith.constant 0 : i32
    return %c0_i32_0, %1, %c0_i32_1, %c0_i32_2 : i32, i32, i32, i32
  }
  func.func @transform_1(%arg0: i32) -> (i32, i32, i32) {
    %c0_i32 = arith.constant 0 : i32
    %c0_i32_0 = arith.constant 0 : i32
    %c0_i32_1 = arith.constant 0 : i32
    %c0_i32_2 = arith.constant 0 : i32
    return %c0_i32, %c0_i32_0, %c0_i32_1 : i32, i32, i32
  }
  func.func @transform_2(%arg0: i32) -> (i32, i32, i32, i32) {
    %c0_i32 = arith.constant 0 : i32
    %c0_i32_0 = arith.constant 0 : i32
    %c0_i32_1 = arith.constant 0 : i32
    %c0_i32_2 = arith.constant 0 : i32
    return %c0_i32, %arg0, %c0_i32_0, %c0_i32_1 : i32, i32, i32, i32
  }
  func.func @transform_3(%arg0: i32) -> (i32, i32) {
    %c0_i32 = arith.constant 0 : i32
    %c0_i32_0 = arith.constant 0 : i32
    %c0_i32_1 = arith.constant 0 : i32
    return %c0_i32, %c0_i32_0 : i32, i32
  }
  func.func @transform_4(%arg0: i32) -> (i32, i32) {
    %c0_i32 = arith.constant 0 : i32
    %c0_i32_0 = arith.constant 0 : i32
    %c0_i32_1 = arith.constant 0 : i32
    return %c0_i32, %c0_i32_0 : i32, i32
  }
}

module attributes {stable_mosaic.version = 11 : i64} {
  func.func @kernel(%arg0: i32, %arg1: memref<2x1x10x128xbf16, #tpu.memory_space<vmem>>, %arg2: memref<2x1x10x128xbf16, #tpu.memory_space<vmem>>, %arg3: memref<2x1x10x128xbf16, #tpu.memory_space<vmem>>, %arg4: memref<9x128x128xbf16, #tpu.memory_space<vmem>>, %arg5: memref<2x1x8x128xbf16, #tpu.memory_space<vmem>>, %arg6: memref<1x128xf32, #tpu.memory_space<vmem>>, %arg7: memref<1x128xf32, #tpu.memory_space<vmem>>) attributes {dimension_semantics = [#tpu.dimension_semantics<arbitrary>], iteration_bounds = array<i64: 8>, scalar_prefetch = 0 : i64, scratch_operands = 0 : i64, tpu.core_type = #tpu.core_type<tc>, window_params = [{transform_indices = @transform_0, window_bounds = array<i64: 2, 1, 10, 128>}, {transform_indices = @transform_1, window_bounds = array<i64: 2, 1, 10, 128>}, {transform_indices = @transform_2, window_bounds = array<i64: 2, 1, 10, 128>}, {pipeline_mode = #tpu.pipeline_mode<synchronous>, transform_indices = @transform_3, window_bounds = array<i64: 9, 128, 128>}, {transform_indices = @transform_4, window_bounds = array<i64: 2, 1, 8, 128>}, {pipeline_mode = #tpu.pipeline_mode<synchronous>, transform_indices = @transform_5, window_bounds = array<i64: 1, 128>}, {pipeline_mode = #tpu.pipeline_mode<synchronous>, transform_indices = @transform_6, window_bounds = array<i64: 1, 128>}]} {
    %cst = arith.constant 0.000000e+00 : f32
    %0 = vector.broadcast %cst : f32 to vector<8x128xf32>
    %cst_0 = arith.constant 0.000000e+00 : f32
    %1 = vector.broadcast %cst_0 : f32 to vector<8x128xf32>
    %c0 = arith.constant 0 : index
    %c0_1 = arith.constant 0 : index
    %c0_2 = arith.constant 0 : index
    %2 = vector.load %arg4[%c0, %c0_1, %c0_2] : memref<9x128x128xbf16, #tpu.memory_space<vmem>>, vector<1x128x128xbf16>
    %3 = vector.shape_cast %2 : vector<1x128x128xbf16> to vector<128x128xbf16>
    %c0_3 = arith.constant 0 : index
    %c0_4 = arith.constant 0 : index
    %c0_5 = arith.constant 0 : index
    %c0_6 = arith.constant 0 : index
    %4 = vector.load %arg1[%c0_3, %c0_4, %c0_5, %c0_6] : memref<2x1x10x128xbf16, #tpu.memory_space<vmem>>, vector<1x1x8x128xbf16>
    %5 = vector.shape_cast %4 : vector<1x1x8x128xbf16> to vector<8x128xbf16>
    %cst_7 = arith.constant dense<0.000000e+00> : vector<8x128xf32>
    %6 = tpu.matmul %5, %3, %cst_7 {dimension_numbers = #tpu.dot_dimension_numbers<[1], [0], [0], [1], [0, 0, 1, 1], [], []>} : vector<8x128xbf16>, vector<128x128xbf16>, vector<8x128xf32> -> vector<8x128xf32>
    %7 = arith.addf %0, %6 : vector<8x128xf32>
    %c1 = arith.constant 1 : index
    %c0_8 = arith.constant 0 : index
    %c0_9 = arith.constant 0 : index
    %c0_10 = arith.constant 0 : index
    %8 = vector.load %arg1[%c1, %c0_8, %c0_9, %c0_10] : memref<2x1x10x128xbf16, #tpu.memory_space<vmem>>, vector<1x1x8x128xbf16>
    %9 = vector.shape_cast %8 : vector<1x1x8x128xbf16> to vector<8x128xbf16>
    %cst_11 = arith.constant dense<0.000000e+00> : vector<8x128xf32>
    %10 = tpu.matmul %9, %3, %cst_11 {dimension_numbers = #tpu.dot_dimension_numbers<[1], [0], [0], [1], [0, 0, 1, 1], [], []>} : vector<8x128xbf16>, vector<128x128xbf16>, vector<8x128xf32> -> vector<8x128xf32>
    %11 = arith.addf %1, %10 : vector<8x128xf32>
    %c1_12 = arith.constant 1 : index
    %c0_13 = arith.constant 0 : index
    %c0_14 = arith.constant 0 : index
    %12 = vector.load %arg4[%c1_12, %c0_13, %c0_14] : memref<9x128x128xbf16, #tpu.memory_space<vmem>>, vector<1x128x128xbf16>
    %13 = vector.shape_cast %12 : vector<1x128x128xbf16> to vector<128x128xbf16>
    %c0_15 = arith.constant 0 : index
    %c0_16 = arith.constant 0 : index
    %c1_17 = arith.constant 1 : index
    %c0_18 = arith.constant 0 : index
    %14 = vector.load %arg1[%c0_15, %c0_16, %c1_17, %c0_18] : memref<2x1x10x128xbf16, #tpu.memory_space<vmem>>, vector<1x1x8x128xbf16>
    %15 = vector.shape_cast %14 : vector<1x1x8x128xbf16> to vector<8x128xbf16>
    %cst_19 = arith.constant dense<0.000000e+00> : vector<8x128xf32>
    %16 = tpu.matmul %15, %13, %cst_19 {dimension_numbers = #tpu.dot_dimension_numbers<[1], [0], [0], [1], [0, 0, 1, 1], [], []>} : vector<8x128xbf16>, vector<128x128xbf16>, vector<8x128xf32> -> vector<8x128xf32>
    %17 = arith.addf %7, %16 : vector<8x128xf32>
    %c1_20 = arith.constant 1 : index
    %c0_21 = arith.constant 0 : index
    %c1_22 = arith.constant 1 : index
    %c0_23 = arith.constant 0 : index
    %18 = vector.load %arg1[%c1_20, %c0_21, %c1_22, %c0_23] : memref<2x1x10x128xbf16, #tpu.memory_space<vmem>>, vector<1x1x8x128xbf16>
    %19 = vector.shape_cast %18 : vector<1x1x8x128xbf16> to vector<8x128xbf16>
    %cst_24 = arith.constant dense<0.000000e+00> : vector<8x128xf32>
    %20 = tpu.matmul %19, %13, %cst_24 {dimension_numbers = #tpu.dot_dimension_numbers<[1], [0], [0], [1], [0, 0, 1, 1], [], []>} : vector<8x128xbf16>, vector<128x128xbf16>, vector<8x128xf32> -> vector<8x128xf32>
    %21 = arith.addf %11, %20 : vector<8x128xf32>
    %c2 = arith.constant 2 : index
    %c0_25 = arith.constant 0 : index
    %c0_26 = arith.constant 0 : index
    %22 = vector.load %arg4[%c2, %c0_25, %c0_26] : memref<9x128x128xbf16, #tpu.memory_space<vmem>>, vector<1x128x128xbf16>
    %23 = vector.shape_cast %22 : vector<1x128x128xbf16> to vector<128x128xbf16>
    %c0_27 = arith.constant 0 : index
    %c0_28 = arith.constant 0 : index
    %c2_29 = arith.constant 2 : index
    %c0_30 = arith.constant 0 : index
    %24 = vector.load %arg1[%c0_27, %c0_28, %c2_29, %c0_30] : memref<2x1x10x128xbf16, #tpu.memory_space<vmem>>, vector<1x1x8x128xbf16>
    %25 = vector.shape_cast %24 : vector<1x1x8x128xbf16> to vector<8x128xbf16>
    %cst_31 = arith.constant dense<0.000000e+00> : vector<8x128xf32>
    %26 = tpu.matmul %25, %23, %cst_31 {dimension_numbers = #tpu.dot_dimension_numbers<[1], [0], [0], [1], [0, 0, 1, 1], [], []>} : vector<8x128xbf16>, vector<128x128xbf16>, vector<8x128xf32> -> vector<8x128xf32>
    %27 = arith.addf %17, %26 : vector<8x128xf32>
    %c1_32 = arith.constant 1 : index
    %c0_33 = arith.constant 0 : index
    %c2_34 = arith.constant 2 : index
    %c0_35 = arith.constant 0 : index
    %28 = vector.load %arg1[%c1_32, %c0_33, %c2_34, %c0_35] : memref<2x1x10x128xbf16, #tpu.memory_space<vmem>>, vector<1x1x8x128xbf16>
    %29 = vector.shape_cast %28 : vector<1x1x8x128xbf16> to vector<8x128xbf16>
    %cst_36 = arith.constant dense<0.000000e+00> : vector<8x128xf32>
    %30 = tpu.matmul %29, %23, %cst_36 {dimension_numbers = #tpu.dot_dimension_numbers<[1], [0], [0], [1], [0, 0, 1, 1], [], []>} : vector<8x128xbf16>, vector<128x128xbf16>, vector<8x128xf32> -> vector<8x128xf32>
    %31 = arith.addf %21, %30 : vector<8x128xf32>
    %c3 = arith.constant 3 : index
    %c0_37 = arith.constant 0 : index
    %c0_38 = arith.constant 0 : index
    %32 = vector.load %arg4[%c3, %c0_37, %c0_38] : memref<9x128x128xbf16, #tpu.memory_space<vmem>>, vector<1x128x128xbf16>
    %33 = vector.shape_cast %32 : vector<1x128x128xbf16> to vector<128x128xbf16>
    %c0_39 = arith.constant 0 : index
    %c0_40 = arith.constant 0 : index
    %c0_41 = arith.constant 0 : index
    %c0_42 = arith.constant 0 : index
    %34 = vector.load %arg2[%c0_39, %c0_40, %c0_41, %c0_42] : memref<2x1x10x128xbf16, #tpu.memory_space<vmem>>, vector<1x1x8x128xbf16>
    %35 = vector.shape_cast %34 : vector<1x1x8x128xbf16> to vector<8x128xbf16>
    %cst_43 = arith.constant dense<0.000000e+00> : vector<8x128xf32>
    %36 = tpu.matmul %35, %33, %cst_43 {dimension_numbers = #tpu.dot_dimension_numbers<[1], [0], [0], [1], [0, 0, 1, 1], [], []>} : vector<8x128xbf16>, vector<128x128xbf16>, vector<8x128xf32> -> vector<8x128xf32>
    %37 = arith.addf %27, %36 : vector<8x128xf32>
    %c1_44 = arith.constant 1 : index
    %c0_45 = arith.constant 0 : index
    %c0_46 = arith.constant 0 : index
    %c0_47 = arith.constant 0 : index
    %38 = vector.load %arg2[%c1_44, %c0_45, %c0_46, %c0_47] : memref<2x1x10x128xbf16, #tpu.memory_space<vmem>>, vector<1x1x8x128xbf16>
    %39 = vector.shape_cast %38 : vector<1x1x8x128xbf16> to vector<8x128xbf16>
    %cst_48 = arith.constant dense<0.000000e+00> : vector<8x128xf32>
    %40 = tpu.matmul %39, %33, %cst_48 {dimension_numbers = #tpu.dot_dimension_numbers<[1], [0], [0], [1], [0, 0, 1, 1], [], []>} : vector<8x128xbf16>, vector<128x128xbf16>, vector<8x128xf32> -> vector<8x128xf32>
    %41 = arith.addf %31, %40 : vector<8x128xf32>
    %c4 = arith.constant 4 : index
    %c0_49 = arith.constant 0 : index
    %c0_50 = arith.constant 0 : index
    %42 = vector.load %arg4[%c4, %c0_49, %c0_50] : memref<9x128x128xbf16, #tpu.memory_space<vmem>>, vector<1x128x128xbf16>
    %43 = vector.shape_cast %42 : vector<1x128x128xbf16> to vector<128x128xbf16>
    %c0_51 = arith.constant 0 : index
    %c0_52 = arith.constant 0 : index
    %c1_53 = arith.constant 1 : index
    %c0_54 = arith.constant 0 : index
    %44 = vector.load %arg2[%c0_51, %c0_52, %c1_53, %c0_54] : memref<2x1x10x128xbf16, #tpu.memory_space<vmem>>, vector<1x1x8x128xbf16>
    %45 = vector.shape_cast %44 : vector<1x1x8x128xbf16> to vector<8x128xbf16>
    %cst_55 = arith.constant dense<0.000000e+00> : vector<8x128xf32>
    %46 = tpu.matmul %45, %43, %cst_55 {dimension_numbers = #tpu.dot_dimension_numbers<[1], [0], [0], [1], [0, 0, 1, 1], [], []>} : vector<8x128xbf16>, vector<128x128xbf16>, vector<8x128xf32> -> vector<8x128xf32>
    %47 = arith.addf %37, %46 : vector<8x128xf32>
    %c1_56 = arith.constant 1 : index
    %c0_57 = arith.constant 0 : index
    %c1_58 = arith.constant 1 : index
    %c0_59 = arith.constant 0 : index
    %48 = vector.load %arg2[%c1_56, %c0_57, %c1_58, %c0_59] : memref<2x1x10x128xbf16, #tpu.memory_space<vmem>>, vector<1x1x8x128xbf16>
    %49 = vector.shape_cast %48 : vector<1x1x8x128xbf16> to vector<8x128xbf16>
    %cst_60 = arith.constant dense<0.000000e+00> : vector<8x128xf32>
    %50 = tpu.matmul %49, %43, %cst_60 {dimension_numbers = #tpu.dot_dimension_numbers<[1], [0], [0], [1], [0, 0, 1, 1], [], []>} : vector<8x128xbf16>, vector<128x128xbf16>, vector<8x128xf32> -> vector<8x128xf32>
    %51 = arith.addf %41, %50 : vector<8x128xf32>
    %c5 = arith.constant 5 : index
    %c0_61 = arith.constant 0 : index
    %c0_62 = arith.constant 0 : index
    %52 = vector.load %arg4[%c5, %c0_61, %c0_62] : memref<9x128x128xbf16, #tpu.memory_space<vmem>>, vector<1x128x128xbf16>
    %53 = vector.shape_cast %52 : vector<1x128x128xbf16> to vector<128x128xbf16>
    %c0_63 = arith.constant 0 : index
    %c0_64 = arith.constant 0 : index
    %c2_65 = arith.constant 2 : index
    %c0_66 = arith.constant 0 : index
    %54 = vector.load %arg2[%c0_63, %c0_64, %c2_65, %c0_66] : memref<2x1x10x128xbf16, #tpu.memory_space<vmem>>, vector<1x1x8x128xbf16>
    %55 = vector.shape_cast %54 : vector<1x1x8x128xbf16> to vector<8x128xbf16>
    %cst_67 = arith.constant dense<0.000000e+00> : vector<8x128xf32>
    %56 = tpu.matmul %55, %53, %cst_67 {dimension_numbers = #tpu.dot_dimension_numbers<[1], [0], [0], [1], [0, 0, 1, 1], [], []>} : vector<8x128xbf16>, vector<128x128xbf16>, vector<8x128xf32> -> vector<8x128xf32>
    %57 = arith.addf %47, %56 : vector<8x128xf32>
    %c1_68 = arith.constant 1 : index
    %c0_69 = arith.constant 0 : index
    %c2_70 = arith.constant 2 : index
    %c0_71 = arith.constant 0 : index
    %58 = vector.load %arg2[%c1_68, %c0_69, %c2_70, %c0_71] : memref<2x1x10x128xbf16, #tpu.memory_space<vmem>>, vector<1x1x8x128xbf16>
    %59 = vector.shape_cast %58 : vector<1x1x8x128xbf16> to vector<8x128xbf16>
    %cst_72 = arith.constant dense<0.000000e+00> : vector<8x128xf32>
    %60 = tpu.matmul %59, %53, %cst_72 {dimension_numbers = #tpu.dot_dimension_numbers<[1], [0], [0], [1], [0, 0, 1, 1], [], []>} : vector<8x128xbf16>, vector<128x128xbf16>, vector<8x128xf32> -> vector<8x128xf32>
    %61 = arith.addf %51, %60 : vector<8x128xf32>
    %c6 = arith.constant 6 : index
    %c0_73 = arith.constant 0 : index
    %c0_74 = arith.constant 0 : index
    %62 = vector.load %arg4[%c6, %c0_73, %c0_74] : memref<9x128x128xbf16, #tpu.memory_space<vmem>>, vector<1x128x128xbf16>
    %63 = vector.shape_cast %62 : vector<1x128x128xbf16> to vector<128x128xbf16>
    %c0_75 = arith.constant 0 : index
    %c0_76 = arith.constant 0 : index
    %c0_77 = arith.constant 0 : index
    %c0_78 = arith.constant 0 : index
    %64 = vector.load %arg3[%c0_75, %c0_76, %c0_77, %c0_78] : memref<2x1x10x128xbf16, #tpu.memory_space<vmem>>, vector<1x1x8x128xbf16>
    %65 = vector.shape_cast %64 : vector<1x1x8x128xbf16> to vector<8x128xbf16>
    %cst_79 = arith.constant dense<0.000000e+00> : vector<8x128xf32>
    %66 = tpu.matmul %65, %63, %cst_79 {dimension_numbers = #tpu.dot_dimension_numbers<[1], [0], [0], [1], [0, 0, 1, 1], [], []>} : vector<8x128xbf16>, vector<128x128xbf16>, vector<8x128xf32> -> vector<8x128xf32>
    %67 = arith.addf %57, %66 : vector<8x128xf32>
    %c1_80 = arith.constant 1 : index
    %c0_81 = arith.constant 0 : index
    %c0_82 = arith.constant 0 : index
    %c0_83 = arith.constant 0 : index
    %68 = vector.load %arg3[%c1_80, %c0_81, %c0_82, %c0_83] : memref<2x1x10x128xbf16, #tpu.memory_space<vmem>>, vector<1x1x8x128xbf16>
    %69 = vector.shape_cast %68 : vector<1x1x8x128xbf16> to vector<8x128xbf16>
    %cst_84 = arith.constant dense<0.000000e+00> : vector<8x128xf32>
    %70 = tpu.matmul %69, %63, %cst_84 {dimension_numbers = #tpu.dot_dimension_numbers<[1], [0], [0], [1], [0, 0, 1, 1], [], []>} : vector<8x128xbf16>, vector<128x128xbf16>, vector<8x128xf32> -> vector<8x128xf32>
    %71 = arith.addf %61, %70 : vector<8x128xf32>
    %c7 = arith.constant 7 : index
    %c0_85 = arith.constant 0 : index
    %c0_86 = arith.constant 0 : index
    %72 = vector.load %arg4[%c7, %c0_85, %c0_86] : memref<9x128x128xbf16, #tpu.memory_space<vmem>>, vector<1x128x128xbf16>
    %73 = vector.shape_cast %72 : vector<1x128x128xbf16> to vector<128x128xbf16>
    %c0_87 = arith.constant 0 : index
    %c0_88 = arith.constant 0 : index
    %c1_89 = arith.constant 1 : index
    %c0_90 = arith.constant 0 : index
    %74 = vector.load %arg3[%c0_87, %c0_88, %c1_89, %c0_90] : memref<2x1x10x128xbf16, #tpu.memory_space<vmem>>, vector<1x1x8x128xbf16>
    %75 = vector.shape_cast %74 : vector<1x1x8x128xbf16> to vector<8x128xbf16>
    %cst_91 = arith.constant dense<0.000000e+00> : vector<8x128xf32>
    %76 = tpu.matmul %75, %73, %cst_91 {dimension_numbers = #tpu.dot_dimension_numbers<[1], [0], [0], [1], [0, 0, 1, 1], [], []>} : vector<8x128xbf16>, vector<128x128xbf16>, vector<8x128xf32> -> vector<8x128xf32>
    %77 = arith.addf %67, %76 : vector<8x128xf32>
    %c1_92 = arith.constant 1 : index
    %c0_93 = arith.constant 0 : index
    %c1_94 = arith.constant 1 : index
    %c0_95 = arith.constant 0 : index
    %78 = vector.load %arg3[%c1_92, %c0_93, %c1_94, %c0_95] : memref<2x1x10x128xbf16, #tpu.memory_space<vmem>>, vector<1x1x8x128xbf16>
    %79 = vector.shape_cast %78 : vector<1x1x8x128xbf16> to vector<8x128xbf16>
    %cst_96 = arith.constant dense<0.000000e+00> : vector<8x128xf32>
    %80 = tpu.matmul %79, %73, %cst_96 {dimension_numbers = #tpu.dot_dimension_numbers<[1], [0], [0], [1], [0, 0, 1, 1], [], []>} : vector<8x128xbf16>, vector<128x128xbf16>, vector<8x128xf32> -> vector<8x128xf32>
    %81 = arith.addf %71, %80 : vector<8x128xf32>
    %c8 = arith.constant 8 : index
    %c0_97 = arith.constant 0 : index
    %c0_98 = arith.constant 0 : index
    %82 = vector.load %arg4[%c8, %c0_97, %c0_98] : memref<9x128x128xbf16, #tpu.memory_space<vmem>>, vector<1x128x128xbf16>
    %83 = vector.shape_cast %82 : vector<1x128x128xbf16> to vector<128x128xbf16>
    %c0_99 = arith.constant 0 : index
    %c0_100 = arith.constant 0 : index
    %c2_101 = arith.constant 2 : index
    %c0_102 = arith.constant 0 : index
    %84 = vector.load %arg3[%c0_99, %c0_100, %c2_101, %c0_102] : memref<2x1x10x128xbf16, #tpu.memory_space<vmem>>, vector<1x1x8x128xbf16>
    %85 = vector.shape_cast %84 : vector<1x1x8x128xbf16> to vector<8x128xbf16>
    %cst_103 = arith.constant dense<0.000000e+00> : vector<8x128xf32>
    %86 = tpu.matmul %85, %83, %cst_103 {dimension_numbers = #tpu.dot_dimension_numbers<[1], [0], [0], [1], [0, 0, 1, 1], [], []>} : vector<8x128xbf16>, vector<128x128xbf16>, vector<8x128xf32> -> vector<8x128xf32>
    %87 = arith.addf %77, %86 : vector<8x128xf32>
    %c1_104 = arith.constant 1 : index
    %c0_105 = arith.constant 0 : index
    %c2_106 = arith.constant 2 : index
    %c0_107 = arith.constant 0 : index
    %88 = vector.load %arg3[%c1_104, %c0_105, %c2_106, %c0_107] : memref<2x1x10x128xbf16, #tpu.memory_space<vmem>>, vector<1x1x8x128xbf16>
    %89 = vector.shape_cast %88 : vector<1x1x8x128xbf16> to vector<8x128xbf16>
    %cst_108 = arith.constant dense<0.000000e+00> : vector<8x128xf32>
    %90 = tpu.matmul %89, %83, %cst_108 {dimension_numbers = #tpu.dot_dimension_numbers<[1], [0], [0], [1], [0, 0, 1, 1], [], []>} : vector<8x128xbf16>, vector<128x128xbf16>, vector<8x128xf32> -> vector<8x128xf32>
    %91 = arith.addf %81, %90 : vector<8x128xf32>
    %cst_109 = arith.constant 0.000000e+00 : f32
    %92 = vector.broadcast %cst_109 : f32 to vector<1x128xf32>
    %cst_110 = arith.constant 0.000000e+00 : f32
    %93 = vector.broadcast %cst_110 : f32 to vector<1x128xf32>
    %94 = arith.truncf %87 : vector<8x128xf32> to vector<8x128xbf16>
    %c0_111 = arith.constant 0 : index
    %c0_112 = arith.constant 0 : index
    %c0_113 = arith.constant 0 : index
    %c0_114 = arith.constant 0 : index
    %95 = vector.load %arg5[%c0_111, %c0_112, %c0_113, %c0_114] : memref<2x1x8x128xbf16, #tpu.memory_space<vmem>>, vector<1x1x8x128xbf16>
    %96 = vector.shape_cast %95 : vector<1x1x8x128xbf16> to vector<8x128xbf16>
    %97 = vector.shape_cast %94 : vector<8x128xbf16> to vector<1x1x8x128xbf16>
    tpu.vector_store %arg5[%c0_111, %c0_112, %c0_113, %c0_114], %97 {strides = array<i32>} : memref<2x1x8x128xbf16, #tpu.memory_space<vmem>>, vector<1x1x8x128xbf16>,
    %cst_115 = arith.constant dense<0.000000e+00> : vector<128xf32>
    %98 = vector.multi_reduction <add>, %87, %cst_115 [0] : vector<8x128xf32> to vector<128xf32>
    %99 = vector.shape_cast %98 : vector<128xf32> to vector<1x128xf32>
    %100 = arith.addf %92, %99 : vector<1x128xf32>
    %101 = arith.mulf %87, %87 : vector<8x128xf32>
    %cst_116 = arith.constant dense<0.000000e+00> : vector<128xf32>
    %102 = vector.multi_reduction <add>, %101, %cst_116 [0] : vector<8x128xf32> to vector<128xf32>
    %103 = vector.shape_cast %102 : vector<128xf32> to vector<1x128xf32>
    %104 = arith.addf %93, %103 : vector<1x128xf32>
    %105 = arith.truncf %91 : vector<8x128xf32> to vector<8x128xbf16>
    %c1_117 = arith.constant 1 : index
    %c0_118 = arith.constant 0 : index
    %c0_119 = arith.constant 0 : index
    %c0_120 = arith.constant 0 : index
    %106 = vector.load %arg5[%c1_117, %c0_118, %c0_119, %c0_120] : memref<2x1x8x128xbf16, #tpu.memory_space<vmem>>, vector<1x1x8x128xbf16>
    %107 = vector.shape_cast %106 : vector<1x1x8x128xbf16> to vector<8x128xbf16>
    %108 = vector.shape_cast %105 : vector<8x128xbf16> to vector<1x1x8x128xbf16>
    tpu.vector_store %arg5[%c1_117, %c0_118, %c0_119, %c0_120], %108 {strides = array<i32>} : memref<2x1x8x128xbf16, #tpu.memory_space<vmem>>, vector<1x1x8x128xbf16>,
    %cst_121 = arith.constant dense<0.000000e+00> : vector<128xf32>
    %109 = vector.multi_reduction <add>, %91, %cst_121 [0] : vector<8x128xf32> to vector<128xf32>
    %110 = vector.shape_cast %109 : vector<128xf32> to vector<1x128xf32>
    %111 = arith.addf %100, %110 : vector<1x128xf32>
    %112 = arith.mulf %91, %91 : vector<8x128xf32>
    %cst_122 = arith.constant dense<0.000000e+00> : vector<128xf32>
    %113 = vector.multi_reduction <add>, %112, %cst_122 [0] : vector<8x128xf32> to vector<128xf32>
    %114 = vector.shape_cast %113 : vector<128xf32> to vector<1x128xf32>
    %115 = arith.addf %104, %114 : vector<1x128xf32>
    %c0_i32 = arith.constant 0 : i32
    %116 = arith.cmpi eq, %arg0, %c0_i32 : i32
    %117 = arith.extui %116 : i1 to i32
    %c0_i32_123 = arith.constant 0 : i32
    %118 = arith.cmpi ne, %117, %c0_i32_123 : i32
    scf.if %118 {
      %cst_132 = arith.constant 0.000000e+00 : f32
      %125 = vector.broadcast %cst_132 : f32 to vector<1x128xf32>
      %c0_133 = arith.constant 0 : index
      %c0_134 = arith.constant 0 : index
      %126 = vector.load %arg6[%c0_133, %c0_134] : memref<1x128xf32, #tpu.memory_space<vmem>>, vector<1x128xf32>
      tpu.vector_store %arg6[%c0_133, %c0_134], %125 {strides = array<i32>} : memref<1x128xf32, #tpu.memory_space<vmem>>, vector<1x128xf32>,
      %cst_135 = arith.constant 0.000000e+00 : f32
      %127 = vector.broadcast %cst_135 : f32 to vector<1x128xf32>
      %c0_136 = arith.constant 0 : index
      %c0_137 = arith.constant 0 : index
      %128 = vector.load %arg7[%c0_136, %c0_137] : memref<1x128xf32, #tpu.memory_space<vmem>>, vector<1x128xf32>
      tpu.vector_store %arg7[%c0_136, %c0_137], %127 {strides = array<i32>} : memref<1x128xf32, #tpu.memory_space<vmem>>, vector<1x128xf32>,
    } else {
    }
    %c0_124 = arith.constant 0 : index
    %c0_125 = arith.constant 0 : index
    %119 = vector.load %arg6[%c0_124, %c0_125] : memref<1x128xf32, #tpu.memory_space<vmem>>, vector<1x128xf32>
    %120 = arith.addf %119, %111 : vector<1x128xf32>
    %c0_126 = arith.constant 0 : index
    %c0_127 = arith.constant 0 : index
    %121 = vector.load %arg6[%c0_126, %c0_127] : memref<1x128xf32, #tpu.memory_space<vmem>>, vector<1x128xf32>
    tpu.vector_store %arg6[%c0_126, %c0_127], %120 {strides = array<i32>} : memref<1x128xf32, #tpu.memory_space<vmem>>, vector<1x128xf32>,
    %c0_128 = arith.constant 0 : index
    %c0_129 = arith.constant 0 : index
    %122 = vector.load %arg7[%c0_128, %c0_129] : memref<1x128xf32, #tpu.memory_space<vmem>>, vector<1x128xf32>
    %123 = arith.addf %122, %115 : vector<1x128xf32>
    %c0_130 = arith.constant 0 : index
    %c0_131 = arith.constant 0 : index
    %124 = vector.load %arg7[%c0_130, %c0_131] : memref<1x128xf32, #tpu.memory_space<vmem>>, vector<1x128xf32>
    tpu.vector_store %arg7[%c0_130, %c0_131], %123 {strides = array<i32>} : memref<1x128xf32, #tpu.memory_space<vmem>>, vector<1x128xf32>,
    return
  }
  func.func @transform_0(%arg0: i32) -> (i32, i32, i32, i32) {
    %c1_i32 = arith.constant 1 : i32
    %0 = arith.muli %arg0, %c1_i32 : i32
    %c0_i32 = arith.constant 0 : i32
    %1 = arith.addi %0, %c0_i32 : i32
    %c0_i32_0 = arith.constant 0 : i32
    %c0_i32_1 = arith.constant 0 : i32
    %c0_i32_2 = arith.constant 0 : i32
    %c0_i32_3 = arith.constant 0 : i32
    return %c0_i32_0, %1, %c0_i32_1, %c0_i32_2 : i32, i32, i32, i32
  }
  func.func @transform_1(%arg0: i32) -> (i32, i32, i32, i32) {
    %c1_i32 = arith.constant 1 : i32
    %0 = arith.muli %arg0, %c1_i32 : i32
    %c1_i32_0 = arith.constant 1 : i32
    %1 = arith.addi %0, %c1_i32_0 : i32
    %c0_i32 = arith.constant 0 : i32
    %c0_i32_1 = arith.constant 0 : i32
    %c0_i32_2 = arith.constant 0 : i32
    %c0_i32_3 = arith.constant 0 : i32
    return %c0_i32, %1, %c0_i32_1, %c0_i32_2 : i32, i32, i32, i32
  }
  func.func @transform_2(%arg0: i32) -> (i32, i32, i32, i32) {
    %c1_i32 = arith.constant 1 : i32
    %0 = arith.muli %arg0, %c1_i32 : i32
    %c2_i32 = arith.constant 2 : i32
    %1 = arith.addi %0, %c2_i32 : i32
    %c0_i32 = arith.constant 0 : i32
    %c0_i32_0 = arith.constant 0 : i32
    %c0_i32_1 = arith.constant 0 : i32
    %c0_i32_2 = arith.constant 0 : i32
    return %c0_i32, %1, %c0_i32_0, %c0_i32_1 : i32, i32, i32, i32
  }
  func.func @transform_3(%arg0: i32) -> (i32, i32, i32) {
    %c0_i32 = arith.constant 0 : i32
    %c0_i32_0 = arith.constant 0 : i32
    %c0_i32_1 = arith.constant 0 : i32
    %c0_i32_2 = arith.constant 0 : i32
    return %c0_i32, %c0_i32_0, %c0_i32_1 : i32, i32, i32
  }
  func.func @transform_4(%arg0: i32) -> (i32, i32, i32, i32) {
    %c0_i32 = arith.constant 0 : i32
    %c0_i32_0 = arith.constant 0 : i32
    %c0_i32_1 = arith.constant 0 : i32
    %c0_i32_2 = arith.constant 0 : i32
    return %c0_i32, %arg0, %c0_i32_0, %c0_i32_1 : i32, i32, i32, i32
  }
  func.func @transform_5(%arg0: i32) -> (i32, i32) {
    %c0_i32 = arith.constant 0 : i32
    %c0_i32_0 = arith.constant 0 : i32
    %c0_i32_1 = arith.constant 0 : i32
    return %c0_i32, %c0_i32_0 : i32, i32
  }
  func.func @transform_6(%arg0: i32) -> (i32, i32) {
    %c0_i32 = arith.constant 0 : i32
    %c0_i32_0 = arith.constant 0 : i32
    %c0_i32_1 = arith.constant 0 : i32
    return %c0_i32, %c0_i32_0 : i32, i32
  }
}

module attributes {stable_mosaic.version = 11 : i64} {
  func.func @kernel(%arg0: i32, %arg1: memref<2x1x5x128xbf16, #tpu.memory_space<vmem>>, %arg2: memref<2x1x5x128xbf16, #tpu.memory_space<vmem>>, %arg3: memref<2x1x5x128xbf16, #tpu.memory_space<vmem>>, %arg4: memref<2x1x5x128xbf16, #tpu.memory_space<vmem>>, %arg5: memref<2x1x5x128xbf16, #tpu.memory_space<vmem>>, %arg6: memref<2x1x5x128xbf16, #tpu.memory_space<vmem>>, %arg7: memref<9x128x128xbf16, #tpu.memory_space<vmem>>, %arg8: memref<2x1x4x128xbf16, #tpu.memory_space<vmem>>, %arg9: memref<1x128xf32, #tpu.memory_space<vmem>>, %arg10: memref<1x128xf32, #tpu.memory_space<vmem>>) attributes {dimension_semantics = [#tpu.dimension_semantics<arbitrary>], iteration_bounds = array<i64: 4>, scalar_prefetch = 0 : i64, scratch_operands = 0 : i64, tpu.core_type = #tpu.core_type<tc>, window_params = [{transform_indices = @transform_0, window_bounds = array<i64: 2, 1, 5, 128>}, {transform_indices = @transform_1, window_bounds = array<i64: 2, 1, 5, 128>}, {transform_indices = @transform_2, window_bounds = array<i64: 2, 1, 5, 128>}, {transform_indices = @transform_3, window_bounds = array<i64: 2, 1, 5, 128>}, {transform_indices = @transform_4, window_bounds = array<i64: 2, 1, 5, 128>}, {transform_indices = @transform_5, window_bounds = array<i64: 2, 1, 5, 128>}, {pipeline_mode = #tpu.pipeline_mode<synchronous>, transform_indices = @transform_6, window_bounds = array<i64: 9, 128, 128>}, {transform_indices = @transform_7, window_bounds = array<i64: 2, 1, 4, 128>}, {pipeline_mode = #tpu.pipeline_mode<synchronous>, transform_indices = @transform_8, window_bounds = array<i64: 1, 128>}, {pipeline_mode = #tpu.pipeline_mode<synchronous>, transform_indices = @transform_9, window_bounds = array<i64: 1, 128>}]} {
    %cst = arith.constant 0.000000e+00 : f32
    %0 = vector.broadcast %cst : f32 to vector<4x128xf32>
    %cst_0 = arith.constant 0.000000e+00 : f32
    %1 = vector.broadcast %cst_0 : f32 to vector<4x128xf32>
    %c0 = arith.constant 0 : index
    %c0_1 = arith.constant 0 : index
    %c0_2 = arith.constant 0 : index
    %2 = vector.load %arg7[%c0, %c0_1, %c0_2] : memref<9x128x128xbf16, #tpu.memory_space<vmem>>, vector<1x128x128xbf16>
    %3 = vector.shape_cast %2 : vector<1x128x128xbf16> to vector<128x128xbf16>
    %c0_3 = arith.constant 0 : index
    %c0_4 = arith.constant 0 : index
    %c0_5 = arith.constant 0 : index
    %c0_6 = arith.constant 0 : index
    %4 = vector.load %arg1[%c0_3, %c0_4, %c0_5, %c0_6] : memref<2x1x5x128xbf16, #tpu.memory_space<vmem>>, vector<1x1x4x128xbf16>
    %5 = vector.shape_cast %4 : vector<1x1x4x128xbf16> to vector<4x128xbf16>
    %cst_7 = arith.constant dense<0.000000e+00> : vector<4x128xf32>
    %6 = tpu.matmul %5, %3, %cst_7 {dimension_numbers = #tpu.dot_dimension_numbers<[1], [0], [0], [1], [0, 0, 1, 1], [], []>} : vector<4x128xbf16>, vector<128x128xbf16>, vector<4x128xf32> -> vector<4x128xf32>
    %7 = arith.addf %0, %6 : vector<4x128xf32>
    %c1 = arith.constant 1 : index
    %c0_8 = arith.constant 0 : index
    %c0_9 = arith.constant 0 : index
    %c0_10 = arith.constant 0 : index
    %8 = vector.load %arg1[%c1, %c0_8, %c0_9, %c0_10] : memref<2x1x5x128xbf16, #tpu.memory_space<vmem>>, vector<1x1x4x128xbf16>
    %9 = vector.shape_cast %8 : vector<1x1x4x128xbf16> to vector<4x128xbf16>
    %cst_11 = arith.constant dense<0.000000e+00> : vector<4x128xf32>
    %10 = tpu.matmul %9, %3, %cst_11 {dimension_numbers = #tpu.dot_dimension_numbers<[1], [0], [0], [1], [0, 0, 1, 1], [], []>} : vector<4x128xbf16>, vector<128x128xbf16>, vector<4x128xf32> -> vector<4x128xf32>
    %11 = arith.addf %1, %10 : vector<4x128xf32>
    %c1_12 = arith.constant 1 : index
    %c0_13 = arith.constant 0 : index
    %c0_14 = arith.constant 0 : index
    %12 = vector.load %arg7[%c1_12, %c0_13, %c0_14] : memref<9x128x128xbf16, #tpu.memory_space<vmem>>, vector<1x128x128xbf16>
    %13 = vector.shape_cast %12 : vector<1x128x128xbf16> to vector<128x128xbf16>
    %c0_15 = arith.constant 0 : index
    %c0_16 = arith.constant 0 : index
    %c0_17 = arith.constant 0 : index
    %c0_18 = arith.constant 0 : index
    %14 = vector.load %arg2[%c0_15, %c0_16, %c0_17, %c0_18] : memref<2x1x5x128xbf16, #tpu.memory_space<vmem>>, vector<1x1x4x128xbf16>
    %15 = vector.shape_cast %14 : vector<1x1x4x128xbf16> to vector<4x128xbf16>
    %cst_19 = arith.constant dense<0.000000e+00> : vector<4x128xf32>
    %16 = tpu.matmul %15, %13, %cst_19 {dimension_numbers = #tpu.dot_dimension_numbers<[1], [0], [0], [1], [0, 0, 1, 1], [], []>} : vector<4x128xbf16>, vector<128x128xbf16>, vector<4x128xf32> -> vector<4x128xf32>
    %17 = arith.addf %7, %16 : vector<4x128xf32>
    %c1_20 = arith.constant 1 : index
    %c0_21 = arith.constant 0 : index
    %c0_22 = arith.constant 0 : index
    %c0_23 = arith.constant 0 : index
    %18 = vector.load %arg2[%c1_20, %c0_21, %c0_22, %c0_23] : memref<2x1x5x128xbf16, #tpu.memory_space<vmem>>, vector<1x1x4x128xbf16>
    %19 = vector.shape_cast %18 : vector<1x1x4x128xbf16> to vector<4x128xbf16>
    %cst_24 = arith.constant dense<0.000000e+00> : vector<4x128xf32>
    %20 = tpu.matmul %19, %13, %cst_24 {dimension_numbers = #tpu.dot_dimension_numbers<[1], [0], [0], [1], [0, 0, 1, 1], [], []>} : vector<4x128xbf16>, vector<128x128xbf16>, vector<4x128xf32> -> vector<4x128xf32>
    %21 = arith.addf %11, %20 : vector<4x128xf32>
    %c2 = arith.constant 2 : index
    %c0_25 = arith.constant 0 : index
    %c0_26 = arith.constant 0 : index
    %22 = vector.load %arg7[%c2, %c0_25, %c0_26] : memref<9x128x128xbf16, #tpu.memory_space<vmem>>, vector<1x128x128xbf16>
    %23 = vector.shape_cast %22 : vector<1x128x128xbf16> to vector<128x128xbf16>
    %c0_27 = arith.constant 0 : index
    %c0_28 = arith.constant 0 : index
    %c1_29 = arith.constant 1 : index
    %c0_30 = arith.constant 0 : index
    %24 = vector.load %arg1[%c0_27, %c0_28, %c1_29, %c0_30] : memref<2x1x5x128xbf16, #tpu.memory_space<vmem>>, vector<1x1x4x128xbf16>
    %25 = vector.shape_cast %24 : vector<1x1x4x128xbf16> to vector<4x128xbf16>
    %cst_31 = arith.constant dense<0.000000e+00> : vector<4x128xf32>
    %26 = tpu.matmul %25, %23, %cst_31 {dimension_numbers = #tpu.dot_dimension_numbers<[1], [0], [0], [1], [0, 0, 1, 1], [], []>} : vector<4x128xbf16>, vector<128x128xbf16>, vector<4x128xf32> -> vector<4x128xf32>
    %27 = arith.addf %17, %26 : vector<4x128xf32>
    %c1_32 = arith.constant 1 : index
    %c0_33 = arith.constant 0 : index
    %c1_34 = arith.constant 1 : index
    %c0_35 = arith.constant 0 : index
    %28 = vector.load %arg1[%c1_32, %c0_33, %c1_34, %c0_35] : memref<2x1x5x128xbf16, #tpu.memory_space<vmem>>, vector<1x1x4x128xbf16>
    %29 = vector.shape_cast %28 : vector<1x1x4x128xbf16> to vector<4x128xbf16>
    %cst_36 = arith.constant dense<0.000000e+00> : vector<4x128xf32>
    %30 = tpu.matmul %29, %23, %cst_36 {dimension_numbers = #tpu.dot_dimension_numbers<[1], [0], [0], [1], [0, 0, 1, 1], [], []>} : vector<4x128xbf16>, vector<128x128xbf16>, vector<4x128xf32> -> vector<4x128xf32>
    %31 = arith.addf %21, %30 : vector<4x128xf32>
    %c3 = arith.constant 3 : index
    %c0_37 = arith.constant 0 : index
    %c0_38 = arith.constant 0 : index
    %32 = vector.load %arg7[%c3, %c0_37, %c0_38] : memref<9x128x128xbf16, #tpu.memory_space<vmem>>, vector<1x128x128xbf16>
    %33 = vector.shape_cast %32 : vector<1x128x128xbf16> to vector<128x128xbf16>
    %c0_39 = arith.constant 0 : index
    %c0_40 = arith.constant 0 : index
    %c0_41 = arith.constant 0 : index
    %c0_42 = arith.constant 0 : index
    %34 = vector.load %arg3[%c0_39, %c0_40, %c0_41, %c0_42] : memref<2x1x5x128xbf16, #tpu.memory_space<vmem>>, vector<1x1x4x128xbf16>
    %35 = vector.shape_cast %34 : vector<1x1x4x128xbf16> to vector<4x128xbf16>
    %cst_43 = arith.constant dense<0.000000e+00> : vector<4x128xf32>
    %36 = tpu.matmul %35, %33, %cst_43 {dimension_numbers = #tpu.dot_dimension_numbers<[1], [0], [0], [1], [0, 0, 1, 1], [], []>} : vector<4x128xbf16>, vector<128x128xbf16>, vector<4x128xf32> -> vector<4x128xf32>
    %37 = arith.addf %27, %36 : vector<4x128xf32>
    %c1_44 = arith.constant 1 : index
    %c0_45 = arith.constant 0 : index
    %c0_46 = arith.constant 0 : index
    %c0_47 = arith.constant 0 : index
    %38 = vector.load %arg3[%c1_44, %c0_45, %c0_46, %c0_47] : memref<2x1x5x128xbf16, #tpu.memory_space<vmem>>, vector<1x1x4x128xbf16>
    %39 = vector.shape_cast %38 : vector<1x1x4x128xbf16> to vector<4x128xbf16>
    %cst_48 = arith.constant dense<0.000000e+00> : vector<4x128xf32>
    %40 = tpu.matmul %39, %33, %cst_48 {dimension_numbers = #tpu.dot_dimension_numbers<[1], [0], [0], [1], [0, 0, 1, 1], [], []>} : vector<4x128xbf16>, vector<128x128xbf16>, vector<4x128xf32> -> vector<4x128xf32>
    %41 = arith.addf %31, %40 : vector<4x128xf32>
    %c4 = arith.constant 4 : index
    %c0_49 = arith.constant 0 : index
    %c0_50 = arith.constant 0 : index
    %42 = vector.load %arg7[%c4, %c0_49, %c0_50] : memref<9x128x128xbf16, #tpu.memory_space<vmem>>, vector<1x128x128xbf16>
    %43 = vector.shape_cast %42 : vector<1x128x128xbf16> to vector<128x128xbf16>
    %c0_51 = arith.constant 0 : index
    %c0_52 = arith.constant 0 : index
    %c0_53 = arith.constant 0 : index
    %c0_54 = arith.constant 0 : index
    %44 = vector.load %arg4[%c0_51, %c0_52, %c0_53, %c0_54] : memref<2x1x5x128xbf16, #tpu.memory_space<vmem>>, vector<1x1x4x128xbf16>
    %45 = vector.shape_cast %44 : vector<1x1x4x128xbf16> to vector<4x128xbf16>
    %cst_55 = arith.constant dense<0.000000e+00> : vector<4x128xf32>
    %46 = tpu.matmul %45, %43, %cst_55 {dimension_numbers = #tpu.dot_dimension_numbers<[1], [0], [0], [1], [0, 0, 1, 1], [], []>} : vector<4x128xbf16>, vector<128x128xbf16>, vector<4x128xf32> -> vector<4x128xf32>
    %47 = arith.addf %37, %46 : vector<4x128xf32>
    %c1_56 = arith.constant 1 : index
    %c0_57 = arith.constant 0 : index
    %c0_58 = arith.constant 0 : index
    %c0_59 = arith.constant 0 : index
    %48 = vector.load %arg4[%c1_56, %c0_57, %c0_58, %c0_59] : memref<2x1x5x128xbf16, #tpu.memory_space<vmem>>, vector<1x1x4x128xbf16>
    %49 = vector.shape_cast %48 : vector<1x1x4x128xbf16> to vector<4x128xbf16>
    %cst_60 = arith.constant dense<0.000000e+00> : vector<4x128xf32>
    %50 = tpu.matmul %49, %43, %cst_60 {dimension_numbers = #tpu.dot_dimension_numbers<[1], [0], [0], [1], [0, 0, 1, 1], [], []>} : vector<4x128xbf16>, vector<128x128xbf16>, vector<4x128xf32> -> vector<4x128xf32>
    %51 = arith.addf %41, %50 : vector<4x128xf32>
    %c5 = arith.constant 5 : index
    %c0_61 = arith.constant 0 : index
    %c0_62 = arith.constant 0 : index
    %52 = vector.load %arg7[%c5, %c0_61, %c0_62] : memref<9x128x128xbf16, #tpu.memory_space<vmem>>, vector<1x128x128xbf16>
    %53 = vector.shape_cast %52 : vector<1x128x128xbf16> to vector<128x128xbf16>
    %c0_63 = arith.constant 0 : index
    %c0_64 = arith.constant 0 : index
    %c1_65 = arith.constant 1 : index
    %c0_66 = arith.constant 0 : index
    %54 = vector.load %arg3[%c0_63, %c0_64, %c1_65, %c0_66] : memref<2x1x5x128xbf16, #tpu.memory_space<vmem>>, vector<1x1x4x128xbf16>
    %55 = vector.shape_cast %54 : vector<1x1x4x128xbf16> to vector<4x128xbf16>
    %cst_67 = arith.constant dense<0.000000e+00> : vector<4x128xf32>
    %56 = tpu.matmul %55, %53, %cst_67 {dimension_numbers = #tpu.dot_dimension_numbers<[1], [0], [0], [1], [0, 0, 1, 1], [], []>} : vector<4x128xbf16>, vector<128x128xbf16>, vector<4x128xf32> -> vector<4x128xf32>
    %57 = arith.addf %47, %56 : vector<4x128xf32>
    %c1_68 = arith.constant 1 : index
    %c0_69 = arith.constant 0 : index
    %c1_70 = arith.constant 1 : index
    %c0_71 = arith.constant 0 : index
    %58 = vector.load %arg3[%c1_68, %c0_69, %c1_70, %c0_71] : memref<2x1x5x128xbf16, #tpu.memory_space<vmem>>, vector<1x1x4x128xbf16>
    %59 = vector.shape_cast %58 : vector<1x1x4x128xbf16> to vector<4x128xbf16>
    %cst_72 = arith.constant dense<0.000000e+00> : vector<4x128xf32>
    %60 = tpu.matmul %59, %53, %cst_72 {dimension_numbers = #tpu.dot_dimension_numbers<[1], [0], [0], [1], [0, 0, 1, 1], [], []>} : vector<4x128xbf16>, vector<128x128xbf16>, vector<4x128xf32> -> vector<4x128xf32>
    %61 = arith.addf %51, %60 : vector<4x128xf32>
    %c6 = arith.constant 6 : index
    %c0_73 = arith.constant 0 : index
    %c0_74 = arith.constant 0 : index
    %62 = vector.load %arg7[%c6, %c0_73, %c0_74] : memref<9x128x128xbf16, #tpu.memory_space<vmem>>, vector<1x128x128xbf16>
    %63 = vector.shape_cast %62 : vector<1x128x128xbf16> to vector<128x128xbf16>
    %c0_75 = arith.constant 0 : index
    %c0_76 = arith.constant 0 : index
    %c0_77 = arith.constant 0 : index
    %c0_78 = arith.constant 0 : index
    %64 = vector.load %arg5[%c0_75, %c0_76, %c0_77, %c0_78] : memref<2x1x5x128xbf16, #tpu.memory_space<vmem>>, vector<1x1x4x128xbf16>
    %65 = vector.shape_cast %64 : vector<1x1x4x128xbf16> to vector<4x128xbf16>
    %cst_79 = arith.constant dense<0.000000e+00> : vector<4x128xf32>
    %66 = tpu.matmul %65, %63, %cst_79 {dimension_numbers = #tpu.dot_dimension_numbers<[1], [0], [0], [1], [0, 0, 1, 1], [], []>} : vector<4x128xbf16>, vector<128x128xbf16>, vector<4x128xf32> -> vector<4x128xf32>
    %67 = arith.addf %57, %66 : vector<4x128xf32>
    %c1_80 = arith.constant 1 : index
    %c0_81 = arith.constant 0 : index
    %c0_82 = arith.constant 0 : index
    %c0_83 = arith.constant 0 : index
    %68 = vector.load %arg5[%c1_80, %c0_81, %c0_82, %c0_83] : memref<2x1x5x128xbf16, #tpu.memory_space<vmem>>, vector<1x1x4x128xbf16>
    %69 = vector.shape_cast %68 : vector<1x1x4x128xbf16> to vector<4x128xbf16>
    %cst_84 = arith.constant dense<0.000000e+00> : vector<4x128xf32>
    %70 = tpu.matmul %69, %63, %cst_84 {dimension_numbers = #tpu.dot_dimension_numbers<[1], [0], [0], [1], [0, 0, 1, 1], [], []>} : vector<4x128xbf16>, vector<128x128xbf16>, vector<4x128xf32> -> vector<4x128xf32>
    %71 = arith.addf %61, %70 : vector<4x128xf32>
    %c7 = arith.constant 7 : index
    %c0_85 = arith.constant 0 : index
    %c0_86 = arith.constant 0 : index
    %72 = vector.load %arg7[%c7, %c0_85, %c0_86] : memref<9x128x128xbf16, #tpu.memory_space<vmem>>, vector<1x128x128xbf16>
    %73 = vector.shape_cast %72 : vector<1x128x128xbf16> to vector<128x128xbf16>
    %c0_87 = arith.constant 0 : index
    %c0_88 = arith.constant 0 : index
    %c0_89 = arith.constant 0 : index
    %c0_90 = arith.constant 0 : index
    %74 = vector.load %arg6[%c0_87, %c0_88, %c0_89, %c0_90] : memref<2x1x5x128xbf16, #tpu.memory_space<vmem>>, vector<1x1x4x128xbf16>
    %75 = vector.shape_cast %74 : vector<1x1x4x128xbf16> to vector<4x128xbf16>
    %cst_91 = arith.constant dense<0.000000e+00> : vector<4x128xf32>
    %76 = tpu.matmul %75, %73, %cst_91 {dimension_numbers = #tpu.dot_dimension_numbers<[1], [0], [0], [1], [0, 0, 1, 1], [], []>} : vector<4x128xbf16>, vector<128x128xbf16>, vector<4x128xf32> -> vector<4x128xf32>
    %77 = arith.addf %67, %76 : vector<4x128xf32>
    %c1_92 = arith.constant 1 : index
    %c0_93 = arith.constant 0 : index
    %c0_94 = arith.constant 0 : index
    %c0_95 = arith.constant 0 : index
    %78 = vector.load %arg6[%c1_92, %c0_93, %c0_94, %c0_95] : memref<2x1x5x128xbf16, #tpu.memory_space<vmem>>, vector<1x1x4x128xbf16>
    %79 = vector.shape_cast %78 : vector<1x1x4x128xbf16> to vector<4x128xbf16>
    %cst_96 = arith.constant dense<0.000000e+00> : vector<4x128xf32>
    %80 = tpu.matmul %79, %73, %cst_96 {dimension_numbers = #tpu.dot_dimension_numbers<[1], [0], [0], [1], [0, 0, 1, 1], [], []>} : vector<4x128xbf16>, vector<128x128xbf16>, vector<4x128xf32> -> vector<4x128xf32>
    %81 = arith.addf %71, %80 : vector<4x128xf32>
    %c8 = arith.constant 8 : index
    %c0_97 = arith.constant 0 : index
    %c0_98 = arith.constant 0 : index
    %82 = vector.load %arg7[%c8, %c0_97, %c0_98] : memref<9x128x128xbf16, #tpu.memory_space<vmem>>, vector<1x128x128xbf16>
    %83 = vector.shape_cast %82 : vector<1x128x128xbf16> to vector<128x128xbf16>
    %c0_99 = arith.constant 0 : index
    %c0_100 = arith.constant 0 : index
    %c1_101 = arith.constant 1 : index
    %c0_102 = arith.constant 0 : index
    %84 = vector.load %arg5[%c0_99, %c0_100, %c1_101, %c0_102] : memref<2x1x5x128xbf16, #tpu.memory_space<vmem>>, vector<1x1x4x128xbf16>
    %85 = vector.shape_cast %84 : vector<1x1x4x128xbf16> to vector<4x128xbf16>
    %cst_103 = arith.constant dense<0.000000e+00> : vector<4x128xf32>
    %86 = tpu.matmul %85, %83, %cst_103 {dimension_numbers = #tpu.dot_dimension_numbers<[1], [0], [0], [1], [0, 0, 1, 1], [], []>} : vector<4x128xbf16>, vector<128x128xbf16>, vector<4x128xf32> -> vector<4x128xf32>
    %87 = arith.addf %77, %86 : vector<4x128xf32>
    %c1_104 = arith.constant 1 : index
    %c0_105 = arith.constant 0 : index
    %c1_106 = arith.constant 1 : index
    %c0_107 = arith.constant 0 : index
    %88 = vector.load %arg5[%c1_104, %c0_105, %c1_106, %c0_107] : memref<2x1x5x128xbf16, #tpu.memory_space<vmem>>, vector<1x1x4x128xbf16>
    %89 = vector.shape_cast %88 : vector<1x1x4x128xbf16> to vector<4x128xbf16>
    %cst_108 = arith.constant dense<0.000000e+00> : vector<4x128xf32>
    %90 = tpu.matmul %89, %83, %cst_108 {dimension_numbers = #tpu.dot_dimension_numbers<[1], [0], [0], [1], [0, 0, 1, 1], [], []>} : vector<4x128xbf16>, vector<128x128xbf16>, vector<4x128xf32> -> vector<4x128xf32>
    %91 = arith.addf %81, %90 : vector<4x128xf32>
    %cst_109 = arith.constant 0.000000e+00 : f32
    %92 = vector.broadcast %cst_109 : f32 to vector<1x128xf32>
    %cst_110 = arith.constant 0.000000e+00 : f32
    %93 = vector.broadcast %cst_110 : f32 to vector<1x128xf32>
    %94 = arith.truncf %87 : vector<4x128xf32> to vector<4x128xbf16>
    %c0_111 = arith.constant 0 : index
    %c0_112 = arith.constant 0 : index
    %c0_113 = arith.constant 0 : index
    %c0_114 = arith.constant 0 : index
    %95 = vector.load %arg8[%c0_111, %c0_112, %c0_113, %c0_114] : memref<2x1x4x128xbf16, #tpu.memory_space<vmem>>, vector<1x1x4x128xbf16>
    %96 = vector.shape_cast %95 : vector<1x1x4x128xbf16> to vector<4x128xbf16>
    %97 = vector.shape_cast %94 : vector<4x128xbf16> to vector<1x1x4x128xbf16>
    tpu.vector_store %arg8[%c0_111, %c0_112, %c0_113, %c0_114], %97 {strides = array<i32>} : memref<2x1x4x128xbf16, #tpu.memory_space<vmem>>, vector<1x1x4x128xbf16>,
    %cst_115 = arith.constant dense<0.000000e+00> : vector<128xf32>
    %98 = vector.multi_reduction <add>, %87, %cst_115 [0] : vector<4x128xf32> to vector<128xf32>
    %99 = vector.shape_cast %98 : vector<128xf32> to vector<1x128xf32>
    %100 = arith.addf %92, %99 : vector<1x128xf32>
    %101 = arith.mulf %87, %87 : vector<4x128xf32>
    %cst_116 = arith.constant dense<0.000000e+00> : vector<128xf32>
    %102 = vector.multi_reduction <add>, %101, %cst_116 [0] : vector<4x128xf32> to vector<128xf32>
    %103 = vector.shape_cast %102 : vector<128xf32> to vector<1x128xf32>
    %104 = arith.addf %93, %103 : vector<1x128xf32>
    %105 = arith.truncf %91 : vector<4x128xf32> to vector<4x128xbf16>
    %c1_117 = arith.constant 1 : index
    %c0_118 = arith.constant 0 : index
    %c0_119 = arith.constant 0 : index
    %c0_120 = arith.constant 0 : index
    %106 = vector.load %arg8[%c1_117, %c0_118, %c0_119, %c0_120] : memref<2x1x4x128xbf16, #tpu.memory_space<vmem>>, vector<1x1x4x128xbf16>
    %107 = vector.shape_cast %106 : vector<1x1x4x128xbf16> to vector<4x128xbf16>
    %108 = vector.shape_cast %105 : vector<4x128xbf16> to vector<1x1x4x128xbf16>
    tpu.vector_store %arg8[%c1_117, %c0_118, %c0_119, %c0_120], %108 {strides = array<i32>} : memref<2x1x4x128xbf16, #tpu.memory_space<vmem>>, vector<1x1x4x128xbf16>,
    %cst_121 = arith.constant dense<0.000000e+00> : vector<128xf32>
    %109 = vector.multi_reduction <add>, %91, %cst_121 [0] : vector<4x128xf32> to vector<128xf32>
    %110 = vector.shape_cast %109 : vector<128xf32> to vector<1x128xf32>
    %111 = arith.addf %100, %110 : vector<1x128xf32>
    %112 = arith.mulf %91, %91 : vector<4x128xf32>
    %cst_122 = arith.constant dense<0.000000e+00> : vector<128xf32>
    %113 = vector.multi_reduction <add>, %112, %cst_122 [0] : vector<4x128xf32> to vector<128xf32>
    %114 = vector.shape_cast %113 : vector<128xf32> to vector<1x128xf32>
    %115 = arith.addf %104, %114 : vector<1x128xf32>
    %c0_i32 = arith.constant 0 : i32
    %116 = arith.cmpi eq, %arg0, %c0_i32 : i32
    %117 = arith.extui %116 : i1 to i32
    %c0_i32_123 = arith.constant 0 : i32
    %118 = arith.cmpi ne, %117, %c0_i32_123 : i32
    scf.if %118 {
      %cst_132 = arith.constant 0.000000e+00 : f32
      %125 = vector.broadcast %cst_132 : f32 to vector<1x128xf32>
      %c0_133 = arith.constant 0 : index
      %c0_134 = arith.constant 0 : index
      %126 = vector.load %arg9[%c0_133, %c0_134] : memref<1x128xf32, #tpu.memory_space<vmem>>, vector<1x128xf32>
      tpu.vector_store %arg9[%c0_133, %c0_134], %125 {strides = array<i32>} : memref<1x128xf32, #tpu.memory_space<vmem>>, vector<1x128xf32>,
      %cst_135 = arith.constant 0.000000e+00 : f32
      %127 = vector.broadcast %cst_135 : f32 to vector<1x128xf32>
      %c0_136 = arith.constant 0 : index
      %c0_137 = arith.constant 0 : index
      %128 = vector.load %arg10[%c0_136, %c0_137] : memref<1x128xf32, #tpu.memory_space<vmem>>, vector<1x128xf32>
      tpu.vector_store %arg10[%c0_136, %c0_137], %127 {strides = array<i32>} : memref<1x128xf32, #tpu.memory_space<vmem>>, vector<1x128xf32>,
    } else {
    }
    %c0_124 = arith.constant 0 : index
    %c0_125 = arith.constant 0 : index
    %119 = vector.load %arg9[%c0_124, %c0_125] : memref<1x128xf32, #tpu.memory_space<vmem>>, vector<1x128xf32>
    %120 = arith.addf %119, %111 : vector<1x128xf32>
    %c0_126 = arith.constant 0 : index
    %c0_127 = arith.constant 0 : index
    %121 = vector.load %arg9[%c0_126, %c0_127] : memref<1x128xf32, #tpu.memory_space<vmem>>, vector<1x128xf32>
    tpu.vector_store %arg9[%c0_126, %c0_127], %120 {strides = array<i32>} : memref<1x128xf32, #tpu.memory_space<vmem>>, vector<1x128xf32>,
    %c0_128 = arith.constant 0 : index
    %c0_129 = arith.constant 0 : index
    %122 = vector.load %arg10[%c0_128, %c0_129] : memref<1x128xf32, #tpu.memory_space<vmem>>, vector<1x128xf32>
    %123 = arith.addf %122, %115 : vector<1x128xf32>
    %c0_130 = arith.constant 0 : index
    %c0_131 = arith.constant 0 : index
    %124 = vector.load %arg10[%c0_130, %c0_131] : memref<1x128xf32, #tpu.memory_space<vmem>>, vector<1x128xf32>
    tpu.vector_store %arg10[%c0_130, %c0_131], %123 {strides = array<i32>} : memref<1x128xf32, #tpu.memory_space<vmem>>, vector<1x128xf32>,
    return
  }
  func.func @transform_0(%arg0: i32) -> (i32, i32, i32, i32) {
    %c2_i32 = arith.constant 2 : i32
    %0 = arith.muli %arg0, %c2_i32 : i32
    %c0_i32 = arith.constant 0 : i32
    %1 = arith.addi %0, %c0_i32 : i32
    %c0_i32_0 = arith.constant 0 : i32
    %c0_i32_1 = arith.constant 0 : i32
    %c0_i32_2 = arith.constant 0 : i32
    %c0_i32_3 = arith.constant 0 : i32
    return %c0_i32_0, %1, %c0_i32_1, %c0_i32_2 : i32, i32, i32, i32
  }
  func.func @transform_1(%arg0: i32) -> (i32, i32, i32, i32) {
    %c2_i32 = arith.constant 2 : i32
    %0 = arith.muli %arg0, %c2_i32 : i32
    %c0_i32 = arith.constant 0 : i32
    %1 = arith.addi %0, %c0_i32 : i32
    %c0_i32_0 = arith.constant 0 : i32
    %c0_i32_1 = arith.constant 0 : i32
    %c0_i32_2 = arith.constant 0 : i32
    %c0_i32_3 = arith.constant 0 : i32
    return %c0_i32_0, %1, %c0_i32_1, %c0_i32_2 : i32, i32, i32, i32
  }
  func.func @transform_2(%arg0: i32) -> (i32, i32, i32, i32) {
    %c2_i32 = arith.constant 2 : i32
    %0 = arith.muli %arg0, %c2_i32 : i32
    %c1_i32 = arith.constant 1 : i32
    %1 = arith.addi %0, %c1_i32 : i32
    %c0_i32 = arith.constant 0 : i32
    %c0_i32_0 = arith.constant 0 : i32
    %c0_i32_1 = arith.constant 0 : i32
    %c0_i32_2 = arith.constant 0 : i32
    return %c0_i32, %1, %c0_i32_0, %c0_i32_1 : i32, i32, i32, i32
  }
  func.func @transform_3(%arg0: i32) -> (i32, i32, i32, i32) {
    %c2_i32 = arith.constant 2 : i32
    %0 = arith.muli %arg0, %c2_i32 : i32
    %c1_i32 = arith.constant 1 : i32
    %1 = arith.addi %0, %c1_i32 : i32
    %c0_i32 = arith.constant 0 : i32
    %c0_i32_0 = arith.constant 0 : i32
    %c0_i32_1 = arith.constant 0 : i32
    %c0_i32_2 = arith.constant 0 : i32
    return %c0_i32, %1, %c0_i32_0, %c0_i32_1 : i32, i32, i32, i32
  }
  func.func @transform_4(%arg0: i32) -> (i32, i32, i32, i32) {
    %c2_i32 = arith.constant 2 : i32
    %0 = arith.muli %arg0, %c2_i32 : i32
    %c2_i32_0 = arith.constant 2 : i32
    %1 = arith.addi %0, %c2_i32_0 : i32
    %c0_i32 = arith.constant 0 : i32
    %c0_i32_1 = arith.constant 0 : i32
    %c0_i32_2 = arith.constant 0 : i32
    %c0_i32_3 = arith.constant 0 : i32
    return %c0_i32, %1, %c0_i32_1, %c0_i32_2 : i32, i32, i32, i32
  }
  func.func @transform_5(%arg0: i32) -> (i32, i32, i32, i32) {
    %c2_i32 = arith.constant 2 : i32
    %0 = arith.muli %arg0, %c2_i32 : i32
    %c2_i32_0 = arith.constant 2 : i32
    %1 = arith.addi %0, %c2_i32_0 : i32
    %c0_i32 = arith.constant 0 : i32
    %c0_i32_1 = arith.constant 0 : i32
    %c0_i32_2 = arith.constant 0 : i32
    %c0_i32_3 = arith.constant 0 : i32
    return %c0_i32, %1, %c0_i32_1, %c0_i32_2 : i32, i32, i32, i32
  }
  func.func @transform_6(%arg0: i32) -> (i32, i32, i32) {
    %c0_i32 = arith.constant 0 : i32
    %c0_i32_0 = arith.constant 0 : i32
    %c0_i32_1 = arith.constant 0 : i32
    %c0_i32_2 = arith.constant 0 : i32
    return %c0_i32, %c0_i32_0, %c0_i32_1 : i32, i32, i32
  }
  func.func @transform_7(%arg0: i32) -> (i32, i32, i32, i32) {
    %c0_i32 = arith.constant 0 : i32
    %c0_i32_0 = arith.constant 0 : i32
    %c0_i32_1 = arith.constant 0 : i32
    %c0_i32_2 = arith.constant 0 : i32
    return %c0_i32, %arg0, %c0_i32_0, %c0_i32_1 : i32, i32, i32, i32
  }
  func.func @transform_8(%arg0: i32) -> (i32, i32) {
    %c0_i32 = arith.constant 0 : i32
    %c0_i32_0 = arith.constant 0 : i32
    %c0_i32_1 = arith.constant 0 : i32
    return %c0_i32, %c0_i32_0 : i32, i32
  }
  func.func @transform_9(%arg0: i32) -> (i32, i32) {
    %c0_i32 = arith.constant 0 : i32
    %c0_i32_0 = arith.constant 0 : i32
    %c0_i32_1 = arith.constant 0 : i32
    return %c0_i32, %c0_i32_0 : i32, i32
  }
}

module attributes {stable_mosaic.version = 11 : i64} {
  func.func @_affine_relu_kernel(%arg0: i32, %arg1: memref<2x4x4x128xbf16, #tpu.memory_space<vmem>>, %arg2: memref<1x128xf32, #tpu.memory_space<vmem>>, %arg3: memref<1x128xf32, #tpu.memory_space<vmem>>, %arg4: memref<2x4x4x128xbf16, #tpu.memory_space<vmem>>) attributes {dimension_semantics = [#tpu.dimension_semantics<parallel>], iteration_bounds = array<i64: 1>, scalar_prefetch = 0 : i64, scratch_operands = 0 : i64, tpu.core_type = #tpu.core_type<tc>, window_params = [{transform_indices = @transform_0, window_bounds = array<i64: 2, 4, 4, 128>}, {pipeline_mode = #tpu.pipeline_mode<synchronous>, transform_indices = @transform_1, window_bounds = array<i64: 1, 128>}, {pipeline_mode = #tpu.pipeline_mode<synchronous>, transform_indices = @transform_2, window_bounds = array<i64: 1, 128>}, {transform_indices = @transform_3, window_bounds = array<i64: 2, 4, 4, 128>}]} {
    %c0 = arith.constant 0 : index
    %c0_0 = arith.constant 0 : index
    %c0_1 = arith.constant 0 : index
    %c0_2 = arith.constant 0 : index
    %0 = vector.load %arg1[%c0, %c0_0, %c0_1, %c0_2] : memref<2x4x4x128xbf16, #tpu.memory_space<vmem>>, vector<2x4x4x128xbf16>
    %1 = arith.extf %0 : vector<2x4x4x128xbf16> to vector<2x4x4x128xf32>
    %c0_3 = arith.constant 0 : index
    %c0_4 = arith.constant 0 : index
    %2 = vector.load %arg2[%c0_3, %c0_4] : memref<1x128xf32, #tpu.memory_space<vmem>>, vector<1x128xf32>
    %3 = vector.shape_cast %2 : vector<1x128xf32> to vector<128xf32>
    %4 = vector.shape_cast %3 : vector<128xf32> to vector<1x1x1x128xf32>
    %5 = vector.broadcast %4 : vector<1x1x1x128xf32> to vector<2x4x4x128xf32>
    %6 = arith.mulf %1, %5 : vector<2x4x4x128xf32>
    %c0_5 = arith.constant 0 : index
    %c0_6 = arith.constant 0 : index
    %7 = vector.load %arg3[%c0_5, %c0_6] : memref<1x128xf32, #tpu.memory_space<vmem>>, vector<1x128xf32>
    %8 = vector.shape_cast %7 : vector<1x128xf32> to vector<128xf32>
    %9 = vector.shape_cast %8 : vector<128xf32> to vector<1x1x1x128xf32>
    %10 = vector.broadcast %9 : vector<1x1x1x128xf32> to vector<2x4x4x128xf32>
    %11 = arith.addf %6, %10 : vector<2x4x4x128xf32>
    %cst = arith.constant 0.000000e+00 : f32
    %12 = vector.broadcast %cst : f32 to vector<2x4x4x128xf32>
    %13 = arith.maximumf %11, %12 : vector<2x4x4x128xf32>
    %14 = arith.truncf %13 : vector<2x4x4x128xf32> to vector<2x4x4x128xbf16>
    %c0_7 = arith.constant 0 : index
    %c0_8 = arith.constant 0 : index
    %c0_9 = arith.constant 0 : index
    %c0_10 = arith.constant 0 : index
    %15 = vector.load %arg4[%c0_7, %c0_8, %c0_9, %c0_10] : memref<2x4x4x128xbf16, #tpu.memory_space<vmem>>, vector<2x4x4x128xbf16>
    tpu.vector_store %arg4[%c0_7, %c0_8, %c0_9, %c0_10], %14 {strides = array<i32>} : memref<2x4x4x128xbf16, #tpu.memory_space<vmem>>, vector<2x4x4x128xbf16>,
    return
  }
  func.func @transform_0(%arg0: i32) -> (i32, i32, i32, i32) {
    %c0_i32 = arith.constant 0 : i32
    %c0_i32_0 = arith.constant 0 : i32
    %c0_i32_1 = arith.constant 0 : i32
    %c0_i32_2 = arith.constant 0 : i32
    return %c0_i32, %arg0, %c0_i32_0, %c0_i32_1 : i32, i32, i32, i32
  }
  func.func @transform_1(%arg0: i32) -> (i32, i32) {
    %c0_i32 = arith.constant 0 : i32
    %c0_i32_0 = arith.constant 0 : i32
    %c0_i32_1 = arith.constant 0 : i32
    return %c0_i32, %c0_i32_0 : i32, i32
  }
  func.func @transform_2(%arg0: i32) -> (i32, i32) {
    %c0_i32 = arith.constant 0 : i32
    %c0_i32_0 = arith.constant 0 : i32
    %c0_i32_1 = arith.constant 0 : i32
    return %c0_i32, %c0_i32_0 : i32, i32
  }
  func.func @transform_3(%arg0: i32) -> (i32, i32, i32, i32) {
    %c0_i32 = arith.constant 0 : i32
    %c0_i32_0 = arith.constant 0 : i32
    %c0_i32_1 = arith.constant 0 : i32
    %c0_i32_2 = arith.constant 0 : i32
    return %c0_i32, %arg0, %c0_i32_0, %c0_i32_1 : i32, i32, i32, i32
  }
}

module attributes {stable_mosaic.version = 11 : i64} {
  func.func @kernel(%arg0: i32, %arg1: memref<2x1x3x128xbf16, #tpu.memory_space<vmem>>, %arg2: memref<2x1x3x128xbf16, #tpu.memory_space<vmem>>, %arg3: memref<2x1x3x128xbf16, #tpu.memory_space<vmem>>, %arg4: memref<2x1x3x128xbf16, #tpu.memory_space<vmem>>, %arg5: memref<2x1x3x128xbf16, #tpu.memory_space<vmem>>, %arg6: memref<2x1x3x128xbf16, #tpu.memory_space<vmem>>, %arg7: memref<9x128x256xbf16, #tpu.memory_space<vmem>>, %arg8: memref<2x1x2x256xbf16, #tpu.memory_space<vmem>>, %arg9: memref<1x256xf32, #tpu.memory_space<vmem>>, %arg10: memref<1x256xf32, #tpu.memory_space<vmem>>) attributes {dimension_semantics = [#tpu.dimension_semantics<arbitrary>], iteration_bounds = array<i64: 2>, scalar_prefetch = 0 : i64, scratch_operands = 0 : i64, tpu.core_type = #tpu.core_type<tc>, window_params = [{transform_indices = @transform_0, window_bounds = array<i64: 2, 1, 3, 128>}, {transform_indices = @transform_1, window_bounds = array<i64: 2, 1, 3, 128>}, {transform_indices = @transform_2, window_bounds = array<i64: 2, 1, 3, 128>}, {transform_indices = @transform_3, window_bounds = array<i64: 2, 1, 3, 128>}, {transform_indices = @transform_4, window_bounds = array<i64: 2, 1, 3, 128>}, {transform_indices = @transform_5, window_bounds = array<i64: 2, 1, 3, 128>}, {pipeline_mode = #tpu.pipeline_mode<synchronous>, transform_indices = @transform_6, window_bounds = array<i64: 9, 128, 256>}, {transform_indices = @transform_7, window_bounds = array<i64: 2, 1, 2, 256>}, {pipeline_mode = #tpu.pipeline_mode<synchronous>, transform_indices = @transform_8, window_bounds = array<i64: 1, 256>}, {pipeline_mode = #tpu.pipeline_mode<synchronous>, transform_indices = @transform_9, window_bounds = array<i64: 1, 256>}]} {
    %cst = arith.constant 0.000000e+00 : f32
    %0 = vector.broadcast %cst : f32 to vector<2x256xf32>
    %cst_0 = arith.constant 0.000000e+00 : f32
    %1 = vector.broadcast %cst_0 : f32 to vector<2x256xf32>
    %c0 = arith.constant 0 : index
    %c0_1 = arith.constant 0 : index
    %c0_2 = arith.constant 0 : index
    %2 = vector.load %arg7[%c0, %c0_1, %c0_2] : memref<9x128x256xbf16, #tpu.memory_space<vmem>>, vector<1x128x256xbf16>
    %3 = vector.shape_cast %2 : vector<1x128x256xbf16> to vector<128x256xbf16>
    %c0_3 = arith.constant 0 : index
    %c0_4 = arith.constant 0 : index
    %c0_5 = arith.constant 0 : index
    %c0_6 = arith.constant 0 : index
    %4 = vector.load %arg1[%c0_3, %c0_4, %c0_5, %c0_6] : memref<2x1x3x128xbf16, #tpu.memory_space<vmem>>, vector<1x1x2x128xbf16>
    %5 = vector.shape_cast %4 : vector<1x1x2x128xbf16> to vector<2x128xbf16>
    %cst_7 = arith.constant dense<0.000000e+00> : vector<2x256xf32>
    %6 = tpu.matmul %5, %3, %cst_7 {dimension_numbers = #tpu.dot_dimension_numbers<[1], [0], [0], [1], [0, 0, 1, 1], [], []>} : vector<2x128xbf16>, vector<128x256xbf16>, vector<2x256xf32> -> vector<2x256xf32>
    %7 = arith.addf %0, %6 : vector<2x256xf32>
    %c1 = arith.constant 1 : index
    %c0_8 = arith.constant 0 : index
    %c0_9 = arith.constant 0 : index
    %c0_10 = arith.constant 0 : index
    %8 = vector.load %arg1[%c1, %c0_8, %c0_9, %c0_10] : memref<2x1x3x128xbf16, #tpu.memory_space<vmem>>, vector<1x1x2x128xbf16>
    %9 = vector.shape_cast %8 : vector<1x1x2x128xbf16> to vector<2x128xbf16>
    %cst_11 = arith.constant dense<0.000000e+00> : vector<2x256xf32>
    %10 = tpu.matmul %9, %3, %cst_11 {dimension_numbers = #tpu.dot_dimension_numbers<[1], [0], [0], [1], [0, 0, 1, 1], [], []>} : vector<2x128xbf16>, vector<128x256xbf16>, vector<2x256xf32> -> vector<2x256xf32>
    %11 = arith.addf %1, %10 : vector<2x256xf32>
    %c1_12 = arith.constant 1 : index
    %c0_13 = arith.constant 0 : index
    %c0_14 = arith.constant 0 : index
    %12 = vector.load %arg7[%c1_12, %c0_13, %c0_14] : memref<9x128x256xbf16, #tpu.memory_space<vmem>>, vector<1x128x256xbf16>
    %13 = vector.shape_cast %12 : vector<1x128x256xbf16> to vector<128x256xbf16>
    %c0_15 = arith.constant 0 : index
    %c0_16 = arith.constant 0 : index
    %c0_17 = arith.constant 0 : index
    %c0_18 = arith.constant 0 : index
    %14 = vector.load %arg2[%c0_15, %c0_16, %c0_17, %c0_18] : memref<2x1x3x128xbf16, #tpu.memory_space<vmem>>, vector<1x1x2x128xbf16>
    %15 = vector.shape_cast %14 : vector<1x1x2x128xbf16> to vector<2x128xbf16>
    %cst_19 = arith.constant dense<0.000000e+00> : vector<2x256xf32>
    %16 = tpu.matmul %15, %13, %cst_19 {dimension_numbers = #tpu.dot_dimension_numbers<[1], [0], [0], [1], [0, 0, 1, 1], [], []>} : vector<2x128xbf16>, vector<128x256xbf16>, vector<2x256xf32> -> vector<2x256xf32>
    %17 = arith.addf %7, %16 : vector<2x256xf32>
    %c1_20 = arith.constant 1 : index
    %c0_21 = arith.constant 0 : index
    %c0_22 = arith.constant 0 : index
    %c0_23 = arith.constant 0 : index
    %18 = vector.load %arg2[%c1_20, %c0_21, %c0_22, %c0_23] : memref<2x1x3x128xbf16, #tpu.memory_space<vmem>>, vector<1x1x2x128xbf16>
    %19 = vector.shape_cast %18 : vector<1x1x2x128xbf16> to vector<2x128xbf16>
    %cst_24 = arith.constant dense<0.000000e+00> : vector<2x256xf32>
    %20 = tpu.matmul %19, %13, %cst_24 {dimension_numbers = #tpu.dot_dimension_numbers<[1], [0], [0], [1], [0, 0, 1, 1], [], []>} : vector<2x128xbf16>, vector<128x256xbf16>, vector<2x256xf32> -> vector<2x256xf32>
    %21 = arith.addf %11, %20 : vector<2x256xf32>
    %c2 = arith.constant 2 : index
    %c0_25 = arith.constant 0 : index
    %c0_26 = arith.constant 0 : index
    %22 = vector.load %arg7[%c2, %c0_25, %c0_26] : memref<9x128x256xbf16, #tpu.memory_space<vmem>>, vector<1x128x256xbf16>
    %23 = vector.shape_cast %22 : vector<1x128x256xbf16> to vector<128x256xbf16>
    %c0_27 = arith.constant 0 : index
    %c0_28 = arith.constant 0 : index
    %c1_29 = arith.constant 1 : index
    %c0_30 = arith.constant 0 : index
    %24 = vector.load %arg1[%c0_27, %c0_28, %c1_29, %c0_30] : memref<2x1x3x128xbf16, #tpu.memory_space<vmem>>, vector<1x1x2x128xbf16>
    %25 = vector.shape_cast %24 : vector<1x1x2x128xbf16> to vector<2x128xbf16>
    %cst_31 = arith.constant dense<0.000000e+00> : vector<2x256xf32>
    %26 = tpu.matmul %25, %23, %cst_31 {dimension_numbers = #tpu.dot_dimension_numbers<[1], [0], [0], [1], [0, 0, 1, 1], [], []>} : vector<2x128xbf16>, vector<128x256xbf16>, vector<2x256xf32> -> vector<2x256xf32>
    %27 = arith.addf %17, %26 : vector<2x256xf32>
    %c1_32 = arith.constant 1 : index
    %c0_33 = arith.constant 0 : index
    %c1_34 = arith.constant 1 : index
    %c0_35 = arith.constant 0 : index
    %28 = vector.load %arg1[%c1_32, %c0_33, %c1_34, %c0_35] : memref<2x1x3x128xbf16, #tpu.memory_space<vmem>>, vector<1x1x2x128xbf16>
    %29 = vector.shape_cast %28 : vector<1x1x2x128xbf16> to vector<2x128xbf16>
    %cst_36 = arith.constant dense<0.000000e+00> : vector<2x256xf32>
    %30 = tpu.matmul %29, %23, %cst_36 {dimension_numbers = #tpu.dot_dimension_numbers<[1], [0], [0], [1], [0, 0, 1, 1], [], []>} : vector<2x128xbf16>, vector<128x256xbf16>, vector<2x256xf32> -> vector<2x256xf32>
    %31 = arith.addf %21, %30 : vector<2x256xf32>
    %c3 = arith.constant 3 : index
    %c0_37 = arith.constant 0 : index
    %c0_38 = arith.constant 0 : index
    %32 = vector.load %arg7[%c3, %c0_37, %c0_38] : memref<9x128x256xbf16, #tpu.memory_space<vmem>>, vector<1x128x256xbf16>
    %33 = vector.shape_cast %32 : vector<1x128x256xbf16> to vector<128x256xbf16>
    %c0_39 = arith.constant 0 : index
    %c0_40 = arith.constant 0 : index
    %c0_41 = arith.constant 0 : index
    %c0_42 = arith.constant 0 : index
    %34 = vector.load %arg3[%c0_39, %c0_40, %c0_41, %c0_42] : memref<2x1x3x128xbf16, #tpu.memory_space<vmem>>, vector<1x1x2x128xbf16>
    %35 = vector.shape_cast %34 : vector<1x1x2x128xbf16> to vector<2x128xbf16>
    %cst_43 = arith.constant dense<0.000000e+00> : vector<2x256xf32>
    %36 = tpu.matmul %35, %33, %cst_43 {dimension_numbers = #tpu.dot_dimension_numbers<[1], [0], [0], [1], [0, 0, 1, 1], [], []>} : vector<2x128xbf16>, vector<128x256xbf16>, vector<2x256xf32> -> vector<2x256xf32>
    %37 = arith.addf %27, %36 : vector<2x256xf32>
    %c1_44 = arith.constant 1 : index
    %c0_45 = arith.constant 0 : index
    %c0_46 = arith.constant 0 : index
    %c0_47 = arith.constant 0 : index
    %38 = vector.load %arg3[%c1_44, %c0_45, %c0_46, %c0_47] : memref<2x1x3x128xbf16, #tpu.memory_space<vmem>>, vector<1x1x2x128xbf16>
    %39 = vector.shape_cast %38 : vector<1x1x2x128xbf16> to vector<2x128xbf16>
    %cst_48 = arith.constant dense<0.000000e+00> : vector<2x256xf32>
    %40 = tpu.matmul %39, %33, %cst_48 {dimension_numbers = #tpu.dot_dimension_numbers<[1], [0], [0], [1], [0, 0, 1, 1], [], []>} : vector<2x128xbf16>, vector<128x256xbf16>, vector<2x256xf32> -> vector<2x256xf32>
    %41 = arith.addf %31, %40 : vector<2x256xf32>
    %c4 = arith.constant 4 : index
    %c0_49 = arith.constant 0 : index
    %c0_50 = arith.constant 0 : index
    %42 = vector.load %arg7[%c4, %c0_49, %c0_50] : memref<9x128x256xbf16, #tpu.memory_space<vmem>>, vector<1x128x256xbf16>
    %43 = vector.shape_cast %42 : vector<1x128x256xbf16> to vector<128x256xbf16>
    %c0_51 = arith.constant 0 : index
    %c0_52 = arith.constant 0 : index
    %c0_53 = arith.constant 0 : index
    %c0_54 = arith.constant 0 : index
    %44 = vector.load %arg4[%c0_51, %c0_52, %c0_53, %c0_54] : memref<2x1x3x128xbf16, #tpu.memory_space<vmem>>, vector<1x1x2x128xbf16>
    %45 = vector.shape_cast %44 : vector<1x1x2x128xbf16> to vector<2x128xbf16>
    %cst_55 = arith.constant dense<0.000000e+00> : vector<2x256xf32>
    %46 = tpu.matmul %45, %43, %cst_55 {dimension_numbers = #tpu.dot_dimension_numbers<[1], [0], [0], [1], [0, 0, 1, 1], [], []>} : vector<2x128xbf16>, vector<128x256xbf16>, vector<2x256xf32> -> vector<2x256xf32>
    %47 = arith.addf %37, %46 : vector<2x256xf32>
    %c1_56 = arith.constant 1 : index
    %c0_57 = arith.constant 0 : index
    %c0_58 = arith.constant 0 : index
    %c0_59 = arith.constant 0 : index
    %48 = vector.load %arg4[%c1_56, %c0_57, %c0_58, %c0_59] : memref<2x1x3x128xbf16, #tpu.memory_space<vmem>>, vector<1x1x2x128xbf16>
    %49 = vector.shape_cast %48 : vector<1x1x2x128xbf16> to vector<2x128xbf16>
    %cst_60 = arith.constant dense<0.000000e+00> : vector<2x256xf32>
    %50 = tpu.matmul %49, %43, %cst_60 {dimension_numbers = #tpu.dot_dimension_numbers<[1], [0], [0], [1], [0, 0, 1, 1], [], []>} : vector<2x128xbf16>, vector<128x256xbf16>, vector<2x256xf32> -> vector<2x256xf32>
    %51 = arith.addf %41, %50 : vector<2x256xf32>
    %c5 = arith.constant 5 : index
    %c0_61 = arith.constant 0 : index
    %c0_62 = arith.constant 0 : index
    %52 = vector.load %arg7[%c5, %c0_61, %c0_62] : memref<9x128x256xbf16, #tpu.memory_space<vmem>>, vector<1x128x256xbf16>
    %53 = vector.shape_cast %52 : vector<1x128x256xbf16> to vector<128x256xbf16>
    %c0_63 = arith.constant 0 : index
    %c0_64 = arith.constant 0 : index
    %c1_65 = arith.constant 1 : index
    %c0_66 = arith.constant 0 : index
    %54 = vector.load %arg3[%c0_63, %c0_64, %c1_65, %c0_66] : memref<2x1x3x128xbf16, #tpu.memory_space<vmem>>, vector<1x1x2x128xbf16>
    %55 = vector.shape_cast %54 : vector<1x1x2x128xbf16> to vector<2x128xbf16>
    %cst_67 = arith.constant dense<0.000000e+00> : vector<2x256xf32>
    %56 = tpu.matmul %55, %53, %cst_67 {dimension_numbers = #tpu.dot_dimension_numbers<[1], [0], [0], [1], [0, 0, 1, 1], [], []>} : vector<2x128xbf16>, vector<128x256xbf16>, vector<2x256xf32> -> vector<2x256xf32>
    %57 = arith.addf %47, %56 : vector<2x256xf32>
    %c1_68 = arith.constant 1 : index
    %c0_69 = arith.constant 0 : index
    %c1_70 = arith.constant 1 : index
    %c0_71 = arith.constant 0 : index
    %58 = vector.load %arg3[%c1_68, %c0_69, %c1_70, %c0_71] : memref<2x1x3x128xbf16, #tpu.memory_space<vmem>>, vector<1x1x2x128xbf16>
    %59 = vector.shape_cast %58 : vector<1x1x2x128xbf16> to vector<2x128xbf16>
    %cst_72 = arith.constant dense<0.000000e+00> : vector<2x256xf32>
    %60 = tpu.matmul %59, %53, %cst_72 {dimension_numbers = #tpu.dot_dimension_numbers<[1], [0], [0], [1], [0, 0, 1, 1], [], []>} : vector<2x128xbf16>, vector<128x256xbf16>, vector<2x256xf32> -> vector<2x256xf32>
    %61 = arith.addf %51, %60 : vector<2x256xf32>
    %c6 = arith.constant 6 : index
    %c0_73 = arith.constant 0 : index
    %c0_74 = arith.constant 0 : index
    %62 = vector.load %arg7[%c6, %c0_73, %c0_74] : memref<9x128x256xbf16, #tpu.memory_space<vmem>>, vector<1x128x256xbf16>
    %63 = vector.shape_cast %62 : vector<1x128x256xbf16> to vector<128x256xbf16>
    %c0_75 = arith.constant 0 : index
    %c0_76 = arith.constant 0 : index
    %c0_77 = arith.constant 0 : index
    %c0_78 = arith.constant 0 : index
    %64 = vector.load %arg5[%c0_75, %c0_76, %c0_77, %c0_78] : memref<2x1x3x128xbf16, #tpu.memory_space<vmem>>, vector<1x1x2x128xbf16>
    %65 = vector.shape_cast %64 : vector<1x1x2x128xbf16> to vector<2x128xbf16>
    %cst_79 = arith.constant dense<0.000000e+00> : vector<2x256xf32>
    %66 = tpu.matmul %65, %63, %cst_79 {dimension_numbers = #tpu.dot_dimension_numbers<[1], [0], [0], [1], [0, 0, 1, 1], [], []>} : vector<2x128xbf16>, vector<128x256xbf16>, vector<2x256xf32> -> vector<2x256xf32>
    %67 = arith.addf %57, %66 : vector<2x256xf32>
    %c1_80 = arith.constant 1 : index
    %c0_81 = arith.constant 0 : index
    %c0_82 = arith.constant 0 : index
    %c0_83 = arith.constant 0 : index
    %68 = vector.load %arg5[%c1_80, %c0_81, %c0_82, %c0_83] : memref<2x1x3x128xbf16, #tpu.memory_space<vmem>>, vector<1x1x2x128xbf16>
    %69 = vector.shape_cast %68 : vector<1x1x2x128xbf16> to vector<2x128xbf16>
    %cst_84 = arith.constant dense<0.000000e+00> : vector<2x256xf32>
    %70 = tpu.matmul %69, %63, %cst_84 {dimension_numbers = #tpu.dot_dimension_numbers<[1], [0], [0], [1], [0, 0, 1, 1], [], []>} : vector<2x128xbf16>, vector<128x256xbf16>, vector<2x256xf32> -> vector<2x256xf32>
    %71 = arith.addf %61, %70 : vector<2x256xf32>
    %c7 = arith.constant 7 : index
    %c0_85 = arith.constant 0 : index
    %c0_86 = arith.constant 0 : index
    %72 = vector.load %arg7[%c7, %c0_85, %c0_86] : memref<9x128x256xbf16, #tpu.memory_space<vmem>>, vector<1x128x256xbf16>
    %73 = vector.shape_cast %72 : vector<1x128x256xbf16> to vector<128x256xbf16>
    %c0_87 = arith.constant 0 : index
    %c0_88 = arith.constant 0 : index
    %c0_89 = arith.constant 0 : index
    %c0_90 = arith.constant 0 : index
    %74 = vector.load %arg6[%c0_87, %c0_88, %c0_89, %c0_90] : memref<2x1x3x128xbf16, #tpu.memory_space<vmem>>, vector<1x1x2x128xbf16>
    %75 = vector.shape_cast %74 : vector<1x1x2x128xbf16> to vector<2x128xbf16>
    %cst_91 = arith.constant dense<0.000000e+00> : vector<2x256xf32>
    %76 = tpu.matmul %75, %73, %cst_91 {dimension_numbers = #tpu.dot_dimension_numbers<[1], [0], [0], [1], [0, 0, 1, 1], [], []>} : vector<2x128xbf16>, vector<128x256xbf16>, vector<2x256xf32> -> vector<2x256xf32>
    %77 = arith.addf %67, %76 : vector<2x256xf32>
    %c1_92 = arith.constant 1 : index
    %c0_93 = arith.constant 0 : index
    %c0_94 = arith.constant 0 : index
    %c0_95 = arith.constant 0 : index
    %78 = vector.load %arg6[%c1_92, %c0_93, %c0_94, %c0_95] : memref<2x1x3x128xbf16, #tpu.memory_space<vmem>>, vector<1x1x2x128xbf16>
    %79 = vector.shape_cast %78 : vector<1x1x2x128xbf16> to vector<2x128xbf16>
    %cst_96 = arith.constant dense<0.000000e+00> : vector<2x256xf32>
    %80 = tpu.matmul %79, %73, %cst_96 {dimension_numbers = #tpu.dot_dimension_numbers<[1], [0], [0], [1], [0, 0, 1, 1], [], []>} : vector<2x128xbf16>, vector<128x256xbf16>, vector<2x256xf32> -> vector<2x256xf32>
    %81 = arith.addf %71, %80 : vector<2x256xf32>
    %c8 = arith.constant 8 : index
    %c0_97 = arith.constant 0 : index
    %c0_98 = arith.constant 0 : index
    %82 = vector.load %arg7[%c8, %c0_97, %c0_98] : memref<9x128x256xbf16, #tpu.memory_space<vmem>>, vector<1x128x256xbf16>
    %83 = vector.shape_cast %82 : vector<1x128x256xbf16> to vector<128x256xbf16>
    %c0_99 = arith.constant 0 : index
    %c0_100 = arith.constant 0 : index
    %c1_101 = arith.constant 1 : index
    %c0_102 = arith.constant 0 : index
    %84 = vector.load %arg5[%c0_99, %c0_100, %c1_101, %c0_102] : memref<2x1x3x128xbf16, #tpu.memory_space<vmem>>, vector<1x1x2x128xbf16>
    %85 = vector.shape_cast %84 : vector<1x1x2x128xbf16> to vector<2x128xbf16>
    %cst_103 = arith.constant dense<0.000000e+00> : vector<2x256xf32>
    %86 = tpu.matmul %85, %83, %cst_103 {dimension_numbers = #tpu.dot_dimension_numbers<[1], [0], [0], [1], [0, 0, 1, 1], [], []>} : vector<2x128xbf16>, vector<128x256xbf16>, vector<2x256xf32> -> vector<2x256xf32>
    %87 = arith.addf %77, %86 : vector<2x256xf32>
    %c1_104 = arith.constant 1 : index
    %c0_105 = arith.constant 0 : index
    %c1_106 = arith.constant 1 : index
    %c0_107 = arith.constant 0 : index
    %88 = vector.load %arg5[%c1_104, %c0_105, %c1_106, %c0_107] : memref<2x1x3x128xbf16, #tpu.memory_space<vmem>>, vector<1x1x2x128xbf16>
    %89 = vector.shape_cast %88 : vector<1x1x2x128xbf16> to vector<2x128xbf16>
    %cst_108 = arith.constant dense<0.000000e+00> : vector<2x256xf32>
    %90 = tpu.matmul %89, %83, %cst_108 {dimension_numbers = #tpu.dot_dimension_numbers<[1], [0], [0], [1], [0, 0, 1, 1], [], []>} : vector<2x128xbf16>, vector<128x256xbf16>, vector<2x256xf32> -> vector<2x256xf32>
    %91 = arith.addf %81, %90 : vector<2x256xf32>
    %cst_109 = arith.constant 0.000000e+00 : f32
    %92 = vector.broadcast %cst_109 : f32 to vector<1x256xf32>
    %cst_110 = arith.constant 0.000000e+00 : f32
    %93 = vector.broadcast %cst_110 : f32 to vector<1x256xf32>
    %94 = arith.truncf %87 : vector<2x256xf32> to vector<2x256xbf16>
    %c0_111 = arith.constant 0 : index
    %c0_112 = arith.constant 0 : index
    %c0_113 = arith.constant 0 : index
    %c0_114 = arith.constant 0 : index
    %95 = vector.load %arg8[%c0_111, %c0_112, %c0_113, %c0_114] : memref<2x1x2x256xbf16, #tpu.memory_space<vmem>>, vector<1x1x2x256xbf16>
    %96 = vector.shape_cast %95 : vector<1x1x2x256xbf16> to vector<2x256xbf16>
    %97 = vector.shape_cast %94 : vector<2x256xbf16> to vector<1x1x2x256xbf16>
    tpu.vector_store %arg8[%c0_111, %c0_112, %c0_113, %c0_114], %97 {strides = array<i32>} : memref<2x1x2x256xbf16, #tpu.memory_space<vmem>>, vector<1x1x2x256xbf16>,
    %cst_115 = arith.constant dense<0.000000e+00> : vector<256xf32>
    %98 = vector.multi_reduction <add>, %87, %cst_115 [0] : vector<2x256xf32> to vector<256xf32>
    %99 = vector.shape_cast %98 : vector<256xf32> to vector<1x256xf32>
    %100 = arith.addf %92, %99 : vector<1x256xf32>
    %101 = arith.mulf %87, %87 : vector<2x256xf32>
    %cst_116 = arith.constant dense<0.000000e+00> : vector<256xf32>
    %102 = vector.multi_reduction <add>, %101, %cst_116 [0] : vector<2x256xf32> to vector<256xf32>
    %103 = vector.shape_cast %102 : vector<256xf32> to vector<1x256xf32>
    %104 = arith.addf %93, %103 : vector<1x256xf32>
    %105 = arith.truncf %91 : vector<2x256xf32> to vector<2x256xbf16>
    %c1_117 = arith.constant 1 : index
    %c0_118 = arith.constant 0 : index
    %c0_119 = arith.constant 0 : index
    %c0_120 = arith.constant 0 : index
    %106 = vector.load %arg8[%c1_117, %c0_118, %c0_119, %c0_120] : memref<2x1x2x256xbf16, #tpu.memory_space<vmem>>, vector<1x1x2x256xbf16>
    %107 = vector.shape_cast %106 : vector<1x1x2x256xbf16> to vector<2x256xbf16>
    %108 = vector.shape_cast %105 : vector<2x256xbf16> to vector<1x1x2x256xbf16>
    tpu.vector_store %arg8[%c1_117, %c0_118, %c0_119, %c0_120], %108 {strides = array<i32>} : memref<2x1x2x256xbf16, #tpu.memory_space<vmem>>, vector<1x1x2x256xbf16>,
    %cst_121 = arith.constant dense<0.000000e+00> : vector<256xf32>
    %109 = vector.multi_reduction <add>, %91, %cst_121 [0] : vector<2x256xf32> to vector<256xf32>
    %110 = vector.shape_cast %109 : vector<256xf32> to vector<1x256xf32>
    %111 = arith.addf %100, %110 : vector<1x256xf32>
    %112 = arith.mulf %91, %91 : vector<2x256xf32>
    %cst_122 = arith.constant dense<0.000000e+00> : vector<256xf32>
    %113 = vector.multi_reduction <add>, %112, %cst_122 [0] : vector<2x256xf32> to vector<256xf32>
    %114 = vector.shape_cast %113 : vector<256xf32> to vector<1x256xf32>
    %115 = arith.addf %104, %114 : vector<1x256xf32>
    %c0_i32 = arith.constant 0 : i32
    %116 = arith.cmpi eq, %arg0, %c0_i32 : i32
    %117 = arith.extui %116 : i1 to i32
    %c0_i32_123 = arith.constant 0 : i32
    %118 = arith.cmpi ne, %117, %c0_i32_123 : i32
    scf.if %118 {
      %cst_132 = arith.constant 0.000000e+00 : f32
      %125 = vector.broadcast %cst_132 : f32 to vector<1x256xf32>
      %c0_133 = arith.constant 0 : index
      %c0_134 = arith.constant 0 : index
      %126 = vector.load %arg9[%c0_133, %c0_134] : memref<1x256xf32, #tpu.memory_space<vmem>>, vector<1x256xf32>
      tpu.vector_store %arg9[%c0_133, %c0_134], %125 {strides = array<i32>} : memref<1x256xf32, #tpu.memory_space<vmem>>, vector<1x256xf32>,
      %cst_135 = arith.constant 0.000000e+00 : f32
      %127 = vector.broadcast %cst_135 : f32 to vector<1x256xf32>
      %c0_136 = arith.constant 0 : index
      %c0_137 = arith.constant 0 : index
      %128 = vector.load %arg10[%c0_136, %c0_137] : memref<1x256xf32, #tpu.memory_space<vmem>>, vector<1x256xf32>
      tpu.vector_store %arg10[%c0_136, %c0_137], %127 {strides = array<i32>} : memref<1x256xf32, #tpu.memory_space<vmem>>, vector<1x256xf32>,
    } else {
    }
    %c0_124 = arith.constant 0 : index
    %c0_125 = arith.constant 0 : index
    %119 = vector.load %arg9[%c0_124, %c0_125] : memref<1x256xf32, #tpu.memory_space<vmem>>, vector<1x256xf32>
    %120 = arith.addf %119, %111 : vector<1x256xf32>
    %c0_126 = arith.constant 0 : index
    %c0_127 = arith.constant 0 : index
    %121 = vector.load %arg9[%c0_126, %c0_127] : memref<1x256xf32, #tpu.memory_space<vmem>>, vector<1x256xf32>
    tpu.vector_store %arg9[%c0_126, %c0_127], %120 {strides = array<i32>} : memref<1x256xf32, #tpu.memory_space<vmem>>, vector<1x256xf32>,
    %c0_128 = arith.constant 0 : index
    %c0_129 = arith.constant 0 : index
    %122 = vector.load %arg10[%c0_128, %c0_129] : memref<1x256xf32, #tpu.memory_space<vmem>>, vector<1x256xf32>
    %123 = arith.addf %122, %115 : vector<1x256xf32>
    %c0_130 = arith.constant 0 : index
    %c0_131 = arith.constant 0 : index
    %124 = vector.load %arg10[%c0_130, %c0_131] : memref<1x256xf32, #tpu.memory_space<vmem>>, vector<1x256xf32>
    tpu.vector_store %arg10[%c0_130, %c0_131], %123 {strides = array<i32>} : memref<1x256xf32, #tpu.memory_space<vmem>>, vector<1x256xf32>,
    return
  }
  func.func @transform_0(%arg0: i32) -> (i32, i32, i32, i32) {
    %c2_i32 = arith.constant 2 : i32
    %0 = arith.muli %arg0, %c2_i32 : i32
    %c0_i32 = arith.constant 0 : i32
    %1 = arith.addi %0, %c0_i32 : i32
    %c0_i32_0 = arith.constant 0 : i32
    %c0_i32_1 = arith.constant 0 : i32
    %c0_i32_2 = arith.constant 0 : i32
    %c0_i32_3 = arith.constant 0 : i32
    return %c0_i32_0, %1, %c0_i32_1, %c0_i32_2 : i32, i32, i32, i32
  }
  func.func @transform_1(%arg0: i32) -> (i32, i32, i32, i32) {
    %c2_i32 = arith.constant 2 : i32
    %0 = arith.muli %arg0, %c2_i32 : i32
    %c0_i32 = arith.constant 0 : i32
    %1 = arith.addi %0, %c0_i32 : i32
    %c0_i32_0 = arith.constant 0 : i32
    %c0_i32_1 = arith.constant 0 : i32
    %c0_i32_2 = arith.constant 0 : i32
    %c0_i32_3 = arith.constant 0 : i32
    return %c0_i32_0, %1, %c0_i32_1, %c0_i32_2 : i32, i32, i32, i32
  }
  func.func @transform_2(%arg0: i32) -> (i32, i32, i32, i32) {
    %c2_i32 = arith.constant 2 : i32
    %0 = arith.muli %arg0, %c2_i32 : i32
    %c1_i32 = arith.constant 1 : i32
    %1 = arith.addi %0, %c1_i32 : i32
    %c0_i32 = arith.constant 0 : i32
    %c0_i32_0 = arith.constant 0 : i32
    %c0_i32_1 = arith.constant 0 : i32
    %c0_i32_2 = arith.constant 0 : i32
    return %c0_i32, %1, %c0_i32_0, %c0_i32_1 : i32, i32, i32, i32
  }
  func.func @transform_3(%arg0: i32) -> (i32, i32, i32, i32) {
    %c2_i32 = arith.constant 2 : i32
    %0 = arith.muli %arg0, %c2_i32 : i32
    %c1_i32 = arith.constant 1 : i32
    %1 = arith.addi %0, %c1_i32 : i32
    %c0_i32 = arith.constant 0 : i32
    %c0_i32_0 = arith.constant 0 : i32
    %c0_i32_1 = arith.constant 0 : i32
    %c0_i32_2 = arith.constant 0 : i32
    return %c0_i32, %1, %c0_i32_0, %c0_i32_1 : i32, i32, i32, i32
  }
  func.func @transform_4(%arg0: i32) -> (i32, i32, i32, i32) {
    %c2_i32 = arith.constant 2 : i32
    %0 = arith.muli %arg0, %c2_i32 : i32
    %c2_i32_0 = arith.constant 2 : i32
    %1 = arith.addi %0, %c2_i32_0 : i32
    %c0_i32 = arith.constant 0 : i32
    %c0_i32_1 = arith.constant 0 : i32
    %c0_i32_2 = arith.constant 0 : i32
    %c0_i32_3 = arith.constant 0 : i32
    return %c0_i32, %1, %c0_i32_1, %c0_i32_2 : i32, i32, i32, i32
  }
  func.func @transform_5(%arg0: i32) -> (i32, i32, i32, i32) {
    %c2_i32 = arith.constant 2 : i32
    %0 = arith.muli %arg0, %c2_i32 : i32
    %c2_i32_0 = arith.constant 2 : i32
    %1 = arith.addi %0, %c2_i32_0 : i32
    %c0_i32 = arith.constant 0 : i32
    %c0_i32_1 = arith.constant 0 : i32
    %c0_i32_2 = arith.constant 0 : i32
    %c0_i32_3 = arith.constant 0 : i32
    return %c0_i32, %1, %c0_i32_1, %c0_i32_2 : i32, i32, i32, i32
  }
  func.func @transform_6(%arg0: i32) -> (i32, i32, i32) {
    %c0_i32 = arith.constant 0 : i32
    %c0_i32_0 = arith.constant 0 : i32
    %c0_i32_1 = arith.constant 0 : i32
    %c0_i32_2 = arith.constant 0 : i32
    return %c0_i32, %c0_i32_0, %c0_i32_1 : i32, i32, i32
  }
  func.func @transform_7(%arg0: i32) -> (i32, i32, i32, i32) {
    %c0_i32 = arith.constant 0 : i32
    %c0_i32_0 = arith.constant 0 : i32
    %c0_i32_1 = arith.constant 0 : i32
    %c0_i32_2 = arith.constant 0 : i32
    return %c0_i32, %arg0, %c0_i32_0, %c0_i32_1 : i32, i32, i32, i32
  }
  func.func @transform_8(%arg0: i32) -> (i32, i32) {
    %c0_i32 = arith.constant 0 : i32
    %c0_i32_0 = arith.constant 0 : i32
    %c0_i32_1 = arith.constant 0 : i32
    return %c0_i32, %c0_i32_0 : i32, i32
  }
  func.func @transform_9(%arg0: i32) -> (i32, i32) {
    %c0_i32 = arith.constant 0 : i32
    %c0_i32_0 = arith.constant 0 : i32
    %c0_i32_1 = arith.constant 0 : i32
    return %c0_i32, %c0_i32_0 : i32, i32
  }
}

module attributes {stable_mosaic.version = 11 : i64} {
  func.func @_affine_relu_kernel(%arg0: i32, %arg1: memref<2x2x2x256xbf16, #tpu.memory_space<vmem>>, %arg2: memref<1x256xf32, #tpu.memory_space<vmem>>, %arg3: memref<1x256xf32, #tpu.memory_space<vmem>>, %arg4: memref<2x2x2x256xbf16, #tpu.memory_space<vmem>>) attributes {dimension_semantics = [#tpu.dimension_semantics<parallel>], iteration_bounds = array<i64: 1>, scalar_prefetch = 0 : i64, scratch_operands = 0 : i64, tpu.core_type = #tpu.core_type<tc>, window_params = [{transform_indices = @transform_0, window_bounds = array<i64: 2, 2, 2, 256>}, {pipeline_mode = #tpu.pipeline_mode<synchronous>, transform_indices = @transform_1, window_bounds = array<i64: 1, 256>}, {pipeline_mode = #tpu.pipeline_mode<synchronous>, transform_indices = @transform_2, window_bounds = array<i64: 1, 256>}, {transform_indices = @transform_3, window_bounds = array<i64: 2, 2, 2, 256>}]} {
    %c0 = arith.constant 0 : index
    %c0_0 = arith.constant 0 : index
    %c0_1 = arith.constant 0 : index
    %c0_2 = arith.constant 0 : index
    %0 = vector.load %arg1[%c0, %c0_0, %c0_1, %c0_2] : memref<2x2x2x256xbf16, #tpu.memory_space<vmem>>, vector<2x2x2x256xbf16>
    %1 = arith.extf %0 : vector<2x2x2x256xbf16> to vector<2x2x2x256xf32>
    %c0_3 = arith.constant 0 : index
    %c0_4 = arith.constant 0 : index
    %2 = vector.load %arg2[%c0_3, %c0_4] : memref<1x256xf32, #tpu.memory_space<vmem>>, vector<1x256xf32>
    %3 = vector.shape_cast %2 : vector<1x256xf32> to vector<256xf32>
    %4 = vector.shape_cast %3 : vector<256xf32> to vector<1x1x1x256xf32>
    %5 = vector.broadcast %4 : vector<1x1x1x256xf32> to vector<2x2x2x256xf32>
    %6 = arith.mulf %1, %5 : vector<2x2x2x256xf32>
    %c0_5 = arith.constant 0 : index
    %c0_6 = arith.constant 0 : index
    %7 = vector.load %arg3[%c0_5, %c0_6] : memref<1x256xf32, #tpu.memory_space<vmem>>, vector<1x256xf32>
    %8 = vector.shape_cast %7 : vector<1x256xf32> to vector<256xf32>
    %9 = vector.shape_cast %8 : vector<256xf32> to vector<1x1x1x256xf32>
    %10 = vector.broadcast %9 : vector<1x1x1x256xf32> to vector<2x2x2x256xf32>
    %11 = arith.addf %6, %10 : vector<2x2x2x256xf32>
    %cst = arith.constant 0.000000e+00 : f32
    %12 = vector.broadcast %cst : f32 to vector<2x2x2x256xf32>
    %13 = arith.maximumf %11, %12 : vector<2x2x2x256xf32>
    %14 = arith.truncf %13 : vector<2x2x2x256xf32> to vector<2x2x2x256xbf16>
    %c0_7 = arith.constant 0 : index
    %c0_8 = arith.constant 0 : index
    %c0_9 = arith.constant 0 : index
    %c0_10 = arith.constant 0 : index
    %15 = vector.load %arg4[%c0_7, %c0_8, %c0_9, %c0_10] : memref<2x2x2x256xbf16, #tpu.memory_space<vmem>>, vector<2x2x2x256xbf16>
    tpu.vector_store %arg4[%c0_7, %c0_8, %c0_9, %c0_10], %14 {strides = array<i32>} : memref<2x2x2x256xbf16, #tpu.memory_space<vmem>>, vector<2x2x2x256xbf16>,
    return
  }
  func.func @transform_0(%arg0: i32) -> (i32, i32, i32, i32) {
    %c0_i32 = arith.constant 0 : i32
    %c0_i32_0 = arith.constant 0 : i32
    %c0_i32_1 = arith.constant 0 : i32
    %c0_i32_2 = arith.constant 0 : i32
    return %c0_i32, %arg0, %c0_i32_0, %c0_i32_1 : i32, i32, i32, i32
  }
  func.func @transform_1(%arg0: i32) -> (i32, i32) {
    %c0_i32 = arith.constant 0 : i32
    %c0_i32_0 = arith.constant 0 : i32
    %c0_i32_1 = arith.constant 0 : i32
    return %c0_i32, %c0_i32_0 : i32, i32
  }
  func.func @transform_2(%arg0: i32) -> (i32, i32) {
    %c0_i32 = arith.constant 0 : i32
    %c0_i32_0 = arith.constant 0 : i32
    %c0_i32_1 = arith.constant 0 : i32
    return %c0_i32, %c0_i32_0 : i32, i32
  }
  func.func @transform_3(%arg0: i32) -> (i32, i32, i32, i32) {
    %c0_i32 = arith.constant 0 : i32
    %c0_i32_0 = arith.constant 0 : i32
    %c0_i32_1 = arith.constant 0 : i32
    %c0_i32_2 = arith.constant 0 : i32
    return %c0_i32, %arg0, %c0_i32_0, %c0_i32_1 : i32, i32, i32, i32
  }
}

</mosaic_0001>

<bundles_post_ra>
// kernel: xception_forward.9
= control target key start
LH: loop header
LB: loop body
LE: loop exit
PB: predicated region body
PF: predicated region fallthrough
CT: control target
= control target key end

     0   :  { %s342_s0 = inlined_call_operand.vmem [shape: bf16[2,8,8,128], index: 0, kind: input, shape index: {}]   ;;  %s343_s1 = inlined_call_operand.vmem [shape: f32[1,128], index: 1, kind: input, shape index: {}]   ;;  %s344_s2 = inlined_call_operand.vmem [shape: f32[1,128], index: 2, kind: input, shape index: {}]   ;;  %s345_s3 = inlined_call_operand.vmem [shape: bf16[2,8,8,128], index: 3, kind: output, shape index: {}]  }
   0x1   :  { %v147_v0 = vld [vmem:[%s342_s0] sm:$0xff]   ;;  %v218_v4 = vld [vmem:[%s342_s0 + $0x8] sm:$0xff]   ;;  %v219_v5 = vld [vmem:[%s342_s0 + $0x10] sm:$0xff]  }
   0x2   :  { %v258_v1 = vld [vmem:[%s343_s1] ss:$0 sm:$0xff]  ;;  %v148_v2 = vunpack.c.l.bf16 %v147_v0  ;;  %v149_v3 = vunpack.c.h.bf16 %v147_v0  ;;  %v220_v6 = vld [vmem:[%s342_s0 + $0x18] sm:$0xff]   ;;  %v152_v8 = vunpack.c.l.bf16 %v218_v4  ;;  %v153_v9 = vunpack.c.h.bf16 %v218_v4  ;;  %v222_v33 = vld [vmem:[%s342_s0 + $0x28] sm:$0xff]  }
   0x3   :  { %v272_v7 = vld [vmem:[%s344_s2] ss:$0 sm:$0xff]  ;;  %v156_v10 = vunpack.c.l.bf16 %v219_v5  ;;  %v157_v11 = vunpack.c.h.bf16 %v219_v5  ;;  %v160_v14 = vunpack.c.l.bf16 %v220_v6  ;;  %v161_v15 = vunpack.c.h.bf16 %v220_v6  ;;  %v223_v38 = vld [vmem:[%s342_s0 + $0x30] sm:$0xff]   ;;  %v224_v43 = vld [vmem:[%s342_s0 + $0x38] sm:$0xff]  }
   0x4   :  { %v53_v12 = vmul.f32 %v148_v2, %v258_v1  ;;  %v54_v13 = vmul.f32 %v149_v3, %v258_v1  ;;  %v55_v16 = vmul.f32 %v152_v8, %v258_v1  ;;  %v56_v17 = vmul.f32 %v153_v9, %v258_v1  ;;  %v221_v28 = vld [vmem:[%s342_s0 + $0x20] sm:$0xff]  }
   0x5   :  { %v57_v18 = vmul.f32 %v156_v10, %v258_v1  ;;  %v58_v19 = vmul.f32 %v157_v11, %v258_v1  ;;  %v59_v22 = vmul.f32 %v160_v14, %v258_v1  ;;  %v60_v23 = vmul.f32 %v161_v15, %v258_v1 }
   0x6   :  { %v76_v20 = vadd.f32 %v272_v7, %v53_v12  ;;  %v77_v21 = vadd.f32 %v272_v7, %v54_v13  ;;  %v78_v24 = vadd.f32 %v272_v7, %v55_v16  ;;  %v79_v25 = vadd.f32 %v272_v7, %v56_v17 }
   0x7   :  { %v80_v26 = vadd.f32 %v272_v7, %v57_v18  ;;  %v81_v27 = vadd.f32 %v272_v7, %v58_v19  ;;  %v82_v31 = vadd.f32 %v272_v7, %v59_v22  ;;  %v83_v32 = vadd.f32 %v272_v7, %v60_v23 }
   0x8   :  { %v92_v29 = vmax.f32 %v76_v20, 0.0  ;;  %v93_v30 = vmax.f32 %v77_v21, 0.0  ;;  %v94_v34 = vmax.f32 %v78_v24, 0.0  ;;  %v95_v35 = vmax.f32 %v79_v25, 0.0 }
   0x9   :  { %v96_v36 = vmax.f32 %v80_v26, 0.0  ;;  %v97_v37 = vmax.f32 %v81_v27, 0.0  ;;  %v98_v40 = vmax.f32 %v82_v31, 0.0  ;;  %v99_v41 = vmax.f32 %v83_v32, 0.0 }
   0xa   :  { %v181_v39 = vpack.c.bf16 %v93_v30, %v92_v29  ;;  %v164_v42 = vunpack.c.l.bf16 %v221_v28  ;;  %v186_v44 = vpack.c.bf16 %v95_v35, %v94_v34  ;;  %v165_v46 = vunpack.c.h.bf16 %v221_v28 }
   0xb   :  { %v191_v45 = vpack.c.bf16 %v97_v37, %v96_v36  ;;  %v168_v47 = vunpack.c.l.bf16 %v222_v33  ;;  %v196_v48 = vpack.c.bf16 %v99_v41, %v98_v40  ;;  %v169_v50 = vunpack.c.h.bf16 %v222_v33 }
   0xc   :  { %182 = vst [vmem:[%s345_s3] sm:$0xff] %v181_v39   ;;  %v61_v49 = vmul.f32 %v164_v42, %v258_v1  ;;  %v172_v51 = vunpack.c.l.bf16 %v223_v38  ;;  %225 = vst [vmem:[%s345_s3 + $0x8] sm:$0xff] %v186_v44   ;;  %v62_v52 = vmul.f32 %v165_v46, %v258_v1  ;;  %v173_v54 = vunpack.c.h.bf16 %v223_v38 }
   0xd   :  { %226 = vst [vmem:[%s345_s3 + $0x10] sm:$0xff] %v191_v45   ;;  %v63_v53 = vmul.f32 %v168_v47, %v258_v1  ;;  %v176_v55 = vunpack.c.l.bf16 %v224_v43  ;;  %227 = vst [vmem:[%s345_s3 + $0x18] sm:$0xff] %v196_v48   ;;  %v64_v57 = vmul.f32 %v169_v50, %v258_v1  ;;  %v177_v59 = vunpack.c.h.bf16 %v224_v43 }
   0xe   :  { %v84_v56 = vadd.f32 %v272_v7, %v61_v49  ;;  %v65_v58 = vmul.f32 %v172_v51, %v258_v1  ;;  %v85_v60 = vadd.f32 %v272_v7, %v62_v52  ;;  %v66_v62 = vmul.f32 %v173_v54, %v258_v1 }
   0xf   :  { %v86_v61 = vadd.f32 %v272_v7, %v63_v53  ;;  %v67_v63 = vmul.f32 %v176_v55, %v258_v1  ;;  %v87_v2 = vadd.f32 %v272_v7, %v64_v57  ;;  %v68_v4 = vmul.f32 %v177_v59, %v258_v1 }
  0x10   :  { %v100_v0 = vmax.f32 %v84_v56, 0.0  ;;  %v88_v3 = vadd.f32 %v272_v7, %v65_v58  ;;  %v101_v5 = vmax.f32 %v85_v60, 0.0  ;;  %v89_v8 = vadd.f32 %v272_v7, %v66_v62 }
  0x11   :  { %v102_v6 = vmax.f32 %v86_v61, 0.0  ;;  %v90_v9 = vadd.f32 %v272_v7, %v67_v63  ;;  %v103_v10 = vmax.f32 %v87_v2, 0.0  ;;  %v91_v12 = vadd.f32 %v272_v7, %v68_v4 }
  0x12   :  { %v104_v11 = vmax.f32 %v88_v3, 0.0  ;;  %v201_v13 = vpack.c.bf16 %v101_v5, %v100_v0  ;;  %v105_v14 = vmax.f32 %v89_v8, 0.0 }
  0x13   :  { %v106_v15 = vmax.f32 %v90_v9, 0.0  ;;  %v206_v16 = vpack.c.bf16 %v103_v10, %v102_v6  ;;  %v107_v17 = vmax.f32 %v91_v12, 0.0 }
  0x14   :  { %228 = vst [vmem:[%s345_s3 + $0x20] sm:$0xff] %v201_v13   ;;  %v211_v1 = vpack.c.bf16 %v105_v14, %v104_v11 }
  0x15   :  { %229 = vst [vmem:[%s345_s3 + $0x28] sm:$0xff] %v206_v16   ;;  %v216_v18 = vpack.c.bf16 %v107_v17, %v106_v15 }
  0x16   :  { %230 = vst [vmem:[%s345_s3 + $0x30] sm:$0xff] %v211_v1  }
  0x17   :  { %231 = vst [vmem:[%s345_s3 + $0x38] sm:$0xff] %v216_v18  }

// kernel: xception_forward.8
= control target key start
LH: loop header
LB: loop body
LE: loop exit
PB: predicated region body
PF: predicated region fallthrough
CT: control target
= control target key end

     0   :  { %s629_s15 = smov 0   ;;  %s631_s16 = smov 0   ;;  %s710_s0 = inlined_call_operand.vmem [shape: bf16[2,8,8,32], index: 0, kind: input, shape index: {}]   ;;  %s711_s1 = inlined_call_operand.vmem [shape: bf16[1,32,128], index: 1, kind: input, shape index: {}]   ;;  %s712_s2 = inlined_call_operand.vmem [shape: bf16[2,8,8,128], index: 2, kind: output, shape index: {0}]   ;;  %s713_s3 = inlined_call_operand.vmem [shape: f32[1,128], index: 3, kind: output, shape index: {1}]   ;;  %s714_s4 = inlined_call_operand.vmem [shape: f32[1,128], index: 4, kind: output, shape index: {2}]  }
   0x1   :  { %s633_s17 = smov 0  }
   0x2 LB: > { %s642_s18 = sadd.s32 4294967295, %s599_s17   ;;  %s644_s19 = sadd.s32 1, %s599_s17   ;;  %s599_s17 = sphi %s633_s17, %s718_s17   ;;  %s595_s16 = sphi %s631_s16, %s717_s16   ;;  %s591_s15 = sphi %s629_s15, %s716_s15  }
   0x3   : > { %s19_s20 = ssub.s32 %s599_s17, %s644_s19  ;;  %s22_s21 = sadd.s32 1, %s595_s16 }
   0x4   : > { %p20_p0 = scmp.eq.s32.totalorder %s19_s20, 0  ;;  %p29_p1 = scmp.ne.s32.totalorder %s595_s16, %s591_s15 }
   0x5   : > { %p30_p2 = scmp.eq.s32.totalorder %s599_s17, 0  ;;  %p80_p3 = scmp.eq.s32.totalorder %s642_s18, 7 }
   0x6   : > { %s652_s22 = scalar_select %p20_p0, %s595_s16, %s22_s21  }
   0x7   : > { %p31_p4 = por %p30_p2, %p29_p1  ;;  %p654_p5 = por %p80_p3, %p29_p1 }
   0x8   : > { %p509_p6 = scmp.ge.s32.totalorder %s599_s17, 8 }
   0xa   : > { %147 = sbr.rel (%p509_p6) target bundleno = 24 (0x18), region = 20 }
  0x11   : > { %150 = sbr.rel (!%p31_p4) target bundleno = 24 (0x18), region = 24  ;;  %s152_s24 = sand.u32 (%p31_p4), 1, %s595_s16  }
  0x12   : > { %s511_s25 = sshll.u32 (%p31_p4), %s599_s17, 2  ;;  %s510_s26 = sshll.u32 (%p31_p4), %s152_s24, 3 }
  0x13   : > { %s156_s29 = scalar_lea.vmem (%p31_p4), %s710_s0, %s511_s25  ;;  %s154_s30 = scalar_lea.vmem (%p31_p4), [#allocation2], %s510_s26 }
  0x14   : > { %v172_v0 = vld [vmem:[%s156_s29] sm:$0xf] (%p31_p4) }
  0x15   : > { %v174_v1 = vld [vmem:[%s156_s29 + $0x20] sm:$0xf] (%p31_p4)  ;;  %173 = vst [vmem:[%s154_s30] sm:$0xf] (%p31_p4), %v172_v0 }
  0x16   : > { %175 = vst [vmem:[%s154_s30 + $0x4] sm:$0xf] (%p31_p4), %v174_v1 }
  0x18 PF: > { %p512_p7 = scmp.ge.s32.totalorder %s599_s17, 1  ;;  %p201_p8 = scmp.lt.s32.totalorder %s599_s17, 9 }
  0x1a   : > { %p202_p9 = pnand %p512_p7, %p201_p8 }
  0x1b   : > { %v575_v2 = vld [vmem:[%s711_s1] sm:$0xff] (!%p202_p9)   ;;  %v601_v3 = vmov (!%p202_p9), 0.0   ;;  %v576_v4 = vld [vmem:[%s711_s1 + $0x8] sm:$0xff] (!%p202_p9)   ;;  %s208_s9 = sand.u32 (!%p202_p9), 1, %s591_s15   ;;  %vm602_vm0 = vmmov (!%p202_p9), 0   ;;  %vm250_vm1 = vcmask (!%p202_p9), 261120  }
  0x1c   : > { %205 = sbr.rel (%p202_p9) target bundleno = 271 (0x10f), region = 65  ;;  %532 = vmatprep.subr.bf16.mxu0 (!%p202_p9), %v601_v3  ;;  %540 = vmatprep.subr.bf16.mxu1 (!%p202_p9), %v601_v3  ;;  %s513_s10 = sshll.u32 (!%p202_p9), %s208_s9, 3 }
  0x1d   : > { %533 = vmatpush3.bf16.msra.mxu0 (!%p202_p9), %v575_v2  ;;  %541 = vmatpush3.bf16.msra.mxu1 (!%p202_p9), %v575_v2  ;;  %s210_s11 = scalar_lea.vmem (!%p202_p9), [#allocation2], %s513_s10  ;;  %s669_s12 = scalar_lea.vmem (!%p202_p9), [#allocation3], %s513_s10 }
  0x1e   : > { %534 = vmatprep.subr.bf16.mxu0 (!%p202_p9), %v601_v3  ;;  %542 = vmatprep.subr.bf16.mxu1 (!%p202_p9), %v601_v3  ;;  %v237_v5 = vld [vmem:[%s210_s11] sm:$0xf] (!%p202_p9)  ;;  %v518_v6 = vld [vmem:[%s210_s11 + $0x4] sm:$0xf] (!%p202_p9)  ;;  %p521_p10 = scmp.ne.s32.totalorder (!%p202_p9), %s642_s18, 0 }
  0x1f   : > { %536 = vmatprep.mubr.msk.bf16.mxu0 (!%p202_p9), %vm602_vm0, %v601_v3  ;;  %544 = vmatprep.mubr.msk.bf16.mxu1 (!%p202_p9), %vm602_vm0, %v601_v3 }
  0x21   : > { %535 = vmatpush3.bf16.msra.mxu0 (!%p202_p9), %v576_v4  ;;  %543 = vmatpush3.bf16.msra.mxu1 (!%p202_p9), %v576_v4 }
  0x23   : > { %v603_v45 = vmov (!%p521_p10), 0.0  }
  0x24   : > { %537 = vmatmul.mubr.msk.bf16.vlgmr.msra.gmra.mrb[0].mxu0 %vm250_vm1, %v237_v5  ;;  %545 = vmatmul.mubr.msk.bf16.vlgmr.msra.gmra.mrb[0].mxu1 %vm250_vm1, %v518_v6  ;;  %378 = vst [vmem:[%s713_s3] sm:$0x1] (!%p521_p10), %v603_v45  ;;  %379 = vst [vmem:[%s714_s4] sm:$0x1] (!%p521_p10), %v603_v45 }
  0xf7   : > { %v288_v7 = vpop.f32.mrb[0].mxu0  ;;  %v333_v8 = vpop.f32.mrb[0].mxu1 }
  0xf8   : > { %v339_v9 = vpack.c.bf16 %v288_v7, %v288_v7  ;;  %v341_v10 = vrot.slane %v288_v7, 4  ;;  %v348_v11 = vmul.f32 %v288_v7, %v288_v7  ;;  %v356_v12 = vpack.c.bf16 %v333_v8, %v333_v8  ;;  %v538_v13 = vpop.f32.mrb[1].mxu0  ;;  %v546_v14 = vpop.f32.mrb[1].mxu1 }
  0xf9   : > { %v359_v15 = vrot.slane %v333_v8, 4  ;;  %v366_v16 = vmul.f32 %v333_v8, %v333_v8  ;;  %v291_v17 = vpop.f32.mrb[2].mxu0  ;;  %v336_v18 = vpop.f32.mrb[2].mxu1 }
  0xfa   : > { %340 = vst [vmem:[%s669_s12] sm:$0xf] %v339_v9  ;;  %v342_v19 = vadd.f32 %v341_v10, %v288_v7  ;;  %v349_v20 = vrot.slane %v348_v11, 4  ;;  %520 = vst [vmem:[%s669_s12 + $0x4] sm:$0xf] %v356_v12  ;;  %v539_v21 = vpop.f32.mrb[3].mxu0  ;;  %v547_v22 = vpop.f32.mrb[3].mxu1 }
  0xfb   : > { %v360_v23 = vadd.f32 %v359_v15, %v333_v8  ;;  %v367_v24 = vrot.slane %v366_v16, 4 }
  0xfc   : > { %v343_v25 = vrot.slane %v342_v19, 2  ;;  %v350_v26 = vadd.f32 %v349_v20, %v348_v11 }
  0xfd   : > { %v361_v27 = vrot.slane %v360_v23, 2  ;;  %v368_v28 = vadd.f32 %v367_v24, %v366_v16 }
  0xfe   : > { %v344_v29 = vadd.f32 %v343_v25, %v342_v19  ;;  %v351_v30 = vrot.slane %v350_v26, 2 }
  0xff   : > { %v362_v31 = vadd.f32 %v361_v27, %v360_v23  ;;  %v369_v32 = vrot.slane %v368_v28, 2 }
 0x100   : > { %v345_v33 = vrot.slane %v344_v29, 1  ;;  %v352_v34 = vadd.f32 %v351_v30, %v350_v26 }
 0x101   : > { %v363_v35 = vrot.slane %v362_v31, 1  ;;  %v370_v36 = vadd.f32 %v369_v32, %v368_v28  ;;  %377 = sbr.rel (%p521_p10) target bundleno = 264 (0x108), region = 73 }
 0x102   : > { %v346_v37 = vadd.f32 %v345_v33, %v344_v29  ;;  %v353_v38 = vrot.slane %v352_v34, 1 }
 0x103   : > { %v364_v39 = vadd.f32 %v363_v35, %v362_v31  ;;  %v371_v40 = vrot.slane %v370_v36, 1 }
 0x104   : > { %v354_v41 = vadd.f32 %v353_v38, %v352_v34 }
 0x105   : > { %v365_v42 = vadd.f32 %v364_v39, %v346_v37  ;;  %v372_v43 = vadd.f32 %v371_v40, %v370_v36 }
 0x107   : > { %v373_v44 = vadd.f32 %v372_v43, %v354_v41 }
 0x108 PF: > { %v380_v46 = vld [vmem:[%s713_s3] sm:$0x1]  ;;  %392 = sbr.rel (!%p654_p5) target bundleno = 271 (0x10f), region = 77  ;;  %s523_s30 = sshll.u32 (%p654_p5), %s642_s18, 2  ;;  %v410_v50 = vld [vmem:[%s669_s12] sm:$0xf] (%p654_p5) }
 0x109   : > { %v383_v47 = vld [vmem:[%s714_s4] sm:$0x1]  ;;  %v381_v48 = vadd.f32 %v380_v46, %v365_v42  ;;  %v412_v51 = vld [vmem:[%s669_s12 + $0x4] sm:$0xf] (%p654_p5)  ;;  %s394_s7 = scalar_lea.vmem (%p654_p5), %s712_s2, %s523_s30 }
 0x10a   : > { %v384_v49 = vadd.f32 %v383_v47, %v373_v44  ;;  %411 = vst [vmem:[%s394_s7] sm:$0xf] (%p654_p5), %v410_v50  ;;  %413 = vst [vmem:[%s394_s7 + $0x20] sm:$0xf] (%p654_p5), %v412_v51 }
 0x10b   : > { %382 = vst [vmem:[%s713_s3] sm:$0x1] %v381_v48 }
 0x10c   : > { %385 = vst [vmem:[%s714_s4] sm:$0x1] %v384_v49 }
 0x10f PF: > { %p12_p11 = scmp.ge.s32.totalorder %s644_s19, 10   ;;  %s716_s15 = smov %s595_s16 }
 0x110   : > { %s717_s16 = smov %s652_s22  ;;  %s718_s17 = smov %s644_s19 }
 0x111   :  { %14 = sbr.rel (!%p12_p11) target bundleno = 2 (0x2), region = 167 }

// kernel: xception_forward.13
= control target key start
LH: loop header
LB: loop body
LE: loop exit
PB: predicated region body
PF: predicated region fallthrough
CT: control target
= control target key end

     0   :  { %s164_s0 = inlined_call_operand.vmem [shape: bf16[2,4,4,128], index: 0, kind: input, shape index: {}]   ;;  %s165_s1 = inlined_call_operand.vmem [shape: f32[1,128], index: 1, kind: input, shape index: {}]   ;;  %s166_s2 = inlined_call_operand.vmem [shape: f32[1,128], index: 2, kind: input, shape index: {}]   ;;  %s167_s3 = inlined_call_operand.vmem [shape: bf16[2,4,4,128], index: 3, kind: output, shape index: {}]  }
   0x1   :  { %v14_v0 = vld [vmem:[%s164_s0] sm:$0x3]  ;;  %v15_v4 = vld [vmem:[%s164_s0 + $0x2] sm:$0x3]  ;;  %v16_v5 = vld [vmem:[%s164_s0 + $0x4] sm:$0x3] }
   0x2   :  { %v88_v1 = vld [vmem:[%s165_s1] ss:$0 sm:$0xff]  ;;  %v22_v3 = vunpack.c.l.bf16 %v14_v0  ;;  %v17_v6 = vld [vmem:[%s164_s0 + $0x6] sm:$0x3]  ;;  %v23_v7 = vunpack.c.l.bf16 %v15_v4  ;;  %v24_v8 = vunpack.c.l.bf16 %v16_v5  ;;  %v18_v10 = vld [vmem:[%s164_s0 + $0x8] sm:$0x3] }
   0x3   :  { %v89_v2 = vld [vmem:[%s166_s2] ss:$0 sm:$0xff]  ;;  %v25_v9 = vunpack.c.l.bf16 %v17_v6  ;;  %v19_v11 = vld [vmem:[%s164_s0 + $0xa] sm:$0x3]  ;;  %v20_v12 = vld [vmem:[%s164_s0 + $0xc] sm:$0x3]  ;;  %v26_v14 = vunpack.c.l.bf16 %v18_v10 }
   0x4   :  { %v37_v13 = vmul.f32 %v88_v1, %v22_v3  ;;  %v27_v15 = vunpack.c.l.bf16 %v19_v11  ;;  %v28_v16 = vunpack.c.l.bf16 %v20_v12  ;;  %v21_v17 = vld [vmem:[%s164_s0 + $0xe] sm:$0x3]  ;;  %v38_v18 = vmul.f32 %v88_v1, %v23_v7 }
   0x5   :  { %v39_v19 = vmul.f32 %v88_v1, %v24_v8  ;;  %v40_v20 = vmul.f32 %v88_v1, %v25_v9  ;;  %v29_v21 = vunpack.c.l.bf16 %v21_v17  ;;  %v41_v23 = vmul.f32 %v88_v1, %v26_v14 }
   0x6   :  { %v52_v22 = vadd.f32 %v89_v2, %v37_v13  ;;  %v42_v24 = vmul.f32 %v88_v1, %v27_v15  ;;  %v43_v25 = vmul.f32 %v88_v1, %v28_v16  ;;  %v53_v26 = vadd.f32 %v89_v2, %v38_v18 }
   0x7   :  { %v54_v27 = vadd.f32 %v89_v2, %v39_v19  ;;  %v55_v28 = vadd.f32 %v89_v2, %v40_v20  ;;  %v44_v29 = vmul.f32 %v88_v1, %v29_v21  ;;  %v56_v31 = vadd.f32 %v89_v2, %v41_v23 }
   0x8   :  { %v60_v30 = vmax.f32 %v52_v22, 0.0  ;;  %v57_v32 = vadd.f32 %v89_v2, %v42_v24  ;;  %v58_v33 = vadd.f32 %v89_v2, %v43_v25  ;;  %v61_v34 = vmax.f32 %v53_v26, 0.0 }
   0x9   :  { %v62_v35 = vmax.f32 %v54_v27, 0.0  ;;  %v63_v36 = vmax.f32 %v55_v28, 0.0  ;;  %v59_v37 = vadd.f32 %v89_v2, %v44_v29  ;;  %v64_v39 = vmax.f32 %v56_v31, 0.0 }
   0xa   :  { %v68_v38 = vpack.c.bf16 %v60_v30, %v60_v30  ;;  %v65_v40 = vmax.f32 %v57_v32, 0.0  ;;  %v66_v41 = vmax.f32 %v58_v33, 0.0  ;;  %v69_v42 = vpack.c.bf16 %v61_v34, %v61_v34 }
   0xb   :  { %v70_v43 = vpack.c.bf16 %v62_v35, %v62_v35  ;;  %v71_v44 = vpack.c.bf16 %v63_v36, %v63_v36  ;;  %v67_v45 = vmax.f32 %v59_v37, 0.0  ;;  %v72_v46 = vpack.c.bf16 %v64_v39, %v64_v39 }
   0xc   :  { %76 = vst [vmem:[%s167_s3] sm:$0x3] %v68_v38  ;;  %v73_v47 = vpack.c.bf16 %v65_v40, %v65_v40  ;;  %v74_v48 = vpack.c.bf16 %v66_v41, %v66_v41  ;;  %77 = vst [vmem:[%s167_s3 + $0x2] sm:$0x3] %v69_v42 }
   0xd   :  { %78 = vst [vmem:[%s167_s3 + $0x4] sm:$0x3] %v70_v43  ;;  %79 = vst [vmem:[%s167_s3 + $0x6] sm:$0x3] %v71_v44  ;;  %v75_v49 = vpack.c.bf16 %v67_v45, %v67_v45 }
   0xe   :  { %80 = vst [vmem:[%s167_s3 + $0x8] sm:$0x3] %v72_v46  ;;  %81 = vst [vmem:[%s167_s3 + $0xa] sm:$0x3] %v73_v47 }
   0xf   :  { %82 = vst [vmem:[%s167_s3 + $0xc] sm:$0x3] %v74_v48  ;;  %83 = vst [vmem:[%s167_s3 + $0xe] sm:$0x3] %v75_v49 }

// kernel: xception_forward.10
= control target key start
LH: loop header
LB: loop body
LE: loop exit
PB: predicated region body
PF: predicated region fallthrough
CT: control target
= control target key end

     0   :  { %s3187_s21 = smov 0   ;;  %s3189_s22 = smov 0   ;;  %s3831_s0 = inlined_call_operand.vmem [shape: bf16[2,10,10,128], index: 0, kind: input, shape index: {}, may-alias: {0,1,2}]   ;;  %s3832_s1 = inlined_call_operand.vmem [shape: bf16[2,10,10,128], index: 1, kind: input, shape index: {}, may-alias: {0,1,2}]   ;;  %s3833_s2 = inlined_call_operand.vmem [shape: bf16[2,10,10,128], index: 2, kind: input, shape index: {}, may-alias: {0,1,2}]   ;;  %s3834_s3 = inlined_call_operand.vmem [shape: bf16[9,128,128], index: 3, kind: input, shape index: {}]   ;;  %s3835_s4 = inlined_call_operand.vmem [shape: bf16[2,8,8,128], index: 4, kind: output, shape index: {0}]   ;;  %s3836_s5 = inlined_call_operand.vmem [shape: f32[1,128], index: 5, kind: output, shape index: {1}]   ;;  %s3837_s6 = inlined_call_operand.vmem [shape: f32[1,128], index: 6, kind: output, shape index: {2}]  }
   0x1   :  { %s3191_s23 = smov 0   ;;  %s3193_s24 = smov 0  }
   0x2   :  { %s3195_s25 = smov 0   ;;  %s3197_s26 = smov 0  }
   0x3   :  { %s3199_s27 = smov 0  }
   0x4 LB: > { %3839 = sst [smem:[#allocation6_spill]] %s3143_s26  ;;  %s3223_s28 = sadd.s32 4294967295, %s3147_s27   ;;  %s3147_s27 = sphi %s3199_s27, %s3853_s27   ;;  %s3143_s26 = sphi %s3197_s26, %s3848_s26   ;;  %s3139_s25 = sphi %s3195_s25, %s3847_s25   ;;  %s3135_s24 = sphi %s3193_s24, %s3852_s24   ;;  %s3131_s23 = sphi %s3191_s23, %s3851_s23   ;;  %s3127_s22 = sphi %s3189_s22, %s3850_s22   ;;  %s3123_s21 = sphi %s3187_s21, %s3849_s21  }
   0x5   : > { %s3226_s29 = sadd.s32 1, %s3147_s27   ;;  %s24_s7 = sadd.s32 1, %s3143_s26 }
   0x6   : > { %s21_s30 = ssub.s32 %s3147_s27, %s3226_s29  ;;  %p31_p1 = scmp.ne.s32.totalorder %s3143_s26, %s3139_s25 }
   0x7   : > { %p22_p0 = scmp.eq.s32.totalorder %s21_s30, 0  ;;  %p32_p2 = scmp.eq.s32.totalorder %s3147_s27, 0 }
   0x8   : > { %s48_s8 = sadd.s32 1, %s3226_s29  ;;  %s52_s12 = sadd.s32 1, %s3135_s24 }
   0x9   : > { %s3236_s9 = scalar_select %p22_p0, %s3143_s26, %s24_s7  }
   0xa   : > { %p3243_p3 = por %p32_p2, %p31_p1  ;;  %s49_s11 = ssub.s32 %s3226_s29, %s48_s8 }
   0xb   : > { %3840 = sst [smem:[#allocation7_spill]] %s3236_s9  ;;  %p50_p4 = scmp.eq.s32.totalorder %s49_s11, 0 }
   0xc   : > { %p59_p5 = scmp.ne.s32.totalorder %s3135_s24, %s3131_s23  ;;  %s75_s13 = sadd.s32 2, %s3147_s27 }
   0xd   : > { %s3253_s14 = scalar_select %p50_p4, %s3135_s24, %s52_s12  }
   0xe   : > { %p3257_p6 = por %p59_p5, %p32_p2  ;;  %s76_s16 = sadd.s32 2, %s3226_s29 }
   0xf   : > { %3842 = sst [smem:[#allocation8_spill]] %s3253_s14  ;;  %s77_s17 = ssub.s32 %s75_s13, %s76_s16 }
  0x10   : > { %s80_s18 = sadd.s32 1, %s3127_s22  ;;  %p78_p7 = scmp.eq.s32.totalorder %s77_s17, 0 }
  0x11   : > { %p87_p8 = scmp.ne.s32.totalorder %s3127_s22, %s3123_s21  ;;  %p138_p9 = scmp.eq.s32.totalorder %s3223_s28, 7 }
  0x12   : > { %s3267_s19 = scalar_select %p78_p7, %s3127_s22, %s80_s18  }
  0x13   : > { %p3271_p10 = por %p87_p8, %p32_p2  ;;  %p3278_p11 = por %p138_p9, %p31_p1 }
  0x14   : > { %p2112_p12 = scmp.ge.s32.totalorder %s3147_s27, 8 }
  0x16   : > { %205 = sbr.rel (%p2112_p12) target bundleno = 50 (0x32), region = 20 }
  0x1d   : > { %208 = sbr.rel (!%p3243_p3) target bundleno = 36 (0x24), region = 24  ;;  %s210_s7 = sand.u32 (%p3243_p3), 1, %s3143_s26  }
  0x1e   : > { %s2363_s8 = sshll.u32 (%p3243_p3), %s3147_s27, 3  ;;  %s2113_s11 = sshll.u32 (%p3243_p3), %s210_s7, 4 }
  0x1f   : > { %s215_s16 = scalar_lea.vmem (%p3243_p3), %s3831_s0, %s2363_s8  ;;  %s212_s17 = scalar_lea.vmem (%p3243_p3), [#allocation2], %s2113_s11 }
  0x20   : > { %v231_v0 = vld [vmem:[%s215_s16] sm:$0xff] (%p3243_p3)   ;;  %v235_v1 = vld [vmem:[%s215_s16 + $0x50] sm:$0xff] (%p3243_p3)  }
  0x21   : > { %232 = vst [vmem:[%s212_s17] sm:$0xff] (%p3243_p3), %v231_v0   ;;  %236 = vst [vmem:[%s212_s17 + $0x8] sm:$0xff] (%p3243_p3), %v235_v1  }
  0x24 PF: > { %269 = sbr.rel (!%p3257_p6) target bundleno = 43 (0x2b), region = 65  ;;  %s271_s10 = sand.u32 (%p3257_p6), 1, %s3135_s24  }
  0x25   : > { %s2117_s18 = sshll.u32 (%p3257_p6), %s3147_s27, 3  ;;  %s2116_s9 = sshll.u32 (%p3257_p6), %s271_s10, 4 }
  0x26   : > { %s2034_s14 = scalar_lea.vmem (%p3257_p6), %s3832_s1, %s2117_s18  ;;  %s273_s8 = scalar_lea.vmem (%p3257_p6), [#allocation3], %s2116_s9 }
  0x27   : > { %v2118_v2 = vld [vmem:[%s2034_s14 + $0x8] sm:$0xff] (%p3257_p6)   ;;  %v2120_v3 = vld [vmem:[%s2034_s14 + $0x58] sm:$0xff] (%p3257_p6)  }
  0x28   : > { %294 = vst [vmem:[%s273_s8] sm:$0xff] (%p3257_p6), %v2118_v2   ;;  %298 = vst [vmem:[%s273_s8 + $0x8] sm:$0xff] (%p3257_p6), %v2120_v3  }
  0x2b PF: > { %331 = sbr.rel (!%p3271_p10) target bundleno = 50 (0x32), region = 106  ;;  %s333_s15 = sand.u32 (%p3271_p10), 1, %s3127_s22  }
  0x2c   : > { %s2123_s11 = sshll.u32 (%p3271_p10), %s3147_s27, 3  ;;  %s2122_s12 = sshll.u32 (%p3271_p10), %s333_s15, 4 }
  0x2d   : > { %s2039_s17 = scalar_lea.vmem (%p3271_p10), %s3833_s2, %s2123_s11  ;;  %s335_s26 = scalar_lea.vmem (%p3271_p10), [#allocation4], %s2122_s12 }
  0x2e   : > { %v2124_v4 = vld [vmem:[%s2039_s17 + $0x10] sm:$0xff] (%p3271_p10)   ;;  %v2126_v5 = vld [vmem:[%s2039_s17 + $0x60] sm:$0xff] (%p3271_p10)  }
  0x2f   : > { %356 = vst [vmem:[%s335_s26] sm:$0xff] (%p3271_p10), %v2124_v4   ;;  %360 = vst [vmem:[%s335_s26 + $0x8] sm:$0xff] (%p3271_p10), %v2126_v5  }
  0x32 PF: > { %p2128_p13 = scmp.ge.s32.totalorder %s3147_s27, 1  ;;  %p392_p0 = scmp.lt.s32.totalorder %s3147_s27, 9 }
  0x34   : > { %p393_p1 = pnand %p2128_p13, %p392_p0 }
  0x35   : > { %v3009_v6 = vld [vmem:[%s3834_s3 + $0x40] sm:$0xff] (!%p393_p1)   ;;  %v3149_v7 = vmov (!%p393_p1), 0.0   ;;  %v3010_v8 = vld [vmem:[%s3834_s3 + $0x48] sm:$0xff] (!%p393_p1)   ;;  %s399_s27 = sand.u32 (!%p393_p1), 1, %s3139_s25   ;;  %vm3150_vm0 = vmmov (!%p393_p1), 0   ;;  %v3011_v9 = vld [vmem:[%s3834_s3 + $0x50] sm:$0xff] (!%p393_p1)  }
  0x36   : > { %396 = sbr.rel (%p393_p1) target bundleno = 577 (0x241), region = 147  ;;  %2526 = vmatprep.subr.bf16.mxu0 (!%p393_p1), %v3149_v7  ;;  %2566 = vmatprep.subr.bf16.mxu1 (!%p393_p1), %v3149_v7  ;;  %s2129_s18 = sshll.u32 (!%p393_p1), %s399_s27, 4  ;;  %v3012_v10 = vld [vmem:[%s3834_s3 + $0x58] sm:$0xff] (!%p393_p1)   ;;  %v3013_v12 = vld [vmem:[%s3834_s3 + $0x60] sm:$0xff] (!%p393_p1)   ;;  %v3014_v18 = vld [vmem:[%s3834_s3 + $0x68] sm:$0xff] (!%p393_p1)  }
  0x37   : > { %2527 = vmatpush3.bf16.msra.mxu0 (!%p393_p1), %v3009_v6  ;;  %2567 = vmatpush3.bf16.msra.mxu1 (!%p393_p1), %v3009_v6  ;;  %s3333_s12 = scalar_lea.vmem (!%p393_p1), [#allocation2], %s2129_s18  ;;  %v3015_v21 = vld [vmem:[%s3834_s3 + $0x70] sm:$0xff] (!%p393_p1)   ;;  %v3016_v22 = vld [vmem:[%s3834_s3 + $0x78] sm:$0xff] (!%p393_p1)   ;;  %v3018_v32 = vld [vmem:[%s3834_s3] sm:$0xff] (!%p393_p1)   ;;  %s406_s15 = sand.u32 (!%p393_p1), 1, %s3131_s23  }
  0x38   : > { %2528 = vmatprep.subr.bf16.mxu0 (!%p393_p1), %v3149_v7  ;;  %2568 = vmatprep.subr.bf16.mxu1 (!%p393_p1), %v3149_v7  ;;  %v3336_v11 = vld [vmem:[%s3333_s12] sm:$0xf] (!%p393_p1)  ;;  %v3342_v13 = vld [vmem:[%s3333_s12 + $0x4] sm:$0x1] (!%p393_p1)  ;;  %v2167_v14 = vld [vmem:[%s3333_s12 + $0x8] sm:$0xf] (!%p393_p1) }
  0x39   : > { %2542 = vmatprep.mubr.msk.bf16.mxu0 (!%p393_p1), %vm3150_vm0, %v3149_v7  ;;  %2582 = vmatprep.mubr.msk.bf16.mxu1 (!%p393_p1), %vm3150_vm0, %v3149_v7  ;;  %v3346_v15 = vld [vmem:[%s3333_s12 + $0xc] sm:$0x1] (!%p393_p1)  ;;  %v2150_v16 = vcombine.low (!%p393_p1), %v3336_v11, %v3342_v13  ;;  %v3367_v27 = vld [vmem:[%s3333_s12] sm:$0xe] (!%p393_p1)  ;;  %v3370_v28 = vld [vmem:[%s3333_s12 + $0x8] sm:$0xe] (!%p393_p1) }
  0x3a   : > { %v2169_v17 = vcombine.low (!%p393_p1), %v2167_v14, %v3346_v15  ;;  %v2186_v29 = vcombine.low (!%p393_p1), %v3367_v27, %v3342_v13  ;;  %v2196_v30 = vcombine.low (!%p393_p1), %v3370_v28, %v3346_v15  ;;  %v3020_v34 = vld [vmem:[%s3834_s3 + $0x8] sm:$0xff] (!%p393_p1)   ;;  %v3021_v35 = vld [vmem:[%s3834_s3 + $0x10] sm:$0xff] (!%p393_p1)   ;;  %v3022_v36 = vld [vmem:[%s3834_s3 + $0x18] sm:$0xff] (!%p393_p1)   ;;  %s2130_s16 = sshll.u32 (!%p393_p1), %s406_s15, 4  ;;  %s413_s9 = sand.u32 (!%p393_p1), 1, %s3123_s21  }
  0x3b   : > { %2529 = vmatpush3.bf16.msra.mxu0 (!%p393_p1), %v3010_v8  ;;  %2569 = vmatpush3.bf16.msra.mxu1 (!%p393_p1), %v3010_v8  ;;  %v497_v19 = vshll.u32 (!%p393_p1), %v2150_v16, 16  ;;  %v495_v23 = vshrl.u32 (!%p393_p1), %v2150_v16, 16  ;;  %v3023_v37 = vld [vmem:[%s3834_s3 + $0x20] sm:$0xff] (!%p393_p1)   ;;  %v3024_v38 = vld [vmem:[%s3834_s3 + $0x28] sm:$0xff] (!%p393_p1)   ;;  %v3025_v39 = vld [vmem:[%s3834_s3 + $0x30] sm:$0xff] (!%p393_p1)   ;;  %s3519_s23 = scalar_lea.vmem (!%p393_p1), [#allocation3], %s2130_s16 }
  0x3c   : > { %2530 = vmatprep.subr.bf16.mxu0 (!%p393_p1), %v3149_v7  ;;  %2570 = vmatprep.subr.bf16.mxu1 (!%p393_p1), %v3149_v7  ;;  %v688_v20 = vshll.u32 (!%p393_p1), %v2169_v17, 16  ;;  %v686_v25 = vshrl.u32 (!%p393_p1), %v2169_v17, 16  ;;  %v3026_v40 = vld [vmem:[%s3834_s3 + $0x38] sm:$0xff] (!%p393_p1)   ;;  %v3027_v42 = vld [vmem:[%s3834_s3 + $0x80] sm:$0xff] (!%p393_p1)   ;;  %v3028_v43 = vld [vmem:[%s3834_s3 + $0x88] sm:$0xff] (!%p393_p1)   ;;  %v794_v50 = vrot.slane (!%p393_p1), %v2186_v29, 1 }
  0x3d   : > { %v499_v24 = vrot.slane %v497_v19, 1  ;;  %v2133_v41 = vld [vmem:[%s3333_s12 + $0x8] sm:$0xf]  ;;  %v3029_v44 = vld [vmem:[%s3834_s3 + $0x90] sm:$0xff]   ;;  %v3031_v46 = vld [vmem:[%s3834_s3 + $0xa0] sm:$0xff]   ;;  %v889_v51 = vrot.slane %v2196_v30, 1 }
  0x3e   : > { %v690_v26 = vrot.slane %v688_v20, 1  ;;  %v3030_v45 = vld [vmem:[%s3834_s3 + $0x98] sm:$0xff]   ;;  %v3032_v47 = vld [vmem:[%s3834_s3 + $0xa8] sm:$0xff]   ;;  %v3033_v48 = vld [vmem:[%s3834_s3 + $0xb0] sm:$0xff]   ;;  %p2358_p2 = scmp.ne.s32.totalorder %s3223_s28, 0 }
  0x3f   : > { %2531 = vmatpush3.bf16.msra.mxu0 %v3011_v9  ;;  %2571 = vmatpush3.bf16.msra.mxu1 %v3011_v9  ;;  %v500_v31 = vor.u32 %v499_v24, %v495_v23  ;;  %v3034_v49 = vld [vmem:[%s3834_s3 + $0xb8] sm:$0xff]   ;;  %v3037_v52 = vld [vmem:[%s3834_s3 + $0xc0] sm:$0xff]   ;;  %v3038_v53 = vld [vmem:[%s3834_s3 + $0xc8] sm:$0xff]  }
  0x40   : > { %2532 = vmatprep.subr.bf16.mxu0 %v3149_v7  ;;  %2572 = vmatprep.subr.bf16.mxu1 %v3149_v7  ;;  %v691_v33 = vor.u32 %v690_v26, %v686_v25  ;;  %v3039_v54 = vld [vmem:[%s3834_s3 + $0xd0] sm:$0xff]   ;;  %v3040_v55 = vld [vmem:[%s3834_s3 + $0xd8] sm:$0xff]   ;;  %v3041_v56 = vld [vmem:[%s3834_s3 + $0xe0] sm:$0xff]  }
  0x41   : > { %v3042_v57 = vld [vmem:[%s3834_s3 + $0xe8] sm:$0xff]   ;;  %v3043_v58 = vld [vmem:[%s3834_s3 + $0xf0] sm:$0xff]   ;;  %v3044_v59 = vld [vmem:[%s3834_s3 + $0xf8] sm:$0xff]  }
  0x42   : > { %v949_v60 = vld [vmem:[%s3519_s23] sm:$0xf]  ;;  %v2221_v61 = vld [vmem:[%s3519_s23 + $0x8] sm:$0xf]  ;;  %v3552_v4 = vld [vmem:[%s3519_s23 + $0x4] sm:$0x1] }
  0x43   : > { %2533 = vmatpush3.bf16.msra.mxu0 %v3012_v10  ;;  %2573 = vmatpush3.bf16.msra.mxu1 %v3012_v10  ;;  %v3045_v62 = vld [vmem:[%s3834_s3 + $0x100] sm:$0xff]   ;;  %v3046_v63 = vld [vmem:[%s3834_s3 + $0x108] sm:$0xff]   ;;  %v3047_v0 = vld [vmem:[%s3834_s3 + $0x110] sm:$0xff]  }
  0x44   : > { %2534 = vmatprep.subr.bf16.mxu0 %v3149_v7  ;;  %2574 = vmatprep.subr.bf16.mxu1 %v3149_v7  ;;  %v3048_v1 = vld [vmem:[%s3834_s3 + $0x118] sm:$0xff]   ;;  %v3049_v2 = vld [vmem:[%s3834_s3 + $0x120] sm:$0xff]   ;;  %v3050_v10 = vld [vmem:[%s3834_s3 + $0x128] sm:$0xff]  }
  0x45   : > { %v1099_v3 = vld [vmem:[%s3519_s23] sm:$0xf]  ;;  %v2247_v5 = vld [vmem:[%s3519_s23 + $0x8] sm:$0xf]  ;;  %v3556_v6 = vld [vmem:[%s3519_s23 + $0xc] sm:$0x1] }
  0x46   : > { %v2238_v8 = vcombine.low %v1099_v3, %v3552_v4  ;;  %v2249_v9 = vcombine.low %v2247_v5, %v3556_v6  ;;  %v3051_v13 = vld [vmem:[%s3834_s3 + $0x130] sm:$0xff]   ;;  %v3058_v24 = vld [vmem:[%s3834_s3 + $0x158] sm:$0xff]   ;;  %v3059_v25 = vld [vmem:[%s3834_s3 + $0x160] sm:$0xff]  }
  0x47   : > { %2535 = vmatpush3.bf16.msra.mxu0 %v3013_v12  ;;  %2575 = vmatpush3.bf16.msra.mxu1 %v3013_v12  ;;  %v3057_v23 = vld [vmem:[%s3834_s3 + $0x150] sm:$0xff]   ;;  %v3060_v26 = vld [vmem:[%s3834_s3 + $0x168] sm:$0xff]   ;;  %v3083_v3 = vld [vmem:[%s3834_s3 + $0x200] sm:$0xff]  }
  0x48   : > { %2536 = vmatprep.subr.bf16.mxu0 %v3149_v7  ;;  %2576 = vmatprep.subr.bf16.mxu1 %v3149_v7  ;;  %v1213_v12 = vshll.u32 %v2249_v9, 16  ;;  %v1107_v14 = vshrl.u32 %v2238_v8, 16  ;;  %v1211_v16 = vshrl.u32 %v2249_v9, 16  ;;  %v3061_v27 = vld [vmem:[%s3834_s3 + $0x170] sm:$0xff]   ;;  %v2275_v29 = vld [vmem:[%s3519_s23 + $0x8] sm:$0xe] }
  0x49   : > { %v1276_v28 = vld [vmem:[%s3519_s23] sm:$0xe]  ;;  %s2131_s23 = sshll.u32 %s413_s9, 4  ;;  %v3088_v9 = vld [vmem:[%s3834_s3 + $0x228] sm:$0xff]  }
  0x4a   : > { %v1215_v17 = vrot.slane %v1213_v12, 1  ;;  %v2266_v30 = vcombine.low %v1276_v28, %v3552_v4  ;;  %s3670_s21 = scalar_lea.vmem [#allocation4], %s2131_s23  ;;  %v3084_v4 = vld [vmem:[%s3834_s3 + $0x208] sm:$0xff]   ;;  %v3085_v5 = vld [vmem:[%s3834_s3 + $0x210] sm:$0xff]  }
  0x4b   : > { %2537 = vmatpush3.bf16.msra.mxu0 %v3014_v18  ;;  %2577 = vmatpush3.bf16.msra.mxu1 %v3014_v18  ;;  %v3052_v18 = vld [vmem:[%s3834_s3 + $0x138] sm:$0xff]  }
  0x4c   : > { %2538 = vmatprep.subr.bf16.mxu0 %v3149_v7  ;;  %2578 = vmatprep.subr.bf16.mxu1 %v3149_v7  ;;  %v1216_v20 = vor.u32 %v1215_v17, %v1211_v16  ;;  %v2355_v12 = vld [vmem:[%s3670_s21 + $0x8] sm:$0xe] }
  0x4f   : > { %2539 = vmatpush3.bf16.msra.mxu0 %v3015_v21  ;;  %2579 = vmatpush3.bf16.msra.mxu1 %v3015_v21  ;;  %v3055_v21 = vld [vmem:[%s3834_s3 + $0x140] sm:$0xff]  }
  0x50   : > { %2540 = vmatprep.subr.bf16.mxu0 %v3149_v7  ;;  %2580 = vmatprep.subr.bf16.mxu1 %v3149_v7 }
  0x53   : > { %2541 = vmatpush3.bf16.msra.mxu0 %v3016_v22  ;;  %2581 = vmatpush3.bf16.msra.mxu1 %v3016_v22  ;;  %v3056_v22 = vld [vmem:[%s3834_s3 + $0x148] sm:$0xff]  }
  0x54   : > { %2546 = vmatprep.subr.bf16.mxu0 %v3149_v7  ;;  %2586 = vmatprep.subr.bf16.mxu1 %v3149_v7 }
  0x56   : > { %2543 = vmatmul.mubr.bf16.vlgmr.msra.gmra.mrb[0].mxu0 %v500_v31  ;;  %2583 = vmatmul.mubr.bf16.vlgmr.msra.gmra.mrb[0].mxu1 %v691_v33  ;;  %v2276_v31 = vcombine.low %v2275_v29, %v3556_v6  ;;  %v1280_v33 = vrot.slane %v2266_v30, 1  ;;  %v3086_v6 = vld [vmem:[%s3834_s3 + $0x218] sm:$0xff]  }
  0x57   : > { %2547 = vmatpush3.bf16.msra.mxu0 %v3018_v32  ;;  %2587 = vmatpush3.bf16.msra.mxu1 %v3018_v32  ;;  %v3062_v32 = vld [vmem:[%s3834_s3 + $0x178] sm:$0xff]  }
  0x58   : > { %2548 = vmatprep.subr.bf16.mxu0 %v3149_v7  ;;  %2588 = vmatprep.subr.bf16.mxu1 %v3149_v7 }
  0x59   : > { %2562 = vmatprep.mubr.msk.bf16.mxu0 %vm3150_vm0, %v3149_v7  ;;  %2602 = vmatprep.mubr.msk.bf16.mxu1 %vm3150_vm0, %v3149_v7 }
  0x5b   : > { %2549 = vmatpush3.bf16.msra.mxu0 %v3020_v34  ;;  %2589 = vmatpush3.bf16.msra.mxu1 %v3020_v34  ;;  %v1375_v34 = vrot.slane %v2276_v31, 1 }
  0x5c   : > { %2550 = vmatprep.subr.bf16.mxu0 %v3149_v7  ;;  %2590 = vmatprep.subr.bf16.mxu1 %v3149_v7 }
  0x5f   : > { %2551 = vmatpush3.bf16.msra.mxu0 %v3021_v35  ;;  %2591 = vmatpush3.bf16.msra.mxu1 %v3021_v35  ;;  %v3065_v35 = vld [vmem:[%s3834_s3 + $0x180] sm:$0xff]  }
  0x60   : > { %2552 = vmatprep.subr.bf16.mxu0 %v3149_v7  ;;  %2592 = vmatprep.subr.bf16.mxu1 %v3149_v7 }
  0x63   : > { %2553 = vmatpush3.bf16.msra.mxu0 %v3022_v36  ;;  %2593 = vmatpush3.bf16.msra.mxu1 %v3022_v36  ;;  %v3066_v36 = vld [vmem:[%s3834_s3 + $0x188] sm:$0xff]  }
  0x64   : > { %2554 = vmatprep.subr.bf16.mxu0 %v3149_v7  ;;  %2594 = vmatprep.subr.bf16.mxu1 %v3149_v7 }
  0x67   : > { %2555 = vmatpush3.bf16.msra.mxu0 %v3023_v37  ;;  %2595 = vmatpush3.bf16.msra.mxu1 %v3023_v37  ;;  %v3067_v37 = vld [vmem:[%s3834_s3 + $0x190] sm:$0xff]  }
  0x68   : > { %2556 = vmatprep.subr.bf16.mxu0 %v3149_v7  ;;  %2596 = vmatprep.subr.bf16.mxu1 %v3149_v7 }
  0x6b   : > { %2557 = vmatpush3.bf16.msra.mxu0 %v3024_v38  ;;  %2597 = vmatpush3.bf16.msra.mxu1 %v3024_v38  ;;  %v3068_v38 = vld [vmem:[%s3834_s3 + $0x198] sm:$0xff]  }
  0x6c   : > { %2558 = vmatprep.subr.bf16.mxu0 %v3149_v7  ;;  %2598 = vmatprep.subr.bf16.mxu1 %v3149_v7 }
  0x6f   : > { %2559 = vmatpush3.bf16.msra.mxu0 %v3025_v39  ;;  %2599 = vmatpush3.bf16.msra.mxu1 %v3025_v39  ;;  %v3069_v39 = vld [vmem:[%s3834_s3 + $0x1a0] sm:$0xff]  }
  0x70   : > { %2560 = vmatprep.subr.bf16.mxu0 %v3149_v7  ;;  %2600 = vmatprep.subr.bf16.mxu1 %v3149_v7 }
  0x73   : > { %2561 = vmatpush3.bf16.msra.mxu0 %v3026_v40  ;;  %2601 = vmatpush3.bf16.msra.mxu1 %v3026_v40  ;;  %v3070_v40 = vld [vmem:[%s3834_s3 + $0x1a8] sm:$0xff]  }
  0x74   : > { %2606 = vmatprep.subr.bf16.mxu0 %v3149_v7  ;;  %2626 = vmatprep.subr.bf16.mxu1 %v3149_v7 }
  0x76   : > { %2563 = vmatmul.mubr.bf16.vlgmr.msra.gmra.mrb[0].mxu0 %v3336_v11  ;;  %2603 = vmatmul.mubr.bf16.vlgmr.msra.gmra.mrb[0].mxu1 %v2133_v41  ;;  %v1109_v11 = vshll.u32 %v2238_v8, 16  ;;  %v3071_v41 = vld [vmem:[%s3834_s3 + $0x1b0] sm:$0xff]   ;;  %v3087_v8 = vld [vmem:[%s3834_s3 + $0x220] sm:$0xff]  }
  0x77   : > { %2607 = vmatpush3.bf16.msra.mxu0 %v3027_v42  ;;  %2627 = vmatpush3.bf16.msra.mxu1 %v3027_v42  ;;  %v3072_v42 = vld [vmem:[%s3834_s3 + $0x1b8] sm:$0xff]  }
  0x78   : > { %2608 = vmatprep.subr.bf16.mxu0 %v3149_v7  ;;  %2628 = vmatprep.subr.bf16.mxu1 %v3149_v7  ;;  %v1111_v15 = vrot.slane %v1109_v11, 1  ;;  %v1762_v11 = vld [vmem:[%s3670_s21] sm:$0xe] }
  0x79   : > { %2622 = vmatprep.mubr.msk.bf16.mxu0 %vm3150_vm0, %v3149_v7  ;;  %2642 = vmatprep.mubr.msk.bf16.mxu1 %vm3150_vm0, %v3149_v7 }
  0x7a   : > { %v1112_v19 = vor.u32 %v1111_v15, %v1107_v14  ;;  %v3090_v15 = vld [vmem:[%s3834_s3 + $0x238] sm:$0xff]  }
  0x7b   : > { %2609 = vmatpush3.bf16.msra.mxu0 %v3028_v43  ;;  %2629 = vmatpush3.bf16.msra.mxu1 %v3028_v43  ;;  %v1435_v43 = vld [vmem:[%s3670_s21] sm:$0xf] }
  0x7c   : > { %2610 = vmatprep.subr.bf16.mxu0 %v3149_v7  ;;  %2630 = vmatprep.subr.bf16.mxu1 %v3149_v7 }
  0x7f   : > { %2611 = vmatpush3.bf16.msra.mxu0 %v3029_v44  ;;  %2631 = vmatpush3.bf16.msra.mxu1 %v3029_v44  ;;  %v2301_v44 = vld [vmem:[%s3670_s21 + $0x8] sm:$0xf] }
  0x80   : > { %2612 = vmatprep.subr.bf16.mxu0 %v3149_v7  ;;  %2632 = vmatprep.subr.bf16.mxu1 %v3149_v7 }
  0x83   : > { %2613 = vmatpush3.bf16.msra.mxu0 %v3030_v45  ;;  %2633 = vmatpush3.bf16.msra.mxu1 %v3030_v45  ;;  %v3073_v45 = vld [vmem:[%s3834_s3 + $0x1c0] sm:$0xff]  }
  0x84   : > { %2614 = vmatprep.subr.bf16.mxu0 %v3149_v7  ;;  %2634 = vmatprep.subr.bf16.mxu1 %v3149_v7 }
  0x87   : > { %2615 = vmatpush3.bf16.msra.mxu0 %v3031_v46  ;;  %2635 = vmatpush3.bf16.msra.mxu1 %v3031_v46  ;;  %v3074_v46 = vld [vmem:[%s3834_s3 + $0x1c8] sm:$0xff]  }
  0x88   : > { %2616 = vmatprep.subr.bf16.mxu0 %v3149_v7  ;;  %2636 = vmatprep.subr.bf16.mxu1 %v3149_v7 }
  0x8b   : > { %2617 = vmatpush3.bf16.msra.mxu0 %v3032_v47  ;;  %2637 = vmatpush3.bf16.msra.mxu1 %v3032_v47  ;;  %v3075_v47 = vld [vmem:[%s3834_s3 + $0x1d0] sm:$0xff]  }
  0x8c   : > { %2618 = vmatprep.subr.bf16.mxu0 %v3149_v7  ;;  %2638 = vmatprep.subr.bf16.mxu1 %v3149_v7 }
  0x8f   : > { %2619 = vmatpush3.bf16.msra.mxu0 %v3033_v48  ;;  %2639 = vmatpush3.bf16.msra.mxu1 %v3033_v48  ;;  %v3076_v48 = vld [vmem:[%s3834_s3 + $0x1d8] sm:$0xff]  }
  0x90   : > { %2620 = vmatprep.subr.bf16.mxu0 %v3149_v7  ;;  %2640 = vmatprep.subr.bf16.mxu1 %v3149_v7 }
  0x93   : > { %2621 = vmatpush3.bf16.msra.mxu0 %v3034_v49  ;;  %2641 = vmatpush3.bf16.msra.mxu1 %v3034_v49  ;;  %v3077_v49 = vld [vmem:[%s3834_s3 + $0x1e0] sm:$0xff]  }
  0x94   : > { %2646 = vmatprep.subr.bf16.mxu0 %v3149_v7  ;;  %2666 = vmatprep.subr.bf16.mxu1 %v3149_v7 }
  0x96   : > { %2623 = vmatmul.mubr.bf16.vlgmr.msra.gmra.mrb[0].mxu0 %v794_v50  ;;  %2643 = vmatmul.mubr.bf16.vlgmr.msra.gmra.mrb[0].mxu1 %v889_v51  ;;  %v1585_v50 = vld [vmem:[%s3670_s21] sm:$0xf]  ;;  %v3703_v51 = vld [vmem:[%s3670_s21 + $0x4] sm:$0x1] }
  0x97   : > { %2647 = vmatpush3.bf16.msra.mxu0 %v3037_v52  ;;  %2667 = vmatpush3.bf16.msra.mxu1 %v3037_v52  ;;  %v2327_v52 = vld [vmem:[%s3670_s21 + $0x8] sm:$0xf] }
  0x98   : > { %2648 = vmatprep.subr.bf16.mxu0 %v3149_v7  ;;  %2668 = vmatprep.subr.bf16.mxu1 %v3149_v7 }
  0x99   : > { %2662 = vmatprep.mubr.msk.bf16.mxu0 %vm3150_vm0, %v3149_v7  ;;  %2682 = vmatprep.mubr.msk.bf16.mxu1 %vm3150_vm0, %v3149_v7 }
  0x9b   : > { %2649 = vmatpush3.bf16.msra.mxu0 %v3038_v53  ;;  %2669 = vmatpush3.bf16.msra.mxu1 %v3038_v53  ;;  %v3707_v53 = vld [vmem:[%s3670_s21 + $0xc] sm:$0x1]  ;;  %s2132_s21 = sshll.u32 %s399_s27, 3 }
  0x9c   : > { %2650 = vmatprep.subr.bf16.mxu0 %v3149_v7  ;;  %2670 = vmatprep.subr.bf16.mxu1 %v3149_v7  ;;  %v2356_v14 = vcombine.low %v2355_v12, %v3707_v53  ;;  %s3778_s15 = scalar_lea.vmem [#allocation5], %s2132_s21 }
  0x9e   : > { %v1861_v17 = vrot.slane %v2356_v14, 1 }
  0x9f   : > { %2651 = vmatpush3.bf16.msra.mxu0 %v3039_v54  ;;  %2671 = vmatpush3.bf16.msra.mxu1 %v3039_v54  ;;  %v2318_v54 = vcombine.low %v1585_v50, %v3703_v51 }
  0xa0   : > { %2652 = vmatprep.subr.bf16.mxu0 %v3149_v7  ;;  %2672 = vmatprep.subr.bf16.mxu1 %v3149_v7 }
  0xa3   : > { %2653 = vmatpush3.bf16.msra.mxu0 %v3040_v55  ;;  %2673 = vmatpush3.bf16.msra.mxu1 %v3040_v55  ;;  %v2329_v55 = vcombine.low %v2327_v52, %v3707_v53 }
  0xa4   : > { %2654 = vmatprep.subr.bf16.mxu0 %v3149_v7  ;;  %2674 = vmatprep.subr.bf16.mxu1 %v3149_v7 }
  0xa7   : > { %2655 = vmatpush3.bf16.msra.mxu0 %v3041_v56  ;;  %2675 = vmatpush3.bf16.msra.mxu1 %v3041_v56  ;;  %v3078_v56 = vld [vmem:[%s3834_s3 + $0x1e8] sm:$0xff]  }
  0xa8   : > { %2656 = vmatprep.subr.bf16.mxu0 %v3149_v7  ;;  %2676 = vmatprep.subr.bf16.mxu1 %v3149_v7 }
  0xab   : > { %2657 = vmatpush3.bf16.msra.mxu0 %v3042_v57  ;;  %2677 = vmatpush3.bf16.msra.mxu1 %v3042_v57  ;;  %v1595_v57 = vshll.u32 %v2318_v54, 16 }
  0xac   : > { %2658 = vmatprep.subr.bf16.mxu0 %v3149_v7  ;;  %2678 = vmatprep.subr.bf16.mxu1 %v3149_v7 }
  0xaf   : > { %2659 = vmatpush3.bf16.msra.mxu0 %v3043_v58  ;;  %2679 = vmatpush3.bf16.msra.mxu1 %v3043_v58  ;;  %v1699_v58 = vshll.u32 %v2329_v55, 16 }
  0xb0   : > { %2660 = vmatprep.subr.bf16.mxu0 %v3149_v7  ;;  %2680 = vmatprep.subr.bf16.mxu1 %v3149_v7 }
  0xb3   : > { %2661 = vmatpush3.bf16.msra.mxu0 %v3044_v59  ;;  %2681 = vmatpush3.bf16.msra.mxu1 %v3044_v59  ;;  %v3079_v59 = vld [vmem:[%s3834_s3 + $0x1f0] sm:$0xff]  }
  0xb4   : > { %2686 = vmatprep.subr.bf16.mxu0 %v3149_v7  ;;  %2706 = vmatprep.subr.bf16.mxu1 %v3149_v7 }
  0xb6   : > { %2663 = vmatmul.mubr.bf16.vlgmr.msra.gmra.mrb[0].mxu0 %v949_v60  ;;  %2683 = vmatmul.mubr.bf16.vlgmr.msra.gmra.mrb[0].mxu1 %v2221_v61  ;;  %v1593_v60 = vshrl.u32 %v2318_v54, 16  ;;  %v1597_v61 = vrot.slane %v1595_v57, 1 }
  0xb7   : > { %2687 = vmatpush3.bf16.msra.mxu0 %v3045_v62  ;;  %2707 = vmatpush3.bf16.msra.mxu1 %v3045_v62  ;;  %v1697_v62 = vshrl.u32 %v2329_v55, 16  ;;  %v3151_v55 = vmov (!%p2358_p2), 0.0  }
  0xb8   : > { %2688 = vmatprep.subr.bf16.mxu0 %v3149_v7  ;;  %2708 = vmatprep.subr.bf16.mxu1 %v3149_v7  ;;  %1943 = vst [vmem:[%s3836_s5] sm:$0x1] (!%p2358_p2), %v3151_v55  ;;  %1944 = vst [vmem:[%s3837_s6] sm:$0x1] (!%p2358_p2), %v3151_v55 }
  0xb9   : > { %2702 = vmatprep.mubr.msk.bf16.mxu0 %vm3150_vm0, %v3149_v7  ;;  %2722 = vmatprep.mubr.msk.bf16.mxu1 %vm3150_vm0, %v3149_v7 }
  0xbb   : > { %2689 = vmatpush3.bf16.msra.mxu0 %v3046_v63  ;;  %2709 = vmatpush3.bf16.msra.mxu1 %v3046_v63  ;;  %v1701_v63 = vrot.slane %v1699_v58, 1 }
  0xbc   : > { %2690 = vmatprep.subr.bf16.mxu0 %v3149_v7  ;;  %2710 = vmatprep.subr.bf16.mxu1 %v3149_v7 }
  0xbf   : > { %2691 = vmatpush3.bf16.msra.mxu0 %v3047_v0  ;;  %2711 = vmatpush3.bf16.msra.mxu1 %v3047_v0  ;;  %v3080_v0 = vld [vmem:[%s3834_s3 + $0x1f8] sm:$0xff]  }
  0xc0   : > { %2692 = vmatprep.subr.bf16.mxu0 %v3149_v7  ;;  %2712 = vmatprep.subr.bf16.mxu1 %v3149_v7 }
  0xc3   : > { %2693 = vmatpush3.bf16.msra.mxu0 %v3048_v1  ;;  %2713 = vmatpush3.bf16.msra.mxu1 %v3048_v1  ;;  %v1598_v1 = vor.u32 %v1597_v61, %v1593_v60 }
  0xc4   : > { %2694 = vmatprep.subr.bf16.mxu0 %v3149_v7  ;;  %2714 = vmatprep.subr.bf16.mxu1 %v3149_v7 }
  0xc7   : > { %2695 = vmatpush3.bf16.msra.mxu0 %v3049_v2  ;;  %2715 = vmatpush3.bf16.msra.mxu1 %v3049_v2  ;;  %v1702_v2 = vor.u32 %v1701_v63, %v1697_v62 }
  0xc8   : > { %2696 = vmatprep.subr.bf16.mxu0 %v3149_v7  ;;  %2716 = vmatprep.subr.bf16.mxu1 %v3149_v7 }
  0xcb   : > { %2697 = vmatpush3.bf16.msra.mxu0 %v3050_v10  ;;  %2717 = vmatpush3.bf16.msra.mxu1 %v3050_v10  ;;  %v3089_v10 = vld [vmem:[%s3834_s3 + $0x230] sm:$0xff]  }
  0xcc   : > { %2698 = vmatprep.subr.bf16.mxu0 %v3149_v7  ;;  %2718 = vmatprep.subr.bf16.mxu1 %v3149_v7 }
  0xcf   : > { %2699 = vmatpush3.bf16.msra.mxu0 %v3051_v13  ;;  %2719 = vmatpush3.bf16.msra.mxu1 %v3051_v13  ;;  %v2346_v13 = vcombine.low %v1762_v11, %v3703_v51 }
  0xd0   : > { %2700 = vmatprep.subr.bf16.mxu0 %v3149_v7  ;;  %2720 = vmatprep.subr.bf16.mxu1 %v3149_v7 }
  0xd1   : > { %v1766_v16 = vrot.slane %v2346_v13, 1 }
  0xd3   : > { %2701 = vmatpush3.bf16.msra.mxu0 %v3052_v18  ;;  %2721 = vmatpush3.bf16.msra.mxu1 %v3052_v18 }
  0xd4   : > { %2726 = vmatprep.subr.bf16.mxu0 %v3149_v7  ;;  %2746 = vmatprep.subr.bf16.mxu1 %v3149_v7 }
  0xd6   : > { %2703 = vmatmul.mubr.bf16.vlgmr.msra.gmra.mrb[0].mxu0 %v1112_v19  ;;  %2723 = vmatmul.mubr.bf16.vlgmr.msra.gmra.mrb[0].mxu1 %v1216_v20 }
  0xd7   : > { %2727 = vmatpush3.bf16.msra.mxu0 %v3055_v21  ;;  %2747 = vmatpush3.bf16.msra.mxu1 %v3055_v21 }
  0xd8   : > { %2728 = vmatprep.subr.bf16.mxu0 %v3149_v7  ;;  %2748 = vmatprep.subr.bf16.mxu1 %v3149_v7 }
  0xd9   : > { %2742 = vmatprep.mubr.msk.bf16.mxu0 %vm3150_vm0, %v3149_v7  ;;  %2762 = vmatprep.mubr.msk.bf16.mxu1 %vm3150_vm0, %v3149_v7 }
  0xdb   : > { %2729 = vmatpush3.bf16.msra.mxu0 %v3056_v22  ;;  %2749 = vmatpush3.bf16.msra.mxu1 %v3056_v22 }
  0xdc   : > { %2730 = vmatprep.subr.bf16.mxu0 %v3149_v7  ;;  %2750 = vmatprep.subr.bf16.mxu1 %v3149_v7 }
  0xdf   : > { %2731 = vmatpush3.bf16.msra.mxu0 %v3057_v23  ;;  %2751 = vmatpush3.bf16.msra.mxu1 %v3057_v23 }
  0xe0   : > { %2732 = vmatprep.subr.bf16.mxu0 %v3149_v7  ;;  %2752 = vmatprep.subr.bf16.mxu1 %v3149_v7 }
  0xe3   : > { %2733 = vmatpush3.bf16.msra.mxu0 %v3058_v24  ;;  %2753 = vmatpush3.bf16.msra.mxu1 %v3058_v24 }
  0xe4   : > { %2734 = vmatprep.subr.bf16.mxu0 %v3149_v7  ;;  %2754 = vmatprep.subr.bf16.mxu1 %v3149_v7 }
  0xe7   : > { %2735 = vmatpush3.bf16.msra.mxu0 %v3059_v25  ;;  %2755 = vmatpush3.bf16.msra.mxu1 %v3059_v25 }
  0xe8   : > { %2736 = vmatprep.subr.bf16.mxu0 %v3149_v7  ;;  %2756 = vmatprep.subr.bf16.mxu1 %v3149_v7 }
  0xeb   : > { %2737 = vmatpush3.bf16.msra.mxu0 %v3060_v26  ;;  %2757 = vmatpush3.bf16.msra.mxu1 %v3060_v26 }
  0xec   : > { %2738 = vmatprep.subr.bf16.mxu0 %v3149_v7  ;;  %2758 = vmatprep.subr.bf16.mxu1 %v3149_v7 }
  0xef   : > { %2739 = vmatpush3.bf16.msra.mxu0 %v3061_v27  ;;  %2759 = vmatpush3.bf16.msra.mxu1 %v3061_v27 }
  0xf0   : > { %2740 = vmatprep.subr.bf16.mxu0 %v3149_v7  ;;  %2760 = vmatprep.subr.bf16.mxu1 %v3149_v7 }
  0xf3   : > { %2741 = vmatpush3.bf16.msra.mxu0 %v3062_v32  ;;  %2761 = vmatpush3.bf16.msra.mxu1 %v3062_v32 }
  0xf4   : > { %2766 = vmatprep.subr.bf16.mxu0 %v3149_v7  ;;  %2786 = vmatprep.subr.bf16.mxu1 %v3149_v7 }
  0xf6   : > { %2743 = vmatmul.mubr.bf16.vlgmr.msra.gmra.mrb[0].mxu0 %v1280_v33  ;;  %2763 = vmatmul.mubr.bf16.vlgmr.msra.gmra.mrb[0].mxu1 %v1375_v34 }
  0xf7   : > { %2767 = vmatpush3.bf16.msra.mxu0 %v3065_v35  ;;  %2787 = vmatpush3.bf16.msra.mxu1 %v3065_v35 }
  0xf8   : > { %2768 = vmatprep.subr.bf16.mxu0 %v3149_v7  ;;  %2788 = vmatprep.subr.bf16.mxu1 %v3149_v7 }
  0xf9   : > { %2782 = vmatprep.mubr.msk.bf16.mxu0 %vm3150_vm0, %v3149_v7  ;;  %2802 = vmatprep.mubr.msk.bf16.mxu1 %vm3150_vm0, %v3149_v7 }
  0xfb   : > { %2769 = vmatpush3.bf16.msra.mxu0 %v3066_v36  ;;  %2789 = vmatpush3.bf16.msra.mxu1 %v3066_v36 }
  0xfc   : > { %2770 = vmatprep.subr.bf16.mxu0 %v3149_v7  ;;  %2790 = vmatprep.subr.bf16.mxu1 %v3149_v7 }
  0xff   : > { %2771 = vmatpush3.bf16.msra.mxu0 %v3067_v37  ;;  %2791 = vmatpush3.bf16.msra.mxu1 %v3067_v37 }
 0x100   : > { %2772 = vmatprep.subr.bf16.mxu0 %v3149_v7  ;;  %2792 = vmatprep.subr.bf16.mxu1 %v3149_v7 }
 0x103   : > { %2773 = vmatpush3.bf16.msra.mxu0 %v3068_v38  ;;  %2793 = vmatpush3.bf16.msra.mxu1 %v3068_v38 }
 0x104   : > { %2774 = vmatprep.subr.bf16.mxu0 %v3149_v7  ;;  %2794 = vmatprep.subr.bf16.mxu1 %v3149_v7 }
 0x107   : > { %2775 = vmatpush3.bf16.msra.mxu0 %v3069_v39  ;;  %2795 = vmatpush3.bf16.msra.mxu1 %v3069_v39 }
 0x108   : > { %2776 = vmatprep.subr.bf16.mxu0 %v3149_v7  ;;  %2796 = vmatprep.subr.bf16.mxu1 %v3149_v7 }
 0x10b   : > { %2777 = vmatpush3.bf16.msra.mxu0 %v3070_v40  ;;  %2797 = vmatpush3.bf16.msra.mxu1 %v3070_v40 }
 0x10c   : > { %2778 = vmatprep.subr.bf16.mxu0 %v3149_v7  ;;  %2798 = vmatprep.subr.bf16.mxu1 %v3149_v7 }
 0x10f   : > { %2779 = vmatpush3.bf16.msra.mxu0 %v3071_v41  ;;  %2799 = vmatpush3.bf16.msra.mxu1 %v3071_v41 }
 0x110   : > { %2780 = vmatprep.subr.bf16.mxu0 %v3149_v7  ;;  %2800 = vmatprep.subr.bf16.mxu1 %v3149_v7 }
 0x113   : > { %2781 = vmatpush3.bf16.msra.mxu0 %v3072_v42  ;;  %2801 = vmatpush3.bf16.msra.mxu1 %v3072_v42 }
 0x114   : > { %2806 = vmatprep.subr.bf16.mxu0 %v3149_v7  ;;  %2826 = vmatprep.subr.bf16.mxu1 %v3149_v7 }
 0x116   : > { %2783 = vmatmul.mubr.bf16.vlgmr.msra.gmra.mrb[0].mxu0 %v1435_v43  ;;  %2803 = vmatmul.mubr.bf16.vlgmr.msra.gmra.mrb[0].mxu1 %v2301_v44 }
 0x117   : > { %2807 = vmatpush3.bf16.msra.mxu0 %v3073_v45  ;;  %2827 = vmatpush3.bf16.msra.mxu1 %v3073_v45 }
 0x118   : > { %2808 = vmatprep.subr.bf16.mxu0 %v3149_v7  ;;  %2828 = vmatprep.subr.bf16.mxu1 %v3149_v7 }
 0x119   : > { %2822 = vmatprep.mubr.msk.bf16.mxu0 %vm3150_vm0, %v3149_v7  ;;  %2842 = vmatprep.mubr.msk.bf16.mxu1 %vm3150_vm0, %v3149_v7 }
 0x11b   : > { %2809 = vmatpush3.bf16.msra.mxu0 %v3074_v46  ;;  %2829 = vmatpush3.bf16.msra.mxu1 %v3074_v46 }
 0x11c   : > { %2810 = vmatprep.subr.bf16.mxu0 %v3149_v7  ;;  %2830 = vmatprep.subr.bf16.mxu1 %v3149_v7 }
 0x11f   : > { %2811 = vmatpush3.bf16.msra.mxu0 %v3075_v47  ;;  %2831 = vmatpush3.bf16.msra.mxu1 %v3075_v47 }
 0x120   : > { %2812 = vmatprep.subr.bf16.mxu0 %v3149_v7  ;;  %2832 = vmatprep.subr.bf16.mxu1 %v3149_v7 }
 0x123   : > { %2813 = vmatpush3.bf16.msra.mxu0 %v3076_v48  ;;  %2833 = vmatpush3.bf16.msra.mxu1 %v3076_v48 }
 0x124   : > { %2814 = vmatprep.subr.bf16.mxu0 %v3149_v7  ;;  %2834 = vmatprep.subr.bf16.mxu1 %v3149_v7 }
 0x127   : > { %2815 = vmatpush3.bf16.msra.mxu0 %v3077_v49  ;;  %2835 = vmatpush3.bf16.msra.mxu1 %v3077_v49 }
 0x128   : > { %2816 = vmatprep.subr.bf16.mxu0 %v3149_v7  ;;  %2836 = vmatprep.subr.bf16.mxu1 %v3149_v7 }
 0x12b   : > { %2817 = vmatpush3.bf16.msra.mxu0 %v3078_v56  ;;  %2837 = vmatpush3.bf16.msra.mxu1 %v3078_v56 }
 0x12c   : > { %2818 = vmatprep.subr.bf16.mxu0 %v3149_v7  ;;  %2838 = vmatprep.subr.bf16.mxu1 %v3149_v7 }
 0x12f   : > { %2819 = vmatpush3.bf16.msra.mxu0 %v3079_v59  ;;  %2839 = vmatpush3.bf16.msra.mxu1 %v3079_v59 }
 0x130   : > { %2820 = vmatprep.subr.bf16.mxu0 %v3149_v7  ;;  %2840 = vmatprep.subr.bf16.mxu1 %v3149_v7 }
 0x133   : > { %2821 = vmatpush3.bf16.msra.mxu0 %v3080_v0  ;;  %2841 = vmatpush3.bf16.msra.mxu1 %v3080_v0 }
 0x134   : > { %2846 = vmatprep.subr.bf16.mxu0 %v3149_v7  ;;  %2866 = vmatprep.subr.bf16.mxu1 %v3149_v7 }
 0x136   : > { %2823 = vmatmul.mubr.bf16.vlgmr.msra.gmra.mrb[0].mxu0 %v1598_v1  ;;  %2843 = vmatmul.mubr.bf16.vlgmr.msra.gmra.mrb[0].mxu1 %v1702_v2 }
 0x137   : > { %2847 = vmatpush3.bf16.msra.mxu0 %v3083_v3  ;;  %2867 = vmatpush3.bf16.msra.mxu1 %v3083_v3 }
 0x138   : > { %2848 = vmatprep.subr.bf16.mxu0 %v3149_v7  ;;  %2868 = vmatprep.subr.bf16.mxu1 %v3149_v7 }
 0x139   : > { %2862 = vmatprep.mubr.msk.bf16.mxu0 %vm3150_vm0, %v3149_v7  ;;  %2882 = vmatprep.mubr.msk.bf16.mxu1 %vm3150_vm0, %v3149_v7 }
 0x13b   : > { %2849 = vmatpush3.bf16.msra.mxu0 %v3084_v4  ;;  %2869 = vmatpush3.bf16.msra.mxu1 %v3084_v4 }
 0x13c   : > { %2850 = vmatprep.subr.bf16.mxu0 %v3149_v7  ;;  %2870 = vmatprep.subr.bf16.mxu1 %v3149_v7 }
 0x13f   : > { %2851 = vmatpush3.bf16.msra.mxu0 %v3085_v5  ;;  %2871 = vmatpush3.bf16.msra.mxu1 %v3085_v5 }
 0x140   : > { %2852 = vmatprep.subr.bf16.mxu0 %v3149_v7  ;;  %2872 = vmatprep.subr.bf16.mxu1 %v3149_v7 }
 0x143   : > { %2853 = vmatpush3.bf16.msra.mxu0 %v3086_v6  ;;  %2873 = vmatpush3.bf16.msra.mxu1 %v3086_v6 }
 0x144   : > { %2854 = vmatprep.subr.bf16.mxu0 %v3149_v7  ;;  %2874 = vmatprep.subr.bf16.mxu1 %v3149_v7 }
 0x147   : > { %2855 = vmatpush3.bf16.msra.mxu0 %v3087_v8  ;;  %2875 = vmatpush3.bf16.msra.mxu1 %v3087_v8 }
 0x148   : > { %2856 = vmatprep.subr.bf16.mxu0 %v3149_v7  ;;  %2876 = vmatprep.subr.bf16.mxu1 %v3149_v7 }
 0x14b   : > { %2857 = vmatpush3.bf16.msra.mxu0 %v3088_v9  ;;  %2877 = vmatpush3.bf16.msra.mxu1 %v3088_v9 }
 0x14c   : > { %2858 = vmatprep.subr.bf16.mxu0 %v3149_v7  ;;  %2878 = vmatprep.subr.bf16.mxu1 %v3149_v7 }
 0x14f   : > { %2859 = vmatpush3.bf16.msra.mxu0 %v3089_v10  ;;  %2879 = vmatpush3.bf16.msra.mxu1 %v3089_v10 }
 0x150   : > { %2860 = vmatprep.subr.bf16.mxu0 %v3149_v7  ;;  %2880 = vmatprep.subr.bf16.mxu1 %v3149_v7 }
 0x153   : > { %2861 = vmatpush3.bf16.msra.mxu0 %v3090_v15  ;;  %2881 = vmatpush3.bf16.msra.mxu1 %v3090_v15 }
 0x156   : > { %2863 = vmatmul.mubr.bf16.vlgmr.msra.gmra.mrb[0].mxu0 %v1766_v16  ;;  %2883 = vmatmul.mubr.bf16.vlgmr.msra.gmra.mrb[0].mxu1 %v1861_v17 }
 0x229   : > { %v1850_v18 = vpop.f32.mrb[0].mxu0  ;;  %v1897_v19 = vpop.f32.mrb[0].mxu1 }
 0x22a   : > { %v1904_v20 = vpack.c.bf16 %v1850_v18, %v1850_v18  ;;  %v1906_v21 = vrot.slane %v1850_v18, 4  ;;  %v1913_v22 = vmul.f32 %v1850_v18, %v1850_v18  ;;  %v1921_v23 = vpack.c.bf16 %v1897_v19, %v1897_v19  ;;  %v2864_v24 = vpop.f32.mrb[1].mxu0  ;;  %v2884_v25 = vpop.f32.mrb[1].mxu1 }
 0x22b   : > { %v1924_v26 = vrot.slane %v1897_v19, 4  ;;  %v1931_v27 = vmul.f32 %v1897_v19, %v1897_v19  ;;  %v1853_v28 = vpop.f32.mrb[2].mxu0  ;;  %v1900_v7 = vpop.f32.mrb[2].mxu1 }
 0x22c   : > { %1905 = vst [vmem:[%s3778_s15] sm:$0xf] %v1904_v20  ;;  %v1907_v29 = vadd.f32 %v1906_v21, %v1850_v18  ;;  %v1914_v30 = vrot.slane %v1913_v22, 4  ;;  %2357 = vst [vmem:[%s3778_s15 + $0x4] sm:$0xf] %v1921_v23  ;;  %v2865_v31 = vpop.f32.mrb[3].mxu0  ;;  %v2885_v32 = vpop.f32.mrb[3].mxu1 }
 0x22d   : > { %v1925_v33 = vadd.f32 %v1924_v26, %v1897_v19  ;;  %v1932_v34 = vrot.slane %v1931_v27, 4 }
 0x22e   : > { %v1908_v35 = vrot.slane %v1907_v29, 2  ;;  %v1915_v36 = vadd.f32 %v1914_v30, %v1913_v22 }
 0x22f   : > { %v1926_v37 = vrot.slane %v1925_v33, 2  ;;  %v1933_v38 = vadd.f32 %v1932_v34, %v1931_v27 }
 0x230   : > { %v1909_v39 = vadd.f32 %v1908_v35, %v1907_v29  ;;  %v1916_v40 = vrot.slane %v1915_v36, 2 }
 0x231   : > { %v1927_v41 = vadd.f32 %v1926_v37, %v1925_v33  ;;  %v1934_v42 = vrot.slane %v1933_v38, 2 }
 0x232   : > { %v1910_v43 = vrot.slane %v1909_v39, 1  ;;  %v1917_v44 = vadd.f32 %v1916_v40, %v1915_v36 }
 0x233   : > { %v1928_v45 = vrot.slane %v1927_v41, 1  ;;  %v1935_v46 = vadd.f32 %v1934_v42, %v1933_v38  ;;  %1942 = sbr.rel (%p2358_p2) target bundleno = 570 (0x23a), region = 163 }
 0x234   : > { %v1911_v47 = vadd.f32 %v1910_v43, %v1909_v39  ;;  %v1918_v48 = vrot.slane %v1917_v44, 1 }
 0x235   : > { %v1929_v49 = vadd.f32 %v1928_v45, %v1927_v41  ;;  %v1936_v50 = vrot.slane %v1935_v46, 1 }
 0x236   : > { %v1919_v51 = vadd.f32 %v1918_v48, %v1917_v44 }
 0x237   : > { %v1930_v52 = vadd.f32 %v1929_v49, %v1911_v47  ;;  %v1937_v53 = vadd.f32 %v1936_v50, %v1935_v46 }
 0x239   : > { %v1938_v54 = vadd.f32 %v1937_v53, %v1919_v51 }
 0x23a PF: > { %v1945_v56 = vld [vmem:[%s3836_s5] sm:$0x1]  ;;  %1957 = sbr.rel (!%p3278_p11) target bundleno = 577 (0x241), region = 167  ;;  %s2360_s10 = sshll.u32 (%p3278_p11), %s3223_s28, 2  ;;  %v1977_v61 = vld [vmem:[%s3778_s15 + $0x4] sm:$0xf] (%p3278_p11) }
 0x23b   : > { %v1948_v57 = vld [vmem:[%s3837_s6] sm:$0x1]  ;;  %v1946_v58 = vadd.f32 %v1945_v56, %v1930_v52  ;;  %s1959_s8 = scalar_lea.vmem (%p3278_p11), %s3835_s4, %s2360_s10 }
 0x23c   : > { %v1949_v59 = vadd.f32 %v1948_v57, %v1938_v54  ;;  %v1975_v60 = vld [vmem:[%s3778_s15] sm:$0xf] (%p3278_p11)  ;;  %1978 = vst [vmem:[%s1959_s8 + $0x20] sm:$0xf] (%p3278_p11), %v1977_v61 }
 0x23d   : > { %1947 = vst [vmem:[%s3836_s5] sm:$0x1] %v1946_v58  ;;  %1976 = vst [vmem:[%s1959_s8] sm:$0xf] (%p3278_p11), %v1975_v60 }
 0x23e   : > { %1950 = vst [vmem:[%s3837_s6] sm:$0x1] %v1949_v59 }
 0x241 PF: > { %s3846_s30 = sld [smem:[#allocation8_spill]]  ;;  %s3847_s25 = sld [smem:[#allocation6_spill]] }
 0x242   : > { %s3848_s26 = sld [smem:[#allocation7_spill]]  ;;  %p14_p3 = scmp.ge.s32.totalorder %s3226_s29, 10  }
 0x243   : > { %s3849_s21 = smov %s3127_s22  ;;  %s3850_s22 = smov %s3267_s19 }
 0x244   : > { %s3851_s23 = smov %s3135_s24  ;;  %s3853_s27 = smov %s3226_s29 }
 0x245   :  { %16 = sbr.rel (!%p14_p3) target bundleno = 4 (0x4), region = 283 }
 0x247   : > { %s3852_s24 = smov %s3846_s30 }

// kernel: xception_forward.15
= control target key start
LH: loop header
LB: loop body
LE: loop exit
PB: predicated region body
PF: predicated region fallthrough
CT: control target
= control target key end

     0   :  { %v24_v0 = vlaneseq  ;;  %v214_v1 = vmov 1983009808   ;;  %v215_v26 = vmov 1966171168   ;;  %s266_s1 = inlined_call_operand.vmem [shape: f32[1,256], index: 1, kind: input, shape index: {}]   ;;  %s267_s2 = inlined_call_operand.vmem [shape: f32[1,256], index: 2, kind: input, shape index: {}]   ;;  %s268_s0 = inlined_call_operand.vmem [shape: bf16[2,2,2,256], index: 0, kind: input, shape index: {}]   ;;  %s269_s3 = inlined_call_operand.vmem [shape: bf16[2,2,2,256], index: 3, kind: output, shape index: {}]  }
   0x1   :  { %v34_v2 = vunpack.c.l.s4 %v214_v1  ;;  %v22_v4 = vld [vmem:[%s266_s1] sm:$0x3]  ;;  %v15_v10 = vld [vmem:[%s268_s0 + $0x2] sm:$0x3]  ;;  %v16_v12 = vld [vmem:[%s268_s0 + $0x4] sm:$0x3]  ;;  %v134_v27 = vunpack.c.l.s4 %v215_v26 }
   0x2   :  { %v25_v3 = vshrl.u32 %v24_v0, 7  ;;  %v45_v6 = vld [vmem:[%s267_s2] sm:$0x3]  ;;  %v17_v13 = vld [vmem:[%s268_s0 + $0x6] sm:$0x3]  ;;  %v19_v19 = vunpack.c.l.bf16 %v15_v10  ;;  %v20_v22 = vunpack.c.l.bf16 %v16_v12 }
   0x3   :  { %v35_v5 = vunpack.c.0.s8 %v34_v2  ;;  %v14_v7 = vld [vmem:[%s268_s0] sm:$0x3]  ;;  %v21_v23 = vunpack.c.l.bf16 %v17_v13  ;;  %v135_v36 = vunpack.c.0.s8 %v134_v27 }
   0x4   :  { %v26_v8 = vsub.s32 0, %v25_v3  ;;  %v30_v9 = vsub.s32 1, %v25_v3  ;;  %v18_v18 = vunpack.c.l.bf16 %v14_v7 }
   0x5   :  { %v38_v11 = vsub.s32 %v35_v5, %v25_v3  ;;  %v138_v45 = vsub.s32 %v135_v36, %v25_v3 }
   0x6   :  { %v27_v14 = vrot.slane %v22_v4, %v26_v8  ;;  %v31_v15 = vrot.slane %v22_v4, %v30_v9  ;;  %v50_v16 = vrot.slane %v45_v6, %v26_v8  ;;  %v54_v17 = vrot.slane %v45_v6, %v30_v9 }
   0x8   :  { %v32_v20 = vcombine.low %v27_v14, %v31_v15  ;;  %v55_v21 = vcombine.low %v50_v16, %v54_v17 }
   0xa   :  { %v39_v24 = vrot.slane %v32_v20, %v38_v11  ;;  %v62_v25 = vrot.slane %v55_v21, %v38_v11 }
   0xc   :  { %v41_v28 = vmul.f32 %v39_v24, %v18_v18  ;;  %v42_v29 = vmul.f32 %v39_v24, %v19_v19  ;;  %v43_v30 = vmul.f32 %v39_v24, %v20_v22  ;;  %v44_v31 = vmul.f32 %v39_v24, %v21_v23 }
   0xe   :  { %v64_v32 = vadd.f32 %v62_v25, %v41_v28  ;;  %v65_v33 = vadd.f32 %v62_v25, %v42_v29  ;;  %v66_v34 = vadd.f32 %v62_v25, %v43_v30  ;;  %v67_v35 = vadd.f32 %v62_v25, %v44_v31 }
  0x10   :  { %v68_v37 = vmax.f32 %v64_v32, 0.0  ;;  %v69_v38 = vmax.f32 %v65_v33, 0.0  ;;  %v70_v39 = vmax.f32 %v66_v34, 0.0  ;;  %v71_v40 = vmax.f32 %v67_v35, 0.0 }
  0x12   :  { %v82_v41 = vrot.slane %v68_v37, %v38_v11  ;;  %v90_v42 = vrot.slane %v69_v38, %v38_v11  ;;  %v98_v43 = vrot.slane %v70_v39, %v38_v11  ;;  %v106_v44 = vrot.slane %v71_v40, %v38_v11 }
  0x14   :  { %v83_v46 = vcombine.high %v82_v41, %v82_v41  ;;  %v91_v47 = vcombine.high %v90_v42, %v90_v42  ;;  %v99_v48 = vcombine.high %v98_v43, %v98_v43  ;;  %v107_v49 = vcombine.high %v106_v44, %v106_v44 }
  0x16   :  { %v204_v50 = vpack.c.bf16 %v83_v46, %v82_v41  ;;  %v205_v51 = vpack.c.bf16 %v91_v47, %v90_v42  ;;  %v206_v52 = vpack.c.bf16 %v99_v48, %v98_v43  ;;  %v207_v53 = vpack.c.bf16 %v107_v49, %v106_v44 }
  0x18   :  { %v139_v54 = vrot.slane %v204_v50, %v138_v45  ;;  %v154_v55 = vrot.slane %v205_v51, %v138_v45  ;;  %v169_v56 = vrot.slane %v206_v52, %v138_v45  ;;  %v184_v57 = vrot.slane %v207_v53, %v138_v45 }
  0x1a   :  { %208 = vst.sshfl [vmem:[%s269_s3] sm:$0x5 pattern:$0x73625140] %v139_v54 }
  0x1b   :  { %209 = vst.sshfl [vmem:[%s269_s3 + $0x2] sm:$0x5 pattern:$0x73625140] %v154_v55 }
  0x1c   :  { %210 = vst.sshfl [vmem:[%s269_s3 + $0x4] sm:$0x5 pattern:$0x73625140] %v169_v56 }
  0x1d   :  { %211 = vst.sshfl [vmem:[%s269_s3 + $0x6] sm:$0x5 pattern:$0x73625140] %v184_v57 }

// kernel: xception_forward.12
= control target key start
LH: loop header
LB: loop body
LE: loop exit
PB: predicated region body
PF: predicated region fallthrough
CT: control target
= control target key end

     0   :  { %s4196_s0 = inlined_call_operand.vmem [shape: bf16[2,10,5,128], index: 0, kind: input, shape index: {}, may-alias: {0,2,4}]   ;;  %s4197_s1 = inlined_call_operand.vmem [shape: bf16[2,10,5,128], index: 1, kind: input, shape index: {}, may-alias: {1,3,5}]   ;;  %s4198_s2 = inlined_call_operand.vmem [shape: bf16[2,10,5,128], index: 2, kind: input, shape index: {}, may-alias: {0,2,4}]   ;;  %s4199_s3 = inlined_call_operand.vmem [shape: bf16[2,10,5,128], index: 3, kind: input, shape index: {}, may-alias: {1,3,5}]   ;;  %s4200_s4 = inlined_call_operand.vmem [shape: bf16[2,10,5,128], index: 4, kind: input, shape index: {}, may-alias: {0,2,4}]   ;;  %s4201_s5 = inlined_call_operand.vmem [shape: bf16[2,10,5,128], index: 5, kind: input, shape index: {}, may-alias: {1,3,5}]   ;;  %s4202_s6 = inlined_call_operand.vmem [shape: bf16[9,128,128], index: 6, kind: input, shape index: {}]   ;;  %s4203_s7 = inlined_call_operand.vmem [shape: bf16[2,4,4,128], index: 7, kind: output, shape index: {0}]   ;;  %s4204_s8 = inlined_call_operand.vmem [shape: f32[1,128], index: 8, kind: output, shape index: {1}]   ;;  %s4205_s9 = inlined_call_operand.vmem [shape: f32[1,128], index: 9, kind: output, shape index: {2}]  }
   0x1   :  { %4212 = sst [smem:[#allocation16_spill]] %s4203_s7 }
   0x2   :  { %4213 = sst [smem:[#allocation17_spill]] %s4204_s8 }
   0x3   :  { %4214 = sst [smem:[#allocation18_spill]] %s4205_s9 }
   0x4   :  { %s3556_s30 = smov 0   ;;  %s3558_s10 = smov 0  }
   0x5   :  { %s3560_s11 = smov 0   ;;  %s3562_s12 = smov 0  }
   0x6   :  { %s3564_s13 = smov 0   ;;  %s3566_s14 = smov 0  }
   0x7   :  { %s3568_s15 = smov 0   ;;  %s3570_s16 = smov 0  }
   0x8   :  { %s3572_s17 = smov 0  }
   0x9 LB: > { %4215 = sst [smem:[#allocation9_spill]] %s3473_s10  ;;  %s3602_s18 = sadd.s32 4294967295, %s3501_s17   ;;  %s3501_s17 = sphi %s3572_s17, %s4232_s17   ;;  %s3497_s16 = sphi %s3570_s16, %s4243_s16   ;;  %s3493_s15 = sphi %s3568_s15, %s4242_s15   ;;  %s3489_s14 = sphi %s3566_s14, %s4241_s14   ;;  %s3485_s13 = sphi %s3564_s13, %s4240_s13   ;;  %s3481_s12 = sphi %s3562_s12, %s4239_s12   ;;  %s3477_s11 = sphi %s3560_s11, %s4238_s11   ;;  %s3473_s10 = sphi %s3558_s10, %s4234_s10   ;;  %s3469_s30 = sphi %s3556_s30, %s4233_s30  }
   0xa   : > { %s3605_s19 = sadd.s32 1, %s3501_s17   ;;  %s2405_s20 = sshll.u32 %s3501_s17, 1 }
   0xb   : > { %4216 = sst [smem:[#allocation10_spill]] %s3605_s19  ;;  %s29_s21 = sadd.s32 1, %s3497_s16 }
   0xc   : > { %s2675_s22 = sadd.s32 2, %s2405_s20  ;;  %p36_p0 = scmp.ne.s32.totalorder %s3497_s16, %s3493_s15 }
   0xd   : > { %s26_s23 = ssub.s32 %s2405_s20, %s2675_s22  ;;  %p37_p1 = scmp.eq.s32.totalorder %s3501_s17, 0 }
   0xe   : > { %p27_p2 = scmp.eq.s32.totalorder %s26_s23, 0  ;;  %s81_s24 = sadd.s32 1, %s2405_s20 }
   0xf   : > { %p3614_p3 = por %p37_p1, %p36_p0  ;;  %s83_s26 = sadd.s32 1, %s2675_s22 }
  0x10   : > { %s3619_s27 = scalar_select %p27_p2, %s3497_s16, %s29_s21  }
  0x11   : > { %s84_s28 = ssub.s32 %s81_s24, %s83_s26  ;;  %s87_s29 = sadd.s32 1, %s3489_s14 }
  0x12   : > { %4218 = sst [smem:[#allocation11_spill]] %s3619_s27  ;;  %p85_p4 = scmp.eq.s32.totalorder %s84_s28, 0 }
  0x13   : > { %p94_p5 = scmp.ne.s32.totalorder %s3489_s14, %s3485_s13  ;;  %s143_s20 = sadd.s32 2, %s2675_s22 }
  0x14   : > { %s147_s23 = sadd.s32 1, %s3481_s12  ;;  %s144_s8 = ssub.s32 %s2675_s22, %s143_s20 }
  0x15   : > { %s3626_s7 = scalar_select %p85_p4, %s3489_s14, %s87_s29  }
  0x16   : > { %p3630_p6 = por %p94_p5, %p37_p1  ;;  %p145_p7 = scmp.eq.s32.totalorder %s144_s8, 0 }
  0x17   : > { %4219 = sst [smem:[#allocation12_spill]] %s3626_s7  ;;  %p154_p8 = scmp.ne.s32.totalorder %s3481_s12, %s3477_s11 }
  0x18   : > { %s221_s21 = ssub.s32 %s3501_s17, %s3605_s19  ;;  %s224_s24 = sadd.s32 1, %s3473_s10 }
  0x19   : > { %s3640_s26 = scalar_select %p145_p7, %s3481_s12, %s147_s23  }
  0x1a   : > { %p3644_p9 = por %p154_p8, %p37_p1  ;;  %p222_p10 = scmp.eq.s32.totalorder %s221_s21, 0 }
  0x1b   : > { %4221 = sst [smem:[#allocation13_spill]] %s3640_s26  ;;  %p234_p11 = scmp.ne.s32.totalorder %s3473_s10, %s3469_s30 }
  0x1c   : > { %p235_p12 = scmp.eq.s32.totalorder %s3602_s18, 3  ;;  %p2418_p0 = scmp.ge.s32.totalorder %s3501_s17, 4 }
  0x1d   : > { %s3652_s29 = scalar_select %p222_p10, %s3473_s10, %s224_s24  }
  0x1e   : > { %p3654_p13 = por %p235_p12, %p234_p11  ;;  %302 = sbr.rel (%p2418_p0) target bundleno = 79 (0x4f), region = 20 }
  0x1f   : > { %4223 = sst [smem:[#allocation14_spill]] %s3652_s29 }
  0x20   : > { %s4224_s27 = scalar_select %p3654_p13, 1, 0 }
  0x22   : > { %4225 = sst [smem:[#allocation15_spill]] %s4224_s27 }
  0x25   : > { %305 = sbr.rel (!%p3614_p3) target bundleno = 44 (0x2c), region = 24  ;;  %s307_s8 = sand.u32 (%p3614_p3), 1, %s3497_s16  }
  0x26   : > { %s2686_s22 = sshll.u32 (%p3614_p3), %s3501_s17, 3  ;;  %s2419_s20 = sshll.u32 (%p3614_p3), %s307_s8, 3 }
  0x27   : > { %s312_s24 = scalar_lea.vmem (%p3614_p3), %s4196_s0, %s2686_s22  ;;  %s309_s7 = scalar_lea.vmem (%p3614_p3), [#allocation2], %s2419_s20 }
  0x28   : > { %v328_v0 = vld [vmem:[%s312_s24] sm:$0xf] (%p3614_p3)  ;;  %v330_v1 = vld [vmem:[%s312_s24 + $0x28] sm:$0xf] (%p3614_p3) }
  0x29   : > { %329 = vst [vmem:[%s309_s7] sm:$0xf] (%p3614_p3), %v328_v0  ;;  %331 = vst [vmem:[%s309_s7 + $0x4] sm:$0xf] (%p3614_p3), %v330_v1 }
  0x2c PF: > { %358 = sbr.rel (!%p3614_p3) target bundleno = 51 (0x33), region = 65  ;;  %s360_s26 = sand.u32 (%p3614_p3), 1, %s3497_s16  }
  0x2d   : > { %s2687_s29 = sshll.u32 (%p3614_p3), %s3501_s17, 3  ;;  %s2422_s10 = sshll.u32 (%p3614_p3), %s360_s26, 3 }
  0x2e   : > { %s365_s27 = scalar_lea.vmem (%p3614_p3), %s4197_s1, %s2687_s29  ;;  %s362_s22 = scalar_lea.vmem (%p3614_p3), [#allocation3], %s2422_s10 }
  0x2f   : > { %v381_v2 = vld [vmem:[%s365_s27] sm:$0xf] (%p3614_p3)  ;;  %v383_v3 = vld [vmem:[%s365_s27 + $0x28] sm:$0xf] (%p3614_p3) }
  0x30   : > { %382 = vst [vmem:[%s362_s22] sm:$0xf] (%p3614_p3), %v381_v2  ;;  %384 = vst [vmem:[%s362_s22 + $0x4] sm:$0xf] (%p3614_p3), %v383_v3 }
  0x33 PF: > { %411 = sbr.rel (!%p3630_p6) target bundleno = 58 (0x3a), region = 106  ;;  %s413_s7 = sand.u32 (%p3630_p6), 1, %s3489_s14  }
  0x34   : > { %s2688_s25 = sshll.u32 (%p3630_p6), %s3501_s17, 3  ;;  %s2425_s20 = sshll.u32 (%p3630_p6), %s413_s7, 3 }
  0x35   : > { %s2273_s21 = scalar_lea.vmem (%p3630_p6), %s4198_s2, %s2688_s25  ;;  %s415_s19 = scalar_lea.vmem (%p3630_p6), [#allocation4], %s2425_s20 }
  0x36   : > { %v2428_v4 = vld [vmem:[%s2273_s21 + $0x4] sm:$0xf] (%p3630_p6)  ;;  %v2429_v5 = vld [vmem:[%s2273_s21 + $0x2c] sm:$0xf] (%p3630_p6) }
  0x37   : > { %436 = vst [vmem:[%s415_s19] sm:$0xf] (%p3630_p6), %v2428_v4  ;;  %438 = vst [vmem:[%s415_s19 + $0x4] sm:$0xf] (%p3630_p6), %v2429_v5 }
  0x3a PF: > { %465 = sbr.rel (!%p3630_p6) target bundleno = 65 (0x41), region = 147  ;;  %s467_s10 = sand.u32 (%p3630_p6), 1, %s3489_s14  }
  0x3b   : > { %s2689_s27 = sshll.u32 (%p3630_p6), %s3501_s17, 3  ;;  %s2430_s29 = sshll.u32 (%p3630_p6), %s467_s10, 3 }
  0x3c   : > { %s2279_s22 = scalar_lea.vmem (%p3630_p6), %s4199_s3, %s2689_s27  ;;  %s469_s7 = scalar_lea.vmem (%p3630_p6), [#allocation5], %s2430_s29 }
  0x3d   : > { %v2433_v6 = vld [vmem:[%s2279_s22 + $0x4] sm:$0xf] (%p3630_p6)  ;;  %v2434_v7 = vld [vmem:[%s2279_s22 + $0x2c] sm:$0xf] (%p3630_p6) }
  0x3e   : > { %490 = vst [vmem:[%s469_s7] sm:$0xf] (%p3630_p6), %v2433_v6  ;;  %492 = vst [vmem:[%s469_s7 + $0x4] sm:$0xf] (%p3630_p6), %v2434_v7 }
  0x41 PF: > { %519 = sbr.rel (!%p3644_p9) target bundleno = 72 (0x48), region = 188  ;;  %s521_s9 = sand.u32 (%p3644_p9), 1, %s3481_s12  }
  0x42   : > { %s2690_s25 = sshll.u32 (%p3644_p9), %s3501_s17, 3  ;;  %s2435_s20 = sshll.u32 (%p3644_p9), %s521_s9, 3 }
  0x43   : > { %s2285_s21 = scalar_lea.vmem (%p3644_p9), %s4200_s4, %s2690_s25  ;;  %s523_s19 = scalar_lea.vmem (%p3644_p9), [#allocation6], %s2435_s20 }
  0x44   : > { %v2438_v8 = vld [vmem:[%s2285_s21 + $0x8] sm:$0xf] (%p3644_p9)  ;;  %v2439_v9 = vld [vmem:[%s2285_s21 + $0x30] sm:$0xf] (%p3644_p9) }
  0x45   : > { %544 = vst [vmem:[%s523_s19] sm:$0xf] (%p3644_p9), %v2438_v8  ;;  %546 = vst [vmem:[%s523_s19 + $0x4] sm:$0xf] (%p3644_p9), %v2439_v9 }
  0x48 PF: > { %573 = sbr.rel (!%p3644_p9) target bundleno = 79 (0x4f), region = 229  ;;  %s575_s10 = sand.u32 (%p3644_p9), 1, %s3481_s12  }
  0x49   : > { %s2691_s27 = sshll.u32 (%p3644_p9), %s3501_s17, 3  ;;  %s2440_s29 = sshll.u32 (%p3644_p9), %s575_s10, 3 }
  0x4a   : > { %s2291_s22 = scalar_lea.vmem (%p3644_p9), %s4201_s5, %s2691_s27  ;;  %s577_s7 = scalar_lea.vmem (%p3644_p9), [#allocation7], %s2440_s29 }
  0x4b   : > { %v2443_v10 = vld [vmem:[%s2291_s22 + $0x8] sm:$0xf] (%p3644_p9)  ;;  %v2444_v11 = vld [vmem:[%s2291_s22 + $0x30] sm:$0xf] (%p3644_p9) }
  0x4c   : > { %598 = vst [vmem:[%s577_s7] sm:$0xf] (%p3644_p9), %v2443_v10  ;;  %600 = vst [vmem:[%s577_s7 + $0x4] sm:$0xf] (%p3644_p9), %v2444_v11 }
  0x4f PF: > { %p2445_p1 = scmp.ge.s32.totalorder %s3501_s17, 1  ;;  %p626_p2 = scmp.lt.s32.totalorder %s3501_s17, 5 }
  0x51   : > { %p627_p3 = pnand %p2445_p1, %p626_p2 }
  0x52   : > { %v3353_v12 = vld [vmem:[%s4202_s6 + $0x40] sm:$0xff] (!%p627_p3)   ;;  %v3503_v13 = vmov (!%p627_p3), 0.0   ;;  %v3354_v14 = vld [vmem:[%s4202_s6 + $0x48] sm:$0xff] (!%p627_p3)   ;;  %s633_s17 = sand.u32 (!%p627_p3), 1, %s3493_s15   ;;  %vm3504_vm0 = vmmov (!%p627_p3), 0   ;;  %v3355_v15 = vld [vmem:[%s4202_s6 + $0x50] sm:$0xff] (!%p627_p3)  }
  0x53   : > { %630 = sbr.rel (%p627_p3) target bundleno = 611 (0x263), region = 270  ;;  %2854 = vmatprep.subr.bf16.mxu0 (!%p627_p3), %v3503_v13  ;;  %2894 = vmatprep.subr.bf16.mxu1 (!%p627_p3), %v3503_v13  ;;  %s3721_s21 = sshll.u32 (!%p627_p3), %s633_s17, 3  ;;  %v3356_v16 = vld [vmem:[%s4202_s6 + $0x58] sm:$0xff] (!%p627_p3)   ;;  %v3357_v17 = vld [vmem:[%s4202_s6 + $0x60] sm:$0xff] (!%p627_p3)   ;;  %v3358_v18 = vld [vmem:[%s4202_s6 + $0x68] sm:$0xff] (!%p627_p3)   ;;  %vm2143_vm1 = vcmask (!%p627_p3), 1043456  }
  0x54   : > { %2855 = vmatpush3.bf16.msra.mxu0 (!%p627_p3), %v3353_v12  ;;  %2895 = vmatpush3.bf16.msra.mxu1 (!%p627_p3), %v3353_v12  ;;  %s3726_s15 = scalar_lea.vmem (!%p627_p3), [#allocation2], %s3721_s21  ;;  %v3359_v19 = vld [vmem:[%s4202_s6 + $0x70] sm:$0xff] (!%p627_p3)   ;;  %v3360_v20 = vld [vmem:[%s4202_s6 + $0x78] sm:$0xff] (!%p627_p3)   ;;  %s647_s25 = sand.u32 (!%p627_p3), 1, %s3485_s13   ;;  %v3363_v22 = vld [vmem:[%s4202_s6] sm:$0xff] (!%p627_p3)  }
  0x55   : > { %2856 = vmatprep.subr.bf16.mxu0 (!%p627_p3), %v3503_v13  ;;  %2896 = vmatprep.subr.bf16.mxu1 (!%p627_p3), %v3503_v13  ;;  %s642_s20 = scalar_lea.vmem (!%p627_p3), [#allocation3], %s3721_s21  ;;  %s3760_s26 = sshll.u32 (!%p627_p3), %s647_s25, 3  ;;  %v3364_v24 = vld [vmem:[%s4202_s6 + $0x8] sm:$0xff] (!%p627_p3)   ;;  %v3365_v25 = vld [vmem:[%s4202_s6 + $0x10] sm:$0xff] (!%p627_p3)   ;;  %v3366_v26 = vld [vmem:[%s4202_s6 + $0x18] sm:$0xff] (!%p627_p3)  }
  0x56   : > { %2870 = vmatprep.mubr.msk.bf16.mxu0 (!%p627_p3), %vm3504_vm0, %v3503_v13  ;;  %2910 = vmatprep.mubr.msk.bf16.mxu1 (!%p627_p3), %vm3504_vm0, %v3503_v13  ;;  %v769_v21 = vld [vmem:[%s642_s20] sm:$0x3] (!%p627_p3)  ;;  %v2486_v23 = vld [vmem:[%s642_s20 + $0x4] sm:$0x3] (!%p627_p3)  ;;  %s3768_s19 = scalar_lea.vmem (!%p627_p3), [#allocation4], %s3760_s26  ;;  %v3367_v27 = vld [vmem:[%s4202_s6 + $0x20] sm:$0xff] (!%p627_p3)  }
  0x57   : > { %v3368_v28 = vld [vmem:[%s4202_s6 + $0x28] sm:$0xff] (!%p627_p3)   ;;  %v3369_v29 = vld [vmem:[%s4202_s6 + $0x30] sm:$0xff] (!%p627_p3)   ;;  %v3370_v30 = vld [vmem:[%s4202_s6 + $0x38] sm:$0xff] (!%p627_p3)   ;;  %s661_s21 = sand.u32 (!%p627_p3), 1, %s3477_s11   ;;  %s656_s29 = scalar_lea.vmem (!%p627_p3), [#allocation5], %s3760_s26 }
  0x58   : > { %2857 = vmatpush3.bf16.msra.mxu0 (!%p627_p3), %v3354_v14  ;;  %2897 = vmatpush3.bf16.msra.mxu1 (!%p627_p3), %v3354_v14  ;;  %v749_v31 = vld [vmem:[%s3726_s15] sm:$0x3] (!%p627_p3)  ;;  %v2453_v32 = vld [vmem:[%s3726_s15 + $0x4] sm:$0x3] (!%p627_p3)  ;;  %v3373_v35 = vld [vmem:[%s4202_s6 + $0x90] sm:$0xff] (!%p627_p3)   ;;  %s3858_s10 = sshll.u32 (!%p627_p3), %s661_s21, 3 }
  0x59   : > { %2858 = vmatprep.subr.bf16.mxu0 (!%p627_p3), %v3503_v13  ;;  %2898 = vmatprep.subr.bf16.mxu1 (!%p627_p3), %v3503_v13  ;;  %v3371_v33 = vld [vmem:[%s4202_s6 + $0x80] sm:$0xff] (!%p627_p3)   ;;  %v3372_v34 = vld [vmem:[%s4202_s6 + $0x88] sm:$0xff] (!%p627_p3)   ;;  %v3374_v36 = vld [vmem:[%s4202_s6 + $0x98] sm:$0xff] (!%p627_p3)   ;;  %s3861_s27 = scalar_lea.vmem (!%p627_p3), [#allocation6], %s3858_s10  ;;  %s715_s23 = sand.u32 (!%p627_p3), 1, %s3469_s30  }
  0x5a   : > { %v3375_v37 = vld [vmem:[%s4202_s6 + $0xa0] sm:$0xff]   ;;  %v3376_v40 = vld [vmem:[%s4202_s6 + $0xa8] sm:$0xff]   ;;  %v3377_v43 = vld [vmem:[%s4202_s6 + $0xb0] sm:$0xff]   ;;  %s2452_s13 = sshll.u32 %s715_s23, 2  ;;  %p2669_p4 = scmp.ne.s32.totalorder %s3602_s18, 0 }
  0x5b   : > { %v3361_v38 = vld [vmem:[%s3726_s15] ss:$0 sps:$4 sm:$0x77]   ;;  %v3362_v39 = vld [vmem:[%s3726_s15 + $0x4] ss:$0 sps:$4 sm:$0x77]  }
  0x5c   : > { %2859 = vmatpush3.bf16.msra.mxu0 %v3355_v15  ;;  %2899 = vmatpush3.bf16.msra.mxu1 %v3355_v15  ;;  %v1052_v41 = vshll.u32 %v3361_v38, 16  ;;  %v1153_v42 = vshll.u32 %v3362_v39, 16  ;;  %v1050_v44 = vshrl.u32 %v3361_v38, 16  ;;  %v1151_v46 = vshrl.u32 %v3362_v39, 16  ;;  %v3378_v48 = vld [vmem:[%s4202_s6 + $0xb8] sm:$0xff]   ;;  %v3379_v51 = vld [vmem:[%s4202_s6 + $0xc0] sm:$0xff]  }
  0x5d   : > { %2860 = vmatprep.subr.bf16.mxu0 %v3503_v13  ;;  %2900 = vmatprep.subr.bf16.mxu1 %v3503_v13  ;;  %v3380_v52 = vld [vmem:[%s4202_s6 + $0xc8] sm:$0xff]   ;;  %v3381_v53 = vld [vmem:[%s4202_s6 + $0xd0] sm:$0xff]   ;;  %v3382_v54 = vld [vmem:[%s4202_s6 + $0xd8] sm:$0xff]  }
  0x5e   : > { %v1054_v45 = vrot.slane %v1052_v41, 1  ;;  %v1155_v47 = vrot.slane %v1153_v42, 1  ;;  %v3383_v55 = vld [vmem:[%s4202_s6 + $0xe0] sm:$0xff]   ;;  %v3384_v56 = vld [vmem:[%s4202_s6 + $0xe8] sm:$0xff]   ;;  %v3385_v57 = vld [vmem:[%s4202_s6 + $0xf0] sm:$0xff]  }
  0x5f   : > { %v3386_v58 = vld [vmem:[%s4202_s6 + $0xf8] sm:$0xff]   ;;  %v1216_v59 = vld [vmem:[%s3768_s19] sm:$0x3]  ;;  %v2538_v60 = vld [vmem:[%s3768_s19 + $0x4] sm:$0x3] }
  0x60   : > { %2861 = vmatpush3.bf16.msra.mxu0 %v3356_v16  ;;  %2901 = vmatpush3.bf16.msra.mxu1 %v3356_v16  ;;  %v1055_v49 = vor.u32 %v1054_v45, %v1050_v44  ;;  %v1156_v50 = vor.u32 %v1155_v47, %v1151_v46  ;;  %v3387_v61 = vld [vmem:[%s4202_s6 + $0x100] sm:$0xff]   ;;  %v3388_v62 = vld [vmem:[%s4202_s6 + $0x108] sm:$0xff]   ;;  %v3389_v63 = vld [vmem:[%s4202_s6 + $0x110] sm:$0xff]  }
  0x61   : > { %2862 = vmatprep.subr.bf16.mxu0 %v3503_v13  ;;  %2902 = vmatprep.subr.bf16.mxu1 %v3503_v13  ;;  %v3390_v0 = vld [vmem:[%s4202_s6 + $0x118] sm:$0xff]   ;;  %v3391_v1 = vld [vmem:[%s4202_s6 + $0x120] sm:$0xff]   ;;  %v3392_v2 = vld [vmem:[%s4202_s6 + $0x128] sm:$0xff]  }
  0x62   : > { %v3393_v3 = vld [vmem:[%s4202_s6 + $0x130] sm:$0xff]   ;;  %v3394_v4 = vld [vmem:[%s4202_s6 + $0x138] sm:$0xff]   ;;  %v3395_v7 = vld [vmem:[%s4202_s6 + $0x140] sm:$0xff]  }
  0x63   : > { %v1366_v5 = vld [vmem:[%s656_s29] sm:$0x3]  ;;  %v2563_v6 = vld [vmem:[%s656_s29 + $0x4] sm:$0x3]  ;;  %v3396_v8 = vld [vmem:[%s4202_s6 + $0x148] sm:$0xff]   ;;  %s4226_s29 = sld [smem:[#allocation17_spill]] (!%p2669_p4) }
  0x64   : > { %2863 = vmatpush3.bf16.msra.mxu0 %v3357_v17  ;;  %2903 = vmatpush3.bf16.msra.mxu1 %v3357_v17  ;;  %v3397_v9 = vld [vmem:[%s4202_s6 + $0x150] sm:$0xff]   ;;  %v3398_v10 = vld [vmem:[%s4202_s6 + $0x158] sm:$0xff]   ;;  %v3399_v11 = vld [vmem:[%s4202_s6 + $0x160] sm:$0xff]  }
  0x65   : > { %2864 = vmatprep.subr.bf16.mxu0 %v3503_v13  ;;  %2904 = vmatprep.subr.bf16.mxu1 %v3503_v13  ;;  %v3403_v12 = vld [vmem:[%s3768_s19] ss:$0 sps:$4 sm:$0x77]   ;;  %v3404_v14 = vld [vmem:[%s3768_s19 + $0x4] ss:$0 sps:$4 sm:$0x77]  }
  0x66   : > { %v3400_v15 = vld [vmem:[%s4202_s6 + $0x168] sm:$0xff]   ;;  %v1523_v16 = vshll.u32 %v3403_v12, 16  ;;  %v1624_v17 = vshll.u32 %v3404_v14, 16  ;;  %v3415_v38 = vld [vmem:[%s4202_s6 + $0x1d0] sm:$0xff]   ;;  %v3416_v39 = vld [vmem:[%s4202_s6 + $0x1d8] sm:$0xff]   ;;  %s670_s19 = scalar_lea.vmem [#allocation7], %s3858_s10 }
  0x67   : > { %v3418_v41 = vld [vmem:[%s4202_s6 + $0x1e8] sm:$0xff]   ;;  %v3419_v42 = vld [vmem:[%s4202_s6 + $0x1f0] sm:$0xff]   ;;  %v3421_v46 = vld [vmem:[%s4202_s6 + $0x200] sm:$0xff]   ;;  %s4227_s10 = sld [smem:[#allocation18_spill]] (!%p2669_p4) }
  0x68   : > { %2865 = vmatpush3.bf16.msra.mxu0 %v3358_v18  ;;  %2905 = vmatpush3.bf16.msra.mxu1 %v3358_v18  ;;  %v3401_v18 = vld [vmem:[%s4202_s6 + $0x170] sm:$0xff]   ;;  %v3422_v47 = vld [vmem:[%s4202_s6 + $0x208] sm:$0xff]  }
  0x69   : > { %2866 = vmatprep.subr.bf16.mxu0 %v3503_v13  ;;  %2906 = vmatprep.subr.bf16.mxu1 %v3503_v13  ;;  %v1837_v44 = vld [vmem:[%s670_s19] sm:$0x3]  ;;  %v2640_v45 = vld [vmem:[%s670_s19 + $0x4] sm:$0x3]  ;;  %s4135_s19 = scalar_lea.vmem [#allocation8], %s2452_s13 }
  0x6c   : > { %2867 = vmatpush3.bf16.msra.mxu0 %v3359_v19  ;;  %2907 = vmatpush3.bf16.msra.mxu1 %v3359_v19  ;;  %v1521_v19 = vshrl.u32 %v3403_v12, 16 }
  0x6d   : > { %2868 = vmatprep.subr.bf16.mxu0 %v3503_v13  ;;  %2908 = vmatprep.subr.bf16.mxu1 %v3503_v13 }
  0x70   : > { %2869 = vmatpush3.bf16.msra.mxu0 %v3360_v20  ;;  %2909 = vmatpush3.bf16.msra.mxu1 %v3360_v20  ;;  %v1525_v20 = vrot.slane %v1523_v16, 1 }
  0x71   : > { %2874 = vmatprep.subr.bf16.mxu0 %v3503_v13  ;;  %2914 = vmatprep.subr.bf16.mxu1 %v3503_v13 }
  0x73   : > { %2871 = vmatmul.mubr.bf16.vlgmr.msra.gmra.mrb[0].mxu0 %v769_v21  ;;  %2911 = vmatmul.mubr.bf16.vlgmr.msra.gmra.mrb[0].mxu1 %v2486_v23  ;;  %v1622_v21 = vshrl.u32 %v3404_v14, 16  ;;  %v3402_v23 = vld [vmem:[%s4202_s6 + $0x178] sm:$0xff]  }
  0x74   : > { %2875 = vmatpush3.bf16.msra.mxu0 %v3363_v22  ;;  %2915 = vmatpush3.bf16.msra.mxu1 %v3363_v22  ;;  %v1626_v22 = vrot.slane %v1624_v17, 1 }
  0x75   : > { %2876 = vmatprep.subr.bf16.mxu0 %v3503_v13  ;;  %2916 = vmatprep.subr.bf16.mxu1 %v3503_v13 }
  0x76   : > { %2890 = vmatprep.mubr.msk.bf16.mxu0 %vm3504_vm0, %v3503_v13  ;;  %2930 = vmatprep.mubr.msk.bf16.mxu1 %vm3504_vm0, %v3503_v13 }
  0x78   : > { %2877 = vmatpush3.bf16.msra.mxu0 %v3364_v24  ;;  %2917 = vmatpush3.bf16.msra.mxu1 %v3364_v24  ;;  %v1526_v24 = vor.u32 %v1525_v20, %v1521_v19 }
  0x79   : > { %2878 = vmatprep.subr.bf16.mxu0 %v3503_v13  ;;  %2918 = vmatprep.subr.bf16.mxu1 %v3503_v13 }
  0x7c   : > { %2879 = vmatpush3.bf16.msra.mxu0 %v3365_v25  ;;  %2919 = vmatpush3.bf16.msra.mxu1 %v3365_v25  ;;  %v1627_v25 = vor.u32 %v1626_v22, %v1622_v21 }
  0x7d   : > { %2880 = vmatprep.subr.bf16.mxu0 %v3503_v13  ;;  %2920 = vmatprep.subr.bf16.mxu1 %v3503_v13 }
  0x80   : > { %2881 = vmatpush3.bf16.msra.mxu0 %v3366_v26  ;;  %2921 = vmatpush3.bf16.msra.mxu1 %v3366_v26  ;;  %v3405_v26 = vld [vmem:[%s4202_s6 + $0x180] sm:$0xff]  }
  0x81   : > { %2882 = vmatprep.subr.bf16.mxu0 %v3503_v13  ;;  %2922 = vmatprep.subr.bf16.mxu1 %v3503_v13 }
  0x84   : > { %2883 = vmatpush3.bf16.msra.mxu0 %v3367_v27  ;;  %2923 = vmatpush3.bf16.msra.mxu1 %v3367_v27  ;;  %v3406_v27 = vld [vmem:[%s4202_s6 + $0x188] sm:$0xff]  }
  0x85   : > { %2884 = vmatprep.subr.bf16.mxu0 %v3503_v13  ;;  %2924 = vmatprep.subr.bf16.mxu1 %v3503_v13 }
  0x88   : > { %2885 = vmatpush3.bf16.msra.mxu0 %v3368_v28  ;;  %2925 = vmatpush3.bf16.msra.mxu1 %v3368_v28  ;;  %v3407_v28 = vld [vmem:[%s4202_s6 + $0x190] sm:$0xff]  }
  0x89   : > { %2886 = vmatprep.subr.bf16.mxu0 %v3503_v13  ;;  %2926 = vmatprep.subr.bf16.mxu1 %v3503_v13 }
  0x8c   : > { %2887 = vmatpush3.bf16.msra.mxu0 %v3369_v29  ;;  %2927 = vmatpush3.bf16.msra.mxu1 %v3369_v29  ;;  %v3408_v29 = vld [vmem:[%s4202_s6 + $0x198] sm:$0xff]  }
  0x8d   : > { %2888 = vmatprep.subr.bf16.mxu0 %v3503_v13  ;;  %2928 = vmatprep.subr.bf16.mxu1 %v3503_v13 }
  0x90   : > { %2889 = vmatpush3.bf16.msra.mxu0 %v3370_v30  ;;  %2929 = vmatpush3.bf16.msra.mxu1 %v3370_v30  ;;  %v3409_v30 = vld [vmem:[%s4202_s6 + $0x1a0] sm:$0xff]  }
  0x91   : > { %2934 = vmatprep.subr.bf16.mxu0 %v3503_v13  ;;  %2954 = vmatprep.subr.bf16.mxu1 %v3503_v13 }
  0x93   : > { %2891 = vmatmul.mubr.bf16.vlgmr.msra.gmra.mrb[0].mxu0 %v749_v31  ;;  %2931 = vmatmul.mubr.bf16.vlgmr.msra.gmra.mrb[0].mxu1 %v2453_v32  ;;  %v3410_v31 = vld [vmem:[%s4202_s6 + $0x1a8] sm:$0xff]   ;;  %v3411_v32 = vld [vmem:[%s4202_s6 + $0x1b0] sm:$0xff]  }
  0x94   : > { %2935 = vmatpush3.bf16.msra.mxu0 %v3371_v33  ;;  %2955 = vmatpush3.bf16.msra.mxu1 %v3371_v33  ;;  %v3412_v33 = vld [vmem:[%s4202_s6 + $0x1b8] sm:$0xff]  }
  0x95   : > { %2936 = vmatprep.subr.bf16.mxu0 %v3503_v13  ;;  %2956 = vmatprep.subr.bf16.mxu1 %v3503_v13 }
  0x96   : > { %2950 = vmatprep.mubr.msk.bf16.mxu0 %vm3504_vm0, %v3503_v13  ;;  %2970 = vmatprep.mubr.msk.bf16.mxu1 %vm3504_vm0, %v3503_v13 }
  0x98   : > { %2937 = vmatpush3.bf16.msra.mxu0 %v3372_v34  ;;  %2957 = vmatpush3.bf16.msra.mxu1 %v3372_v34  ;;  %v1687_v34 = vld [vmem:[%s3861_s27] sm:$0x3] }
  0x99   : > { %2938 = vmatprep.subr.bf16.mxu0 %v3503_v13  ;;  %2958 = vmatprep.subr.bf16.mxu1 %v3503_v13 }
  0x9c   : > { %2939 = vmatpush3.bf16.msra.mxu0 %v3373_v35  ;;  %2959 = vmatpush3.bf16.msra.mxu1 %v3373_v35  ;;  %v2615_v35 = vld [vmem:[%s3861_s27 + $0x4] sm:$0x3] }
  0x9d   : > { %2940 = vmatprep.subr.bf16.mxu0 %v3503_v13  ;;  %2960 = vmatprep.subr.bf16.mxu1 %v3503_v13 }
  0xa0   : > { %2941 = vmatpush3.bf16.msra.mxu0 %v3374_v36  ;;  %2961 = vmatpush3.bf16.msra.mxu1 %v3374_v36  ;;  %v3413_v36 = vld [vmem:[%s4202_s6 + $0x1c0] sm:$0xff]  }
  0xa1   : > { %2942 = vmatprep.subr.bf16.mxu0 %v3503_v13  ;;  %2962 = vmatprep.subr.bf16.mxu1 %v3503_v13 }
  0xa4   : > { %2943 = vmatpush3.bf16.msra.mxu0 %v3375_v37  ;;  %2963 = vmatpush3.bf16.msra.mxu1 %v3375_v37  ;;  %v3414_v37 = vld [vmem:[%s4202_s6 + $0x1c8] sm:$0xff]  }
  0xa5   : > { %2944 = vmatprep.subr.bf16.mxu0 %v3503_v13  ;;  %2964 = vmatprep.subr.bf16.mxu1 %v3503_v13 }
  0xa8   : > { %2945 = vmatpush3.bf16.msra.mxu0 %v3376_v40  ;;  %2965 = vmatpush3.bf16.msra.mxu1 %v3376_v40  ;;  %v3417_v40 = vld [vmem:[%s4202_s6 + $0x1e0] sm:$0xff]  }
  0xa9   : > { %2946 = vmatprep.subr.bf16.mxu0 %v3503_v13  ;;  %2966 = vmatprep.subr.bf16.mxu1 %v3503_v13 }
  0xac   : > { %2947 = vmatpush3.bf16.msra.mxu0 %v3377_v43  ;;  %2967 = vmatpush3.bf16.msra.mxu1 %v3377_v43  ;;  %v3420_v43 = vld [vmem:[%s4202_s6 + $0x1f8] sm:$0xff]  }
  0xad   : > { %2948 = vmatprep.subr.bf16.mxu0 %v3503_v13  ;;  %2968 = vmatprep.subr.bf16.mxu1 %v3503_v13 }
  0xb0   : > { %2949 = vmatpush3.bf16.msra.mxu0 %v3378_v48  ;;  %2969 = vmatpush3.bf16.msra.mxu1 %v3378_v48  ;;  %v3423_v48 = vld [vmem:[%s4202_s6 + $0x210] sm:$0xff]  }
  0xb1   : > { %2974 = vmatprep.subr.bf16.mxu0 %v3503_v13  ;;  %2994 = vmatprep.subr.bf16.mxu1 %v3503_v13 }
  0xb3   : > { %2951 = vmatmul.mubr.bf16.vlgmr.msra.gmra.mrb[0].mxu0 %v1055_v49  ;;  %2971 = vmatmul.mubr.bf16.vlgmr.msra.gmra.mrb[0].mxu1 %v1156_v50  ;;  %v3424_v49 = vld [vmem:[%s4202_s6 + $0x218] sm:$0xff]   ;;  %v3425_v50 = vld [vmem:[%s4202_s6 + $0x220] sm:$0xff]  }
  0xb4   : > { %2975 = vmatpush3.bf16.msra.mxu0 %v3379_v51  ;;  %2995 = vmatpush3.bf16.msra.mxu1 %v3379_v51  ;;  %v3429_v51 = vld [vmem:[%s3861_s27] ss:$0 sps:$4 sm:$0x77]  }
  0xb5   : > { %2976 = vmatprep.subr.bf16.mxu0 %v3503_v13  ;;  %2996 = vmatprep.subr.bf16.mxu1 %v3503_v13 }
  0xb6   : > { %2990 = vmatprep.mubr.msk.bf16.mxu0 %vm3504_vm0, %v3503_v13  ;;  %3010 = vmatprep.mubr.msk.bf16.mxu1 %vm3504_vm0, %v3503_v13 }
  0xb8   : > { %2977 = vmatpush3.bf16.msra.mxu0 %v3380_v52  ;;  %2997 = vmatpush3.bf16.msra.mxu1 %v3380_v52  ;;  %v3430_v52 = vld [vmem:[%s3861_s27 + $0x4] ss:$0 sps:$4 sm:$0x77]  }
  0xb9   : > { %2978 = vmatprep.subr.bf16.mxu0 %v3503_v13  ;;  %2998 = vmatprep.subr.bf16.mxu1 %v3503_v13 }
  0xbc   : > { %2979 = vmatpush3.bf16.msra.mxu0 %v3381_v53  ;;  %2999 = vmatpush3.bf16.msra.mxu1 %v3381_v53  ;;  %v3426_v53 = vld [vmem:[%s4202_s6 + $0x228] sm:$0xff]  }
  0xbd   : > { %2980 = vmatprep.subr.bf16.mxu0 %v3503_v13  ;;  %3000 = vmatprep.subr.bf16.mxu1 %v3503_v13 }
  0xc0   : > { %2981 = vmatpush3.bf16.msra.mxu0 %v3382_v54  ;;  %3001 = vmatpush3.bf16.msra.mxu1 %v3382_v54  ;;  %v1994_v54 = vshll.u32 %v3429_v51, 16 }
  0xc1   : > { %2982 = vmatprep.subr.bf16.mxu0 %v3503_v13  ;;  %3002 = vmatprep.subr.bf16.mxu1 %v3503_v13 }
  0xc4   : > { %2983 = vmatpush3.bf16.msra.mxu0 %v3383_v55  ;;  %3003 = vmatpush3.bf16.msra.mxu1 %v3383_v55  ;;  %v2095_v55 = vshll.u32 %v3430_v52, 16 }
  0xc5   : > { %2984 = vmatprep.subr.bf16.mxu0 %v3503_v13  ;;  %3004 = vmatprep.subr.bf16.mxu1 %v3503_v13 }
  0xc8   : > { %2985 = vmatpush3.bf16.msra.mxu0 %v3384_v56  ;;  %3005 = vmatpush3.bf16.msra.mxu1 %v3384_v56  ;;  %v3427_v56 = vld [vmem:[%s4202_s6 + $0x230] sm:$0xff]  }
  0xc9   : > { %2986 = vmatprep.subr.bf16.mxu0 %v3503_v13  ;;  %3006 = vmatprep.subr.bf16.mxu1 %v3503_v13 }
  0xcc   : > { %2987 = vmatpush3.bf16.msra.mxu0 %v3385_v57  ;;  %3007 = vmatpush3.bf16.msra.mxu1 %v3385_v57  ;;  %v1992_v57 = vshrl.u32 %v3429_v51, 16 }
  0xcd   : > { %2988 = vmatprep.subr.bf16.mxu0 %v3503_v13  ;;  %3008 = vmatprep.subr.bf16.mxu1 %v3503_v13 }
  0xd0   : > { %2989 = vmatpush3.bf16.msra.mxu0 %v3386_v58  ;;  %3009 = vmatpush3.bf16.msra.mxu1 %v3386_v58  ;;  %v1996_v58 = vrot.slane %v1994_v54, 1 }
  0xd1   : > { %3014 = vmatprep.subr.bf16.mxu0 %v3503_v13  ;;  %3034 = vmatprep.subr.bf16.mxu1 %v3503_v13 }
  0xd3   : > { %2991 = vmatmul.mubr.bf16.vlgmr.msra.gmra.mrb[0].mxu0 %v1216_v59  ;;  %3011 = vmatmul.mubr.bf16.vlgmr.msra.gmra.mrb[0].mxu1 %v2538_v60  ;;  %v2093_v59 = vshrl.u32 %v3430_v52, 16  ;;  %v2097_v60 = vrot.slane %v2095_v55, 1 }
  0xd4   : > { %3015 = vmatpush3.bf16.msra.mxu0 %v3387_v61  ;;  %3035 = vmatpush3.bf16.msra.mxu1 %v3387_v61  ;;  %v3428_v61 = vld [vmem:[%s4202_s6 + $0x238] sm:$0xff]  }
  0xd5   : > { %3016 = vmatprep.subr.bf16.mxu0 %v3503_v13  ;;  %3036 = vmatprep.subr.bf16.mxu1 %v3503_v13 }
  0xd6   : > { %3030 = vmatprep.mubr.msk.bf16.mxu0 %vm3504_vm0, %v3503_v13  ;;  %3050 = vmatprep.mubr.msk.bf16.mxu1 %vm3504_vm0, %v3503_v13 }
  0xd8   : > { %3017 = vmatpush3.bf16.msra.mxu0 %v3388_v62  ;;  %3037 = vmatpush3.bf16.msra.mxu1 %v3388_v62  ;;  %v1997_v62 = vor.u32 %v1996_v58, %v1992_v57 }
  0xd9   : > { %3018 = vmatprep.subr.bf16.mxu0 %v3503_v13  ;;  %3038 = vmatprep.subr.bf16.mxu1 %v3503_v13 }
  0xdc   : > { %3019 = vmatpush3.bf16.msra.mxu0 %v3389_v63  ;;  %3039 = vmatpush3.bf16.msra.mxu1 %v3389_v63  ;;  %v2098_v63 = vor.u32 %v2097_v60, %v2093_v59 }
  0xdd   : > { %3020 = vmatprep.subr.bf16.mxu0 %v3503_v13  ;;  %3040 = vmatprep.subr.bf16.mxu1 %v3503_v13 }
  0xe0   : > { %3021 = vmatpush3.bf16.msra.mxu0 %v3390_v0  ;;  %3041 = vmatpush3.bf16.msra.mxu1 %v3390_v0 }
  0xe1   : > { %3022 = vmatprep.subr.bf16.mxu0 %v3503_v13  ;;  %3042 = vmatprep.subr.bf16.mxu1 %v3503_v13 }
  0xe4   : > { %3023 = vmatpush3.bf16.msra.mxu0 %v3391_v1  ;;  %3043 = vmatpush3.bf16.msra.mxu1 %v3391_v1 }
  0xe5   : > { %3024 = vmatprep.subr.bf16.mxu0 %v3503_v13  ;;  %3044 = vmatprep.subr.bf16.mxu1 %v3503_v13 }
  0xe8   : > { %3025 = vmatpush3.bf16.msra.mxu0 %v3392_v2  ;;  %3045 = vmatpush3.bf16.msra.mxu1 %v3392_v2 }
  0xe9   : > { %3026 = vmatprep.subr.bf16.mxu0 %v3503_v13  ;;  %3046 = vmatprep.subr.bf16.mxu1 %v3503_v13 }
  0xec   : > { %3027 = vmatpush3.bf16.msra.mxu0 %v3393_v3  ;;  %3047 = vmatpush3.bf16.msra.mxu1 %v3393_v3 }
  0xed   : > { %3028 = vmatprep.subr.bf16.mxu0 %v3503_v13  ;;  %3048 = vmatprep.subr.bf16.mxu1 %v3503_v13 }
  0xf0   : > { %3029 = vmatpush3.bf16.msra.mxu0 %v3394_v4  ;;  %3049 = vmatpush3.bf16.msra.mxu1 %v3394_v4 }
  0xf1   : > { %3054 = vmatprep.subr.bf16.mxu0 %v3503_v13  ;;  %3074 = vmatprep.subr.bf16.mxu1 %v3503_v13 }
  0xf3   : > { %3031 = vmatmul.mubr.bf16.vlgmr.msra.gmra.mrb[0].mxu0 %v1366_v5  ;;  %3051 = vmatmul.mubr.bf16.vlgmr.msra.gmra.mrb[0].mxu1 %v2563_v6 }
  0xf4   : > { %3055 = vmatpush3.bf16.msra.mxu0 %v3395_v7  ;;  %3075 = vmatpush3.bf16.msra.mxu1 %v3395_v7 }
  0xf5   : > { %3056 = vmatprep.subr.bf16.mxu0 %v3503_v13  ;;  %3076 = vmatprep.subr.bf16.mxu1 %v3503_v13 }
  0xf6   : > { %3070 = vmatprep.mubr.msk.bf16.mxu0 %vm3504_vm0, %v3503_v13  ;;  %3090 = vmatprep.mubr.msk.bf16.mxu1 %vm3504_vm0, %v3503_v13 }
  0xf8   : > { %3057 = vmatpush3.bf16.msra.mxu0 %v3396_v8  ;;  %3077 = vmatpush3.bf16.msra.mxu1 %v3396_v8 }
  0xf9   : > { %3058 = vmatprep.subr.bf16.mxu0 %v3503_v13  ;;  %3078 = vmatprep.subr.bf16.mxu1 %v3503_v13 }
  0xfc   : > { %3059 = vmatpush3.bf16.msra.mxu0 %v3397_v9  ;;  %3079 = vmatpush3.bf16.msra.mxu1 %v3397_v9 }
  0xfd   : > { %3060 = vmatprep.subr.bf16.mxu0 %v3503_v13  ;;  %3080 = vmatprep.subr.bf16.mxu1 %v3503_v13 }
 0x100   : > { %3061 = vmatpush3.bf16.msra.mxu0 %v3398_v10  ;;  %3081 = vmatpush3.bf16.msra.mxu1 %v3398_v10 }
 0x101   : > { %3062 = vmatprep.subr.bf16.mxu0 %v3503_v13  ;;  %3082 = vmatprep.subr.bf16.mxu1 %v3503_v13 }
 0x104   : > { %3063 = vmatpush3.bf16.msra.mxu0 %v3399_v11  ;;  %3083 = vmatpush3.bf16.msra.mxu1 %v3399_v11 }
 0x105   : > { %3064 = vmatprep.subr.bf16.mxu0 %v3503_v13  ;;  %3084 = vmatprep.subr.bf16.mxu1 %v3503_v13 }
 0x108   : > { %3065 = vmatpush3.bf16.msra.mxu0 %v3400_v15  ;;  %3085 = vmatpush3.bf16.msra.mxu1 %v3400_v15 }
 0x109   : > { %3066 = vmatprep.subr.bf16.mxu0 %v3503_v13  ;;  %3086 = vmatprep.subr.bf16.mxu1 %v3503_v13 }
 0x10c   : > { %3067 = vmatpush3.bf16.msra.mxu0 %v3401_v18  ;;  %3087 = vmatpush3.bf16.msra.mxu1 %v3401_v18 }
 0x10d   : > { %3068 = vmatprep.subr.bf16.mxu0 %v3503_v13  ;;  %3088 = vmatprep.subr.bf16.mxu1 %v3503_v13 }
 0x110   : > { %3069 = vmatpush3.bf16.msra.mxu0 %v3402_v23  ;;  %3089 = vmatpush3.bf16.msra.mxu1 %v3402_v23 }
 0x111   : > { %3094 = vmatprep.subr.bf16.mxu0 %v3503_v13  ;;  %3114 = vmatprep.subr.bf16.mxu1 %v3503_v13 }
 0x113   : > { %3071 = vmatmul.mubr.bf16.vlgmr.msra.gmra.mrb[0].mxu0 %v1526_v24  ;;  %3091 = vmatmul.mubr.bf16.vlgmr.msra.gmra.mrb[0].mxu1 %v1627_v25 }
 0x114   : > { %3095 = vmatpush3.bf16.msra.mxu0 %v3405_v26  ;;  %3115 = vmatpush3.bf16.msra.mxu1 %v3405_v26 }
 0x115   : > { %3096 = vmatprep.subr.bf16.mxu0 %v3503_v13  ;;  %3116 = vmatprep.subr.bf16.mxu1 %v3503_v13 }
 0x116   : > { %3110 = vmatprep.mubr.msk.bf16.mxu0 %vm3504_vm0, %v3503_v13  ;;  %3130 = vmatprep.mubr.msk.bf16.mxu1 %vm3504_vm0, %v3503_v13 }
 0x118   : > { %3097 = vmatpush3.bf16.msra.mxu0 %v3406_v27  ;;  %3117 = vmatpush3.bf16.msra.mxu1 %v3406_v27 }
 0x119   : > { %3098 = vmatprep.subr.bf16.mxu0 %v3503_v13  ;;  %3118 = vmatprep.subr.bf16.mxu1 %v3503_v13 }
 0x11c   : > { %3099 = vmatpush3.bf16.msra.mxu0 %v3407_v28  ;;  %3119 = vmatpush3.bf16.msra.mxu1 %v3407_v28 }
 0x11d   : > { %3100 = vmatprep.subr.bf16.mxu0 %v3503_v13  ;;  %3120 = vmatprep.subr.bf16.mxu1 %v3503_v13 }
 0x120   : > { %3101 = vmatpush3.bf16.msra.mxu0 %v3408_v29  ;;  %3121 = vmatpush3.bf16.msra.mxu1 %v3408_v29 }
 0x121   : > { %3102 = vmatprep.subr.bf16.mxu0 %v3503_v13  ;;  %3122 = vmatprep.subr.bf16.mxu1 %v3503_v13 }
 0x124   : > { %3103 = vmatpush3.bf16.msra.mxu0 %v3409_v30  ;;  %3123 = vmatpush3.bf16.msra.mxu1 %v3409_v30 }
 0x125   : > { %3104 = vmatprep.subr.bf16.mxu0 %v3503_v13  ;;  %3124 = vmatprep.subr.bf16.mxu1 %v3503_v13 }
 0x128   : > { %3105 = vmatpush3.bf16.msra.mxu0 %v3410_v31  ;;  %3125 = vmatpush3.bf16.msra.mxu1 %v3410_v31 }
 0x129   : > { %3106 = vmatprep.subr.bf16.mxu0 %v3503_v13  ;;  %3126 = vmatprep.subr.bf16.mxu1 %v3503_v13 }
 0x12c   : > { %3107 = vmatpush3.bf16.msra.mxu0 %v3411_v32  ;;  %3127 = vmatpush3.bf16.msra.mxu1 %v3411_v32 }
 0x12d   : > { %3108 = vmatprep.subr.bf16.mxu0 %v3503_v13  ;;  %3128 = vmatprep.subr.bf16.mxu1 %v3503_v13 }
 0x130   : > { %3109 = vmatpush3.bf16.msra.mxu0 %v3412_v33  ;;  %3129 = vmatpush3.bf16.msra.mxu1 %v3412_v33 }
 0x131   : > { %3134 = vmatprep.subr.bf16.mxu0 %v3503_v13  ;;  %3154 = vmatprep.subr.bf16.mxu1 %v3503_v13 }
 0x133   : > { %3111 = vmatmul.mubr.bf16.vlgmr.msra.gmra.mrb[0].mxu0 %v1687_v34  ;;  %3131 = vmatmul.mubr.bf16.vlgmr.msra.gmra.mrb[0].mxu1 %v2615_v35 }
 0x134   : > { %3135 = vmatpush3.bf16.msra.mxu0 %v3413_v36  ;;  %3155 = vmatpush3.bf16.msra.mxu1 %v3413_v36 }
 0x135   : > { %3136 = vmatprep.subr.bf16.mxu0 %v3503_v13  ;;  %3156 = vmatprep.subr.bf16.mxu1 %v3503_v13 }
 0x136   : > { %3150 = vmatprep.mubr.msk.bf16.mxu0 %vm3504_vm0, %v3503_v13  ;;  %3170 = vmatprep.mubr.msk.bf16.mxu1 %vm3504_vm0, %v3503_v13 }
 0x138   : > { %3137 = vmatpush3.bf16.msra.mxu0 %v3414_v37  ;;  %3157 = vmatpush3.bf16.msra.mxu1 %v3414_v37 }
 0x139   : > { %3138 = vmatprep.subr.bf16.mxu0 %v3503_v13  ;;  %3158 = vmatprep.subr.bf16.mxu1 %v3503_v13 }
 0x13c   : > { %3139 = vmatpush3.bf16.msra.mxu0 %v3415_v38  ;;  %3159 = vmatpush3.bf16.msra.mxu1 %v3415_v38 }
 0x13d   : > { %3140 = vmatprep.subr.bf16.mxu0 %v3503_v13  ;;  %3160 = vmatprep.subr.bf16.mxu1 %v3503_v13 }
 0x140   : > { %3141 = vmatpush3.bf16.msra.mxu0 %v3416_v39  ;;  %3161 = vmatpush3.bf16.msra.mxu1 %v3416_v39 }
 0x141   : > { %3142 = vmatprep.subr.bf16.mxu0 %v3503_v13  ;;  %3162 = vmatprep.subr.bf16.mxu1 %v3503_v13 }
 0x144   : > { %3143 = vmatpush3.bf16.msra.mxu0 %v3417_v40  ;;  %3163 = vmatpush3.bf16.msra.mxu1 %v3417_v40 }
 0x145   : > { %3144 = vmatprep.subr.bf16.mxu0 %v3503_v13  ;;  %3164 = vmatprep.subr.bf16.mxu1 %v3503_v13 }
 0x148   : > { %3145 = vmatpush3.bf16.msra.mxu0 %v3418_v41  ;;  %3165 = vmatpush3.bf16.msra.mxu1 %v3418_v41 }
 0x149   : > { %3146 = vmatprep.subr.bf16.mxu0 %v3503_v13  ;;  %3166 = vmatprep.subr.bf16.mxu1 %v3503_v13 }
 0x14c   : > { %3147 = vmatpush3.bf16.msra.mxu0 %v3419_v42  ;;  %3167 = vmatpush3.bf16.msra.mxu1 %v3419_v42  ;;  %v3505_v42 = vmov (!%p2669_p4), 0.0  }
 0x14d   : > { %3148 = vmatprep.subr.bf16.mxu0 %v3503_v13  ;;  %3168 = vmatprep.subr.bf16.mxu1 %v3503_v13  ;;  %2185 = vst [vmem:[%s4226_s29] sm:$0x1] (!%p2669_p4), %v3505_v42  ;;  %2186 = vst [vmem:[%s4227_s10] sm:$0x1] (!%p2669_p4), %v3505_v42 }
 0x150   : > { %3149 = vmatpush3.bf16.msra.mxu0 %v3420_v43  ;;  %3169 = vmatpush3.bf16.msra.mxu1 %v3420_v43 }
 0x151   : > { %3174 = vmatprep.subr.bf16.mxu0 %v3503_v13  ;;  %3194 = vmatprep.subr.bf16.mxu1 %v3503_v13 }
 0x153   : > { %3151 = vmatmul.mubr.bf16.vlgmr.msra.gmra.mrb[0].mxu0 %v1837_v44  ;;  %3171 = vmatmul.mubr.bf16.vlgmr.msra.gmra.mrb[0].mxu1 %v2640_v45 }
 0x154   : > { %3175 = vmatpush3.bf16.msra.mxu0 %v3421_v46  ;;  %3195 = vmatpush3.bf16.msra.mxu1 %v3421_v46 }
 0x155   : > { %3176 = vmatprep.subr.bf16.mxu0 %v3503_v13  ;;  %3196 = vmatprep.subr.bf16.mxu1 %v3503_v13 }
 0x156   : > { %3190 = vmatprep.mubr.msk.bf16.mxu0 %vm3504_vm0, %v3503_v13  ;;  %3210 = vmatprep.mubr.msk.bf16.mxu1 %vm3504_vm0, %v3503_v13 }
 0x158   : > { %3177 = vmatpush3.bf16.msra.mxu0 %v3422_v47  ;;  %3197 = vmatpush3.bf16.msra.mxu1 %v3422_v47 }
 0x159   : > { %3178 = vmatprep.subr.bf16.mxu0 %v3503_v13  ;;  %3198 = vmatprep.subr.bf16.mxu1 %v3503_v13 }
 0x15c   : > { %3179 = vmatpush3.bf16.msra.mxu0 %v3423_v48  ;;  %3199 = vmatpush3.bf16.msra.mxu1 %v3423_v48 }
 0x15d   : > { %3180 = vmatprep.subr.bf16.mxu0 %v3503_v13  ;;  %3200 = vmatprep.subr.bf16.mxu1 %v3503_v13 }
 0x160   : > { %3181 = vmatpush3.bf16.msra.mxu0 %v3424_v49  ;;  %3201 = vmatpush3.bf16.msra.mxu1 %v3424_v49 }
 0x161   : > { %3182 = vmatprep.subr.bf16.mxu0 %v3503_v13  ;;  %3202 = vmatprep.subr.bf16.mxu1 %v3503_v13 }
 0x164   : > { %3183 = vmatpush3.bf16.msra.mxu0 %v3425_v50  ;;  %3203 = vmatpush3.bf16.msra.mxu1 %v3425_v50 }
 0x165   : > { %3184 = vmatprep.subr.bf16.mxu0 %v3503_v13  ;;  %3204 = vmatprep.subr.bf16.mxu1 %v3503_v13 }
 0x168   : > { %3185 = vmatpush3.bf16.msra.mxu0 %v3426_v53  ;;  %3205 = vmatpush3.bf16.msra.mxu1 %v3426_v53 }
 0x169   : > { %3186 = vmatprep.subr.bf16.mxu0 %v3503_v13  ;;  %3206 = vmatprep.subr.bf16.mxu1 %v3503_v13 }
 0x16c   : > { %3187 = vmatpush3.bf16.msra.mxu0 %v3427_v56  ;;  %3207 = vmatpush3.bf16.msra.mxu1 %v3427_v56 }
 0x16d   : > { %3188 = vmatprep.subr.bf16.mxu0 %v3503_v13  ;;  %3208 = vmatprep.subr.bf16.mxu1 %v3503_v13 }
 0x170   : > { %3189 = vmatpush3.bf16.msra.mxu0 %v3428_v61  ;;  %3209 = vmatpush3.bf16.msra.mxu1 %v3428_v61 }
 0x173   : > { %3191 = vmatmul.mubr.bf16.vlgmr.msra.gmra.mrb[0].mxu0 %v1997_v62  ;;  %3211 = vmatmul.mubr.bf16.vlgmr.msra.gmra.mrb[0].mxu1 %v2098_v63 }
 0x246   : > { %v2081_v0 = vpop.f32.mrb[0].mxu0  ;;  %v2134_v1 = vpop.f32.mrb[0].mxu1 }
 0x247   : > { %v2141_v2 = vpack.c.bf16 %v2081_v0, %v2081_v0  ;;  %v2144_v3 = vsel %vm2143_vm1, %v2081_v0, 0.0  ;;  %v2152_v4 = vmul.f32 %v2081_v0, %v2081_v0  ;;  %v2161_v5 = vpack.c.bf16 %v2134_v1, %v2134_v1  ;;  %v3192_v6 = vpop.f32.mrb[1].mxu0  ;;  %v3212_v7 = vpop.f32.mrb[1].mxu1 }
 0x248   : > { %v2145_v8 = vrot.slane %v2144_v3, 4  ;;  %v2164_v13 = vsel %vm2143_vm1, %v2134_v1, 0.0  ;;  %v2172_v9 = vmul.f32 %v2134_v1, %v2134_v1  ;;  %v2084_v10 = vpop.f32.mrb[2].mxu0  ;;  %v2137_v11 = vpop.f32.mrb[2].mxu1 }
 0x249   : > { %2142 = vst [vmem:[%s4135_s19] sm:$0x3] %v2141_v2  ;;  %v2153_v12 = vsel %vm2143_vm1, %v2152_v4, 0.0  ;;  %2668 = vst [vmem:[%s4135_s19 + $0x2] sm:$0x3] %v2161_v5  ;;  %v2165_v14 = vrot.slane %v2164_v13, 4  ;;  %v3193_v15 = vpop.f32.mrb[3].mxu0 }
 0x24a   : > { %v3213_v16 = vpop.f32.mrb[3].mxu1  ;;  %v2146_v17 = vadd.f32 %v2145_v8, %v2144_v3  ;;  %v2154_v18 = vrot.slane %v2153_v12, 4  ;;  %v2173_v19 = vsel %vm2143_vm1, %v2172_v9, 0.0 }
 0x24b   : > { %v2166_v20 = vadd.f32 %v2165_v14, %v2164_v13  ;;  %v2174_v21 = vrot.slane %v2173_v19, 4 }
 0x24c   : > { %v2147_v22 = vrot.slane %v2146_v17, 2  ;;  %v2155_v23 = vadd.f32 %v2154_v18, %v2153_v12 }
 0x24d   : > { %v2167_v24 = vrot.slane %v2166_v20, 2  ;;  %v2175_v25 = vadd.f32 %v2174_v21, %v2173_v19 }
 0x24e   : > { %v2148_v26 = vadd.f32 %v2147_v22, %v2146_v17  ;;  %v2156_v27 = vrot.slane %v2155_v23, 2 }
 0x24f   : > { %v2168_v28 = vadd.f32 %v2167_v24, %v2166_v20  ;;  %v2176_v29 = vrot.slane %v2175_v25, 2 }
 0x250   : > { %v2149_v30 = vrot.slane %v2148_v26, 1  ;;  %v2157_v31 = vadd.f32 %v2156_v27, %v2155_v23 }
 0x251   : > { %v2169_v32 = vrot.slane %v2168_v28, 1  ;;  %v2177_v33 = vadd.f32 %v2176_v29, %v2175_v25  ;;  %2184 = sbr.rel (%p2669_p4) target bundleno = 600 (0x258), region = 298 }
 0x252   : > { %v2150_v34 = vadd.f32 %v2149_v30, %v2148_v26  ;;  %v2158_v35 = vrot.slane %v2157_v31, 1 }
 0x253   : > { %v2170_v36 = vadd.f32 %v2169_v32, %v2168_v28  ;;  %v2178_v37 = vrot.slane %v2177_v33, 1 }
 0x254   : > { %v2159_v38 = vadd.f32 %v2158_v35, %v2157_v31 }
 0x255   : > { %v2171_v39 = vadd.f32 %v2170_v36, %v2150_v34  ;;  %v2179_v40 = vadd.f32 %v2178_v37, %v2177_v33 }
 0x257   : > { %v2180_v41 = vadd.f32 %v2179_v40, %v2159_v38 }
 0x258 PF: > { %s4228_s26 = sld [smem:[#allocation17_spill]]  ;;  %s4229_s9 = sld [smem:[#allocation18_spill]]  ;;  %v2217_v47 = vld [vmem:[%s4135_s19] sm:$0x3] (%p3654_p13)  ;;  %v2219_v48 = vld [vmem:[%s4135_s19 + $0x2] sm:$0x3] (%p3654_p13) }
 0x259   : > { %s2671_s23 = sshll.u32 (%p3654_p13), %s3602_s18, 1  ;;  %s4231_s21 = sld [smem:[#allocation16_spill]] (%p3654_p13) }
 0x25c   : > { %2199 = sbr.rel (!%p3654_p13) target bundleno = 611 (0x263), region = 302 }
 0x25e   : > { %v2187_v43 = vld [vmem:[%s4228_s26] sm:$0x1] }
 0x25f   : > { %v2190_v44 = vld [vmem:[%s4229_s9] sm:$0x1]  ;;  %v2188_v45 = vadd.f32 %v2187_v43, %v2171_v39  ;;  %s2201_s29 = scalar_lea.vmem (%p3654_p13), %s4231_s21, %s2671_s23 }
 0x260   : > { %v2191_v46 = vadd.f32 %v2190_v44, %v2180_v41  ;;  %2218 = vst [vmem:[%s2201_s29] sm:$0x3] (%p3654_p13), %v2217_v47  ;;  %2220 = vst [vmem:[%s2201_s29 + $0x8] sm:$0x3] (%p3654_p13), %v2219_v48 }
 0x261   : > { %2189 = vst [vmem:[%s4228_s26] sm:$0x1] %v2188_v45 }
 0x262   : > { %2192 = vst [vmem:[%s4229_s9] sm:$0x1] %v2191_v46 }
 0x263 PF: > { %s4232_s17 = sld [smem:[#allocation10_spill]]  ;;  %s4233_s30 = sld [smem:[#allocation9_spill]] }
 0x264   : > { %s4234_s10 = sld [smem:[#allocation14_spill]]  ;;  %s4235_s24 = sld [smem:[#allocation13_spill]] }
 0x265   : > { %s4236_s8 = sld [smem:[#allocation12_spill]]  ;;  %s4237_s22 = sld [smem:[#allocation11_spill]] }
 0x266   : > { %s4238_s11 = smov %s3481_s12  ;;  %s4240_s13 = smov %s3489_s14 }
 0x267   : > { %s4242_s15 = smov %s3497_s16 }
 0x269   : > { %p17_p5 = scmp.ge.s32.totalorder %s4232_s17, 6  }
 0x26a   : > { %s4239_s12 = smov %s4235_s24 }
 0x26b   : > { %s4241_s14 = smov %s4236_s8  ;;  %s4243_s16 = smov %s4237_s22 }
 0x26c   :  { %19 = sbr.rel (!%p17_p5) target bundleno = 9 (0x9), region = 438 }

// kernel: xception_forward.14
= control target key start
LH: loop header
LB: loop body
LE: loop exit
PB: predicated region body
PF: predicated region fallthrough
CT: control target
= control target key end

     0   :  { %s4375_s0 = inlined_call_operand.vmem [shape: bf16[2,6,3,128], index: 0, kind: input, shape index: {}, may-alias: {0,2,4}]   ;;  %s4376_s1 = inlined_call_operand.vmem [shape: bf16[2,6,3,128], index: 1, kind: input, shape index: {}, may-alias: {1,3,5}]   ;;  %s4377_s2 = inlined_call_operand.vmem [shape: bf16[2,6,3,128], index: 2, kind: input, shape index: {}, may-alias: {0,2,4}]   ;;  %s4378_s3 = inlined_call_operand.vmem [shape: bf16[2,6,3,128], index: 3, kind: input, shape index: {}, may-alias: {1,3,5}]   ;;  %s4379_s4 = inlined_call_operand.vmem [shape: bf16[2,6,3,128], index: 4, kind: input, shape index: {}, may-alias: {0,2,4}]   ;;  %s4380_s5 = inlined_call_operand.vmem [shape: bf16[2,6,3,128], index: 5, kind: input, shape index: {}, may-alias: {1,3,5}]   ;;  %s4381_s6 = inlined_call_operand.vmem [shape: bf16[9,128,256], index: 6, kind: input, shape index: {}]   ;;  %s4382_s7 = inlined_call_operand.vmem [shape: bf16[2,2,2,256], index: 7, kind: output, shape index: {0}]   ;;  %s4383_s8 = inlined_call_operand.vmem [shape: f32[1,256], index: 8, kind: output, shape index: {1}]   ;;  %s4384_s9 = inlined_call_operand.vmem [shape: f32[1,256], index: 9, kind: output, shape index: {2}]  }
   0x1   :  { %4391 = sst [smem:[#allocation16_spill]] %s4382_s7 }
   0x2   :  { %4392 = sst [smem:[#allocation17_spill]] %s4383_s8 }
   0x3   :  { %4393 = sst [smem:[#allocation18_spill]] %s4384_s9 }
   0x4   :  { %s3666_s30 = smov 0   ;;  %s3668_s10 = smov 0  }
   0x5   :  { %s3670_s11 = smov 0   ;;  %s3672_s12 = smov 0  }
   0x6   :  { %s3674_s13 = smov 0   ;;  %s3676_s14 = smov 0  }
   0x7   :  { %s3678_s15 = smov 0   ;;  %s3680_s16 = smov 0  }
   0x8   :  { %s3682_s17 = smov 0  }
   0x9 LB: > { %4394 = sst [smem:[#allocation9_spill]] %s3583_s10  ;;  %s3712_s18 = sadd.s32 4294967295, %s3611_s17   ;;  %s3611_s17 = sphi %s3682_s17, %s4411_s17   ;;  %s3607_s16 = sphi %s3680_s16, %s4422_s16   ;;  %s3603_s15 = sphi %s3678_s15, %s4421_s15   ;;  %s3599_s14 = sphi %s3676_s14, %s4420_s14   ;;  %s3595_s13 = sphi %s3674_s13, %s4419_s13   ;;  %s3591_s12 = sphi %s3672_s12, %s4418_s12   ;;  %s3587_s11 = sphi %s3670_s11, %s4417_s11   ;;  %s3583_s10 = sphi %s3668_s10, %s4413_s10   ;;  %s3579_s30 = sphi %s3666_s30, %s4412_s30  }
   0xa   : > { %s3715_s19 = sadd.s32 1, %s3611_s17   ;;  %s2823_s20 = sshll.u32 %s3611_s17, 1 }
   0xb   : > { %4395 = sst [smem:[#allocation10_spill]] %s3715_s19  ;;  %s29_s21 = sadd.s32 1, %s3607_s16 }
   0xc   : > { %s3168_s22 = sadd.s32 2, %s2823_s20  ;;  %p36_p0 = scmp.ne.s32.totalorder %s3607_s16, %s3603_s15 }
   0xd   : > { %s26_s23 = ssub.s32 %s2823_s20, %s3168_s22  ;;  %p37_p1 = scmp.eq.s32.totalorder %s3611_s17, 0 }
   0xe   : > { %p27_p2 = scmp.eq.s32.totalorder %s26_s23, 0  ;;  %s81_s24 = sadd.s32 1, %s2823_s20 }
   0xf   : > { %p3724_p3 = por %p37_p1, %p36_p0  ;;  %s83_s26 = sadd.s32 1, %s3168_s22 }
  0x10   : > { %s3729_s27 = scalar_select %p27_p2, %s3607_s16, %s29_s21  }
  0x11   : > { %s84_s28 = ssub.s32 %s81_s24, %s83_s26  ;;  %s87_s29 = sadd.s32 1, %s3599_s14 }
  0x12   : > { %4397 = sst [smem:[#allocation11_spill]] %s3729_s27  ;;  %p85_p4 = scmp.eq.s32.totalorder %s84_s28, 0 }
  0x13   : > { %p94_p5 = scmp.ne.s32.totalorder %s3599_s14, %s3595_s13  ;;  %s143_s20 = sadd.s32 2, %s3168_s22 }
  0x14   : > { %s147_s23 = sadd.s32 1, %s3591_s12  ;;  %s144_s8 = ssub.s32 %s3168_s22, %s143_s20 }
  0x15   : > { %s3736_s7 = scalar_select %p85_p4, %s3599_s14, %s87_s29  }
  0x16   : > { %p3740_p6 = por %p94_p5, %p37_p1  ;;  %p145_p7 = scmp.eq.s32.totalorder %s144_s8, 0 }
  0x17   : > { %4398 = sst [smem:[#allocation12_spill]] %s3736_s7  ;;  %p154_p8 = scmp.ne.s32.totalorder %s3591_s12, %s3587_s11 }
  0x18   : > { %s221_s21 = ssub.s32 %s3611_s17, %s3715_s19  ;;  %s224_s24 = sadd.s32 1, %s3583_s10 }
  0x19   : > { %s3750_s26 = scalar_select %p145_p7, %s3591_s12, %s147_s23  }
  0x1a   : > { %p3754_p9 = por %p154_p8, %p37_p1  ;;  %p222_p10 = scmp.eq.s32.totalorder %s221_s21, 0 }
  0x1b   : > { %4400 = sst [smem:[#allocation13_spill]] %s3750_s26  ;;  %p234_p11 = scmp.ne.s32.totalorder %s3583_s10, %s3579_s30 }
  0x1c   : > { %p235_p12 = scmp.eq.s32.totalorder %s3712_s18, 1  ;;  %p2836_p0 = scmp.ge.s32.totalorder %s3611_s17, 2 }
  0x1d   : > { %s3762_s29 = scalar_select %p222_p10, %s3583_s10, %s224_s24  }
  0x1e   : > { %p3764_p13 = por %p235_p12, %p234_p11  ;;  %302 = sbr.rel (%p2836_p0) target bundleno = 79 (0x4f), region = 20 }
  0x1f   : > { %4402 = sst [smem:[#allocation14_spill]] %s3762_s29 }
  0x20   : > { %s4403_s27 = scalar_select %p3764_p13, 1, 0 }
  0x22   : > { %4404 = sst [smem:[#allocation15_spill]] %s4403_s27 }
  0x25   : > { %305 = sbr.rel (!%p3724_p3) target bundleno = 44 (0x2c), region = 24  ;;  %s307_s8 = sand.u32 (%p3724_p3), 1, %s3607_s16  }
  0x26   : > { %s3179_s22 = sshll.u32 (%p3724_p3), %s3611_s17, 2  ;;  %s2837_s20 = sshll.u32 (%p3724_p3), %s307_s8, 2 }
  0x27   : > { %s312_s24 = scalar_lea.vmem (%p3724_p3), %s4375_s0, %s3179_s22  ;;  %s309_s7 = scalar_lea.vmem (%p3724_p3), [#allocation2], %s2837_s20 }
  0x28   : > { %v328_v0 = vld [vmem:[%s312_s24] sm:$0x3] (%p3724_p3)  ;;  %v330_v1 = vld [vmem:[%s312_s24 + $0xc] sm:$0x3] (%p3724_p3) }
  0x29   : > { %329 = vst [vmem:[%s309_s7] sm:$0x3] (%p3724_p3), %v328_v0  ;;  %331 = vst [vmem:[%s309_s7 + $0x2] sm:$0x3] (%p3724_p3), %v330_v1 }
  0x2c PF: > { %350 = sbr.rel (!%p3724_p3) target bundleno = 51 (0x33), region = 58  ;;  %s352_s26 = sand.u32 (%p3724_p3), 1, %s3607_s16  }
  0x2d   : > { %s3180_s29 = sshll.u32 (%p3724_p3), %s3611_s17, 2  ;;  %s2840_s10 = sshll.u32 (%p3724_p3), %s352_s26, 2 }
  0x2e   : > { %s357_s27 = scalar_lea.vmem (%p3724_p3), %s4376_s1, %s3180_s29  ;;  %s354_s22 = scalar_lea.vmem (%p3724_p3), [#allocation3], %s2840_s10 }
  0x2f   : > { %v373_v2 = vld [vmem:[%s357_s27] sm:$0x3] (%p3724_p3)  ;;  %v375_v3 = vld [vmem:[%s357_s27 + $0xc] sm:$0x3] (%p3724_p3) }
  0x30   : > { %374 = vst [vmem:[%s354_s22] sm:$0x3] (%p3724_p3), %v373_v2  ;;  %376 = vst [vmem:[%s354_s22 + $0x2] sm:$0x3] (%p3724_p3), %v375_v3 }
  0x33 PF: > { %395 = sbr.rel (!%p3740_p6) target bundleno = 58 (0x3a), region = 92  ;;  %s397_s7 = sand.u32 (%p3740_p6), 1, %s3599_s14  }
  0x34   : > { %s3181_s25 = sshll.u32 (%p3740_p6), %s3611_s17, 2  ;;  %s2843_s20 = sshll.u32 (%p3740_p6), %s397_s7, 2 }
  0x35   : > { %s2691_s21 = scalar_lea.vmem (%p3740_p6), %s4377_s2, %s3181_s25  ;;  %s399_s19 = scalar_lea.vmem (%p3740_p6), [#allocation4], %s2843_s20 }
  0x36   : > { %v2846_v4 = vld [vmem:[%s2691_s21 + $0x2] sm:$0x3] (%p3740_p6)  ;;  %v2847_v5 = vld [vmem:[%s2691_s21 + $0xe] sm:$0x3] (%p3740_p6) }
  0x37   : > { %420 = vst [vmem:[%s399_s19] sm:$0x3] (%p3740_p6), %v2846_v4  ;;  %422 = vst [vmem:[%s399_s19 + $0x2] sm:$0x3] (%p3740_p6), %v2847_v5 }
  0x3a PF: > { %441 = sbr.rel (!%p3740_p6) target bundleno = 65 (0x41), region = 126  ;;  %s443_s10 = sand.u32 (%p3740_p6), 1, %s3599_s14  }
  0x3b   : > { %s3182_s27 = sshll.u32 (%p3740_p6), %s3611_s17, 2  ;;  %s2848_s29 = sshll.u32 (%p3740_p6), %s443_s10, 2 }
  0x3c   : > { %s2697_s22 = scalar_lea.vmem (%p3740_p6), %s4378_s3, %s3182_s27  ;;  %s445_s7 = scalar_lea.vmem (%p3740_p6), [#allocation5], %s2848_s29 }
  0x3d   : > { %v2851_v6 = vld [vmem:[%s2697_s22 + $0x2] sm:$0x3] (%p3740_p6)  ;;  %v2852_v7 = vld [vmem:[%s2697_s22 + $0xe] sm:$0x3] (%p3740_p6) }
  0x3e   : > { %466 = vst [vmem:[%s445_s7] sm:$0x3] (%p3740_p6), %v2851_v6  ;;  %468 = vst [vmem:[%s445_s7 + $0x2] sm:$0x3] (%p3740_p6), %v2852_v7 }
  0x41 PF: > { %487 = sbr.rel (!%p3754_p9) target bundleno = 72 (0x48), region = 160  ;;  %s489_s9 = sand.u32 (%p3754_p9), 1, %s3591_s12  }
  0x42   : > { %s3183_s25 = sshll.u32 (%p3754_p9), %s3611_s17, 2  ;;  %s2853_s20 = sshll.u32 (%p3754_p9), %s489_s9, 2 }
  0x43   : > { %s2703_s21 = scalar_lea.vmem (%p3754_p9), %s4379_s4, %s3183_s25  ;;  %s491_s19 = scalar_lea.vmem (%p3754_p9), [#allocation6], %s2853_s20 }
  0x44   : > { %v2856_v8 = vld [vmem:[%s2703_s21 + $0x4] sm:$0x3] (%p3754_p9)  ;;  %v2857_v9 = vld [vmem:[%s2703_s21 + $0x10] sm:$0x3] (%p3754_p9) }
  0x45   : > { %512 = vst [vmem:[%s491_s19] sm:$0x3] (%p3754_p9), %v2856_v8  ;;  %514 = vst [vmem:[%s491_s19 + $0x2] sm:$0x3] (%p3754_p9), %v2857_v9 }
  0x48 PF: > { %533 = sbr.rel (!%p3754_p9) target bundleno = 79 (0x4f), region = 194  ;;  %s535_s10 = sand.u32 (%p3754_p9), 1, %s3591_s12  }
  0x49   : > { %s3184_s27 = sshll.u32 (%p3754_p9), %s3611_s17, 2  ;;  %s2858_s29 = sshll.u32 (%p3754_p9), %s535_s10, 2 }
  0x4a   : > { %s2709_s22 = scalar_lea.vmem (%p3754_p9), %s4380_s5, %s3184_s27  ;;  %s537_s7 = scalar_lea.vmem (%p3754_p9), [#allocation7], %s2858_s29 }
  0x4b   : > { %v2861_v10 = vld [vmem:[%s2709_s22 + $0x4] sm:$0x3] (%p3754_p9)  ;;  %v2862_v11 = vld [vmem:[%s2709_s22 + $0x10] sm:$0x3] (%p3754_p9) }
  0x4c   : > { %558 = vst [vmem:[%s537_s7] sm:$0x3] (%p3754_p9), %v2861_v10  ;;  %560 = vst [vmem:[%s537_s7 + $0x2] sm:$0x3] (%p3754_p9), %v2862_v11 }
  0x4f PF: > { %p2863_p1 = scmp.ge.s32.totalorder %s3611_s17, 1  ;;  %p578_p2 = scmp.lt.s32.totalorder %s3611_s17, 3 }
  0x51   : > { %p579_p3 = pnand %p2863_p1, %p578_p2 }
  0x52   : > { %v3325_v12 = vld [vmem:[%s4381_s6 + $0x84] ss:$8 sps:$4 sm:$0xff] (!%p579_p3)   ;;  %v3327_v13 = vld [vmem:[%s4381_s6 + $0x80] ss:$8 sps:$4 sm:$0xff] (!%p579_p3)   ;;  %v3613_v14 = vmov (!%p579_p3), 0   ;;  %s585_s27 = sand.u32 (!%p579_p3), 1, %s3603_s15  }
  0x53   : > { %582 = sbr.rel (%p579_p3) target bundleno = 620 (0x26c), region = 228  ;;  %834 = vmatprep.mubr.bf16.mxu0 (!%p579_p3), %v3613_v14  ;;  %998 = vmatprep.mubr.bf16.mxu1 (!%p579_p3), %v3613_v14  ;;  %v3328_v15 = vld [vmem:[%s4381_s6 + $0x94] ss:$8 sps:$4 sm:$0xff] (!%p579_p3)   ;;  %v3330_v16 = vld [vmem:[%s4381_s6 + $0x90] ss:$8 sps:$4 sm:$0xff] (!%p579_p3)   ;;  %s3861_s7 = sshll.u32 (!%p579_p3), %s585_s27, 2 }
  0x54   : > { %802 = vmatprep.subr.bf16.mxu0 (!%p579_p3), %v3325_v12  ;;  %966 = vmatprep.subr.bf16.mxu1 (!%p579_p3), %v3325_v12  ;;  %v3331_v17 = vld [vmem:[%s4381_s6 + $0xa4] ss:$8 sps:$4 sm:$0xff] (!%p579_p3)   ;;  %v3333_v18 = vld [vmem:[%s4381_s6 + $0xa0] ss:$8 sps:$4 sm:$0xff] (!%p579_p3)   ;;  %v3334_v19 = vld [vmem:[%s4381_s6 + $0xb4] ss:$8 sps:$4 sm:$0xff] (!%p579_p3)  }
  0x55   : > { %803 = vmatpush1.bf16.msra.mxu0 (!%p579_p3), %v3327_v13  ;;  %967 = vmatpush1.bf16.msra.mxu1 (!%p579_p3), %v3327_v13  ;;  %v3336_v20 = vld [vmem:[%s4381_s6 + $0xb0] ss:$8 sps:$4 sm:$0xff] (!%p579_p3)   ;;  %v3337_v21 = vld [vmem:[%s4381_s6 + $0xc4] ss:$8 sps:$4 sm:$0xff] (!%p579_p3)   ;;  %v3339_v22 = vld [vmem:[%s4381_s6 + $0xc0] ss:$8 sps:$4 sm:$0xff] (!%p579_p3)  }
  0x56   : > { %804 = vmatprep.subr.bf16.mxu0 (!%p579_p3), %v3328_v15  ;;  %968 = vmatprep.subr.bf16.mxu1 (!%p579_p3), %v3328_v15  ;;  %v3340_v23 = vld [vmem:[%s4381_s6 + $0xd4] ss:$8 sps:$4 sm:$0xff] (!%p579_p3)   ;;  %v3342_v24 = vld [vmem:[%s4381_s6 + $0xd0] ss:$8 sps:$4 sm:$0xff] (!%p579_p3)   ;;  %v3343_v25 = vld [vmem:[%s4381_s6 + $0xe4] ss:$8 sps:$4 sm:$0xff] (!%p579_p3)  }
  0x57   : > { %v3345_v26 = vld [vmem:[%s4381_s6 + $0xe0] ss:$8 sps:$4 sm:$0xff] (!%p579_p3)   ;;  %v3346_v27 = vld [vmem:[%s4381_s6 + $0xf4] ss:$8 sps:$4 sm:$0xff] (!%p579_p3)   ;;  %v3348_v28 = vld [vmem:[%s4381_s6 + $0xf0] ss:$8 sps:$4 sm:$0xff] (!%p579_p3)  }
  0x58   : > { %v3351_v29 = vld [vmem:[%s4381_s6 + $0x4] ss:$8 sps:$4 sm:$0xff] (!%p579_p3)   ;;  %v3349_v30 = vld [vmem:[%s4381_s6] ss:$8 sps:$4 sm:$0xff] (!%p579_p3)   ;;  %s594_s26 = scalar_lea.vmem (!%p579_p3), [#allocation3], %s3861_s7  ;;  %s3924_s17 = scalar_lea.vmem (!%p579_p3), [#allocation2], %s3861_s7 }
  0x59   : > { %805 = vmatpush1.bf16.msra.mxu0 (!%p579_p3), %v3330_v16  ;;  %969 = vmatpush1.bf16.msra.mxu1 (!%p579_p3), %v3330_v16  ;;  %v721_v31 = vld [vmem:[%s594_s26] sm:$0x1] (!%p579_p3)  ;;  %v2920_v32 = vld [vmem:[%s594_s26 + $0x2] sm:$0x1] (!%p579_p3)  ;;  %v3354_v33 = vld [vmem:[%s4381_s6 + $0x14] ss:$8 sps:$4 sm:$0xff] (!%p579_p3)  }
  0x5a   : > { %806 = vmatprep.subr.bf16.mxu0 %v3331_v17  ;;  %970 = vmatprep.subr.bf16.mxu1 %v3331_v17  ;;  %v3352_v34 = vld [vmem:[%s4381_s6 + $0x10] ss:$8 sps:$4 sm:$0xff]   ;;  %v3357_v35 = vld [vmem:[%s4381_s6 + $0x24] ss:$8 sps:$4 sm:$0xff]   ;;  %v3355_v36 = vld [vmem:[%s4381_s6 + $0x20] ss:$8 sps:$4 sm:$0xff]  }
  0x5b   : > { %v3360_v37 = vld [vmem:[%s4381_s6 + $0x34] ss:$8 sps:$4 sm:$0xff]   ;;  %v3358_v38 = vld [vmem:[%s4381_s6 + $0x30] ss:$8 sps:$4 sm:$0xff]   ;;  %v3363_v39 = vld [vmem:[%s4381_s6 + $0x44] ss:$8 sps:$4 sm:$0xff]  }
  0x5c   : > { %v3361_v40 = vld [vmem:[%s4381_s6 + $0x40] ss:$8 sps:$4 sm:$0xff]   ;;  %v3366_v41 = vld [vmem:[%s4381_s6 + $0x54] ss:$8 sps:$4 sm:$0xff]   ;;  %v3364_v42 = vld [vmem:[%s4381_s6 + $0x50] ss:$8 sps:$4 sm:$0xff]  }
  0x5d   : > { %807 = vmatpush1.bf16.msra.mxu0 %v3333_v18  ;;  %971 = vmatpush1.bf16.msra.mxu1 %v3333_v18  ;;  %v3369_v43 = vld [vmem:[%s4381_s6 + $0x64] ss:$8 sps:$4 sm:$0xff]   ;;  %v3367_v44 = vld [vmem:[%s4381_s6 + $0x60] ss:$8 sps:$4 sm:$0xff]   ;;  %v3372_v45 = vld [vmem:[%s4381_s6 + $0x74] ss:$8 sps:$4 sm:$0xff]  }
  0x5e   : > { %808 = vmatprep.subr.bf16.mxu0 %v3334_v19  ;;  %972 = vmatprep.subr.bf16.mxu1 %v3334_v19  ;;  %v3370_v46 = vld [vmem:[%s4381_s6 + $0x70] ss:$8 sps:$4 sm:$0xff]   ;;  %v3375_v47 = vld [vmem:[%s4381_s6 + $0x104] ss:$8 sps:$4 sm:$0xff]   ;;  %v3373_v48 = vld [vmem:[%s4381_s6 + $0x100] ss:$8 sps:$4 sm:$0xff]  }
  0x5f   : > { %v701_v49 = vld [vmem:[%s3924_s17] sm:$0x1]  ;;  %v2871_v50 = vld [vmem:[%s3924_s17 + $0x2] sm:$0x1]  ;;  %v3378_v51 = vld [vmem:[%s4381_s6 + $0x114] ss:$8 sps:$4 sm:$0xff]  }
  0x60   : > { %v3376_v52 = vld [vmem:[%s4381_s6 + $0x110] ss:$8 sps:$4 sm:$0xff]   ;;  %v3381_v53 = vld [vmem:[%s4381_s6 + $0x124] ss:$8 sps:$4 sm:$0xff]   ;;  %v3379_v54 = vld [vmem:[%s4381_s6 + $0x120] ss:$8 sps:$4 sm:$0xff]  }
  0x61   : > { %809 = vmatpush1.bf16.msra.mxu0 %v3336_v20  ;;  %973 = vmatpush1.bf16.msra.mxu1 %v3336_v20  ;;  %v3384_v55 = vld [vmem:[%s4381_s6 + $0x134] ss:$8 sps:$4 sm:$0xff]   ;;  %v3382_v56 = vld [vmem:[%s4381_s6 + $0x130] ss:$8 sps:$4 sm:$0xff]   ;;  %v3387_v57 = vld [vmem:[%s4381_s6 + $0x144] ss:$8 sps:$4 sm:$0xff]  }
  0x62   : > { %810 = vmatprep.subr.bf16.mxu0 %v3337_v21  ;;  %974 = vmatprep.subr.bf16.mxu1 %v3337_v21  ;;  %v3385_v58 = vld [vmem:[%s4381_s6 + $0x140] ss:$8 sps:$4 sm:$0xff]   ;;  %v3390_v59 = vld [vmem:[%s4381_s6 + $0x154] ss:$8 sps:$4 sm:$0xff]   ;;  %v3388_v62 = vld [vmem:[%s4381_s6 + $0x150] ss:$8 sps:$4 sm:$0xff]  }
  0x63   : > { %v2937_v60 = vld.sshfl [vmem:[%s3924_s17] sm:$0x3 pattern:$0x76325410]  ;;  %v3396_v3 = vld [vmem:[%s4381_s6 + $0x174] ss:$8 sps:$4 sm:$0xff]  }
  0x64   : > { %v2955_v61 = vld.sshfl [vmem:[%s3924_s17 + $0x2] sm:$0x3 pattern:$0x76325410]  ;;  %v1077_v0 = vshll.u32 %v2937_v60, 16  ;;  %v1075_v4 = vshrl.u32 %v2937_v60, 16 }
  0x65   : > { %811 = vmatpush1.bf16.msra.mxu0 %v3339_v22  ;;  %975 = vmatpush1.bf16.msra.mxu1 %v3339_v22  ;;  %v3393_v63 = vld [vmem:[%s4381_s6 + $0x164] ss:$8 sps:$4 sm:$0xff]   ;;  %v1217_v1 = vshll.u32 %v2955_v61, 16  ;;  %v3391_v2 = vld [vmem:[%s4381_s6 + $0x160] ss:$8 sps:$4 sm:$0xff]   ;;  %v1215_v6 = vshrl.u32 %v2955_v61, 16 }
  0x66   : > { %812 = vmatprep.subr.bf16.mxu0 %v3340_v23  ;;  %976 = vmatprep.subr.bf16.mxu1 %v3340_v23  ;;  %v1079_v5 = vrot.slane %v1077_v0, 1  ;;  %v3394_v8 = vld [vmem:[%s4381_s6 + $0x170] ss:$8 sps:$4 sm:$0xff]   ;;  %v3399_v9 = vld [vmem:[%s4381_s6 + $0x184] ss:$8 sps:$4 sm:$0xff]   ;;  %s599_s7 = sand.u32 1, %s3595_s13  }
  0x67   : > { %v1219_v7 = vrot.slane %v1217_v1, 1  ;;  %v3397_v12 = vld [vmem:[%s4381_s6 + $0x180] ss:$8 sps:$4 sm:$0xff]   ;;  %v3402_v13 = vld [vmem:[%s4381_s6 + $0x194] ss:$8 sps:$4 sm:$0xff]   ;;  %s4022_s22 = sshll.u32 %s599_s7, 2 }
  0x68   : > { %v1080_v10 = vor.u32 %v1079_v5, %v1075_v4  ;;  %v3400_v15 = vld [vmem:[%s4381_s6 + $0x190] ss:$8 sps:$4 sm:$0xff]   ;;  %v3405_v16 = vld [vmem:[%s4381_s6 + $0x1a4] ss:$8 sps:$4 sm:$0xff]   ;;  %v3403_v17 = vld [vmem:[%s4381_s6 + $0x1a0] ss:$8 sps:$4 sm:$0xff]  }
  0x69   : > { %813 = vmatpush1.bf16.msra.mxu0 %v3342_v24  ;;  %977 = vmatpush1.bf16.msra.mxu1 %v3342_v24  ;;  %v1220_v11 = vor.u32 %v1219_v7, %v1215_v6  ;;  %v3408_v18 = vld [vmem:[%s4381_s6 + $0x1b4] ss:$8 sps:$4 sm:$0xff]   ;;  %v3406_v19 = vld [vmem:[%s4381_s6 + $0x1b0] ss:$8 sps:$4 sm:$0xff]   ;;  %v3411_v20 = vld [vmem:[%s4381_s6 + $0x1c4] ss:$8 sps:$4 sm:$0xff]  }
  0x6a   : > { %814 = vmatprep.subr.bf16.mxu0 %v3343_v25  ;;  %978 = vmatprep.subr.bf16.mxu1 %v3343_v25  ;;  %v3409_v21 = vld [vmem:[%s4381_s6 + $0x1c0] ss:$8 sps:$4 sm:$0xff]   ;;  %v3414_v22 = vld [vmem:[%s4381_s6 + $0x1d4] ss:$8 sps:$4 sm:$0xff]   ;;  %v3412_v23 = vld [vmem:[%s4381_s6 + $0x1d0] ss:$8 sps:$4 sm:$0xff]  }
  0x6b   : > { %v3417_v24 = vld [vmem:[%s4381_s6 + $0x1e4] ss:$8 sps:$4 sm:$0xff]   ;;  %v3415_v25 = vld [vmem:[%s4381_s6 + $0x1e0] ss:$8 sps:$4 sm:$0xff]   ;;  %s4034_s23 = scalar_lea.vmem [#allocation4], %s4022_s22  ;;  %s608_s26 = scalar_lea.vmem [#allocation5], %s4022_s22 }
  0x6c   : > { %v3460_v60 = vld [vmem:[%s4381_s6 + $0x2d0] ss:$8 sps:$4 sm:$0xff]   ;;  %v3463_v1 = vld [vmem:[%s4381_s6 + $0x2e0] ss:$8 sps:$4 sm:$0xff]   ;;  %s613_s19 = sand.u32 1, %s3587_s11   ;;  %vm2464_vm0 = vcmask 1041408  }
  0x6d   : > { %815 = vmatpush1.bf16.msra.mxu0 %v3345_v26  ;;  %979 = vmatpush1.bf16.msra.mxu1 %v3345_v26  ;;  %v3420_v26 = vld [vmem:[%s4381_s6 + $0x1f4] ss:$8 sps:$4 sm:$0xff]   ;;  %v3466_v7 = vld [vmem:[%s4381_s6 + $0x2f0] ss:$8 sps:$4 sm:$0xff]   ;;  %s4183_s29 = sshll.u32 %s613_s19, 2  ;;  %s667_s10 = sand.u32 1, %s3579_s30  }
  0x6e   : > { %816 = vmatprep.subr.bf16.mxu0 %v3346_v27  ;;  %980 = vmatprep.subr.bf16.mxu1 %v3346_v27  ;;  %v3418_v27 = vld [vmem:[%s4381_s6 + $0x1f0] ss:$8 sps:$4 sm:$0xff]   ;;  %s4195_s9 = scalar_lea.vmem [#allocation6], %s4183_s29  ;;  %s622_s17 = scalar_lea.vmem [#allocation7], %s4183_s29 }
  0x6f   : > { %v3056_v61 = vld.sshfl [vmem:[%s4034_s23 + $0x2] sm:$0x3 pattern:$0x76325410]  ;;  %s2870_s27 = sshll.u32 %s667_s10, 2  ;;  %p3162_p4 = scmp.ne.s32.totalorder %s3712_s18, 0 }
  0x70   : > { %v1806_v0 = vshll.u32 %v3056_v61, 16  ;;  %v1804_v5 = vshrl.u32 %v3056_v61, 16  ;;  %s4307_s30 = scalar_lea.vmem [#allocation8], %s2870_s27  ;;  %s4405_s24 = sld [smem:[#allocation17_spill]] (!%p3162_p4) }
  0x71   : > { %817 = vmatpush1.bf16.msra.mxu0 %v3348_v28  ;;  %981 = vmatpush1.bf16.msra.mxu1 %v3348_v28  ;;  %v3423_v28 = vld [vmem:[%s4381_s6 + $0x204] ss:$8 sps:$4 sm:$0xff]  }
  0x72   : > { %923 = vmatprep.subr.bf16.mxu0 %v3351_v29  ;;  %1007 = vmatprep.subr.bf16.mxu1 %v3351_v29  ;;  %v3421_v29 = vld [vmem:[%s4381_s6 + $0x200] ss:$8 sps:$4 sm:$0xff]   ;;  %v1808_v6 = vrot.slane %v1806_v0, 1  ;;  %v3540_v0 = vld [vmem:[%s4381_s6 + $0x474] ss:$8 sps:$4 sm:$0xff]  }
  0x74   : > { %835 = vmatmul.mubr.bf16.vlgmr.msra.gmra.mrb[0].mxu0 %v721_v31  ;;  %999 = vmatmul.mubr.bf16.vlgmr.msra.gmra.mrb[0].mxu1 %v2920_v32  ;;  %v2988_v31 = vld [vmem:[%s4034_s23 + $0x2] sm:$0x1] }
  0x75   : > { %924 = vmatpush1.bf16.msra.mxu0 %v3349_v30  ;;  %1008 = vmatpush1.bf16.msra.mxu1 %v3349_v30  ;;  %v1282_v30 = vld [vmem:[%s4034_s23] sm:$0x1] }
  0x76   : > { %925 = vmatprep.subr.bf16.mxu0 %v3354_v33  ;;  %1009 = vmatprep.subr.bf16.mxu1 %v3354_v33  ;;  %v3426_v32 = vld [vmem:[%s4381_s6 + $0x214] ss:$8 sps:$4 sm:$0xff]   ;;  %v3424_v33 = vld [vmem:[%s4381_s6 + $0x210] ss:$8 sps:$4 sm:$0xff]  }
  0x77   : > { %955 = vmatprep.mubr.bf16.mxu0 %v3613_v14  ;;  %1039 = vmatprep.mubr.bf16.mxu1 %v3613_v14 }
  0x79   : > { %926 = vmatpush1.bf16.msra.mxu0 %v3352_v34  ;;  %1010 = vmatpush1.bf16.msra.mxu1 %v3352_v34  ;;  %v3429_v34 = vld [vmem:[%s4381_s6 + $0x224] ss:$8 sps:$4 sm:$0xff]  }
  0x7a   : > { %927 = vmatprep.subr.bf16.mxu0 %v3357_v35  ;;  %1011 = vmatprep.subr.bf16.mxu1 %v3357_v35  ;;  %v3427_v35 = vld [vmem:[%s4381_s6 + $0x220] ss:$8 sps:$4 sm:$0xff]  }
  0x7d   : > { %928 = vmatpush1.bf16.msra.mxu0 %v3355_v36  ;;  %1012 = vmatpush1.bf16.msra.mxu1 %v3355_v36  ;;  %v3432_v36 = vld [vmem:[%s4381_s6 + $0x234] ss:$8 sps:$4 sm:$0xff]  }
  0x7e   : > { %929 = vmatprep.subr.bf16.mxu0 %v3360_v37  ;;  %1013 = vmatprep.subr.bf16.mxu1 %v3360_v37  ;;  %v3430_v37 = vld [vmem:[%s4381_s6 + $0x230] ss:$8 sps:$4 sm:$0xff]  }
  0x81   : > { %930 = vmatpush1.bf16.msra.mxu0 %v3358_v38  ;;  %1014 = vmatpush1.bf16.msra.mxu1 %v3358_v38  ;;  %v3435_v38 = vld [vmem:[%s4381_s6 + $0x244] ss:$8 sps:$4 sm:$0xff]  }
  0x82   : > { %931 = vmatprep.subr.bf16.mxu0 %v3363_v39  ;;  %1015 = vmatprep.subr.bf16.mxu1 %v3363_v39  ;;  %v3433_v39 = vld [vmem:[%s4381_s6 + $0x240] ss:$8 sps:$4 sm:$0xff]  }
  0x85   : > { %932 = vmatpush1.bf16.msra.mxu0 %v3361_v40  ;;  %1016 = vmatpush1.bf16.msra.mxu1 %v3361_v40  ;;  %v3438_v40 = vld [vmem:[%s4381_s6 + $0x254] ss:$8 sps:$4 sm:$0xff]  }
  0x86   : > { %933 = vmatprep.subr.bf16.mxu0 %v3366_v41  ;;  %1017 = vmatprep.subr.bf16.mxu1 %v3366_v41  ;;  %v3436_v41 = vld [vmem:[%s4381_s6 + $0x250] ss:$8 sps:$4 sm:$0xff]  }
  0x89   : > { %934 = vmatpush1.bf16.msra.mxu0 %v3364_v42  ;;  %1018 = vmatpush1.bf16.msra.mxu1 %v3364_v42  ;;  %v3441_v42 = vld [vmem:[%s4381_s6 + $0x264] ss:$8 sps:$4 sm:$0xff]  }
  0x8a   : > { %935 = vmatprep.subr.bf16.mxu0 %v3369_v43  ;;  %1019 = vmatprep.subr.bf16.mxu1 %v3369_v43  ;;  %v3439_v43 = vld [vmem:[%s4381_s6 + $0x260] ss:$8 sps:$4 sm:$0xff]  }
  0x8d   : > { %936 = vmatpush1.bf16.msra.mxu0 %v3367_v44  ;;  %1020 = vmatpush1.bf16.msra.mxu1 %v3367_v44  ;;  %v3444_v44 = vld [vmem:[%s4381_s6 + $0x274] ss:$8 sps:$4 sm:$0xff]  }
  0x8e   : > { %937 = vmatprep.subr.bf16.mxu0 %v3372_v45  ;;  %1021 = vmatprep.subr.bf16.mxu1 %v3372_v45  ;;  %v3442_v45 = vld [vmem:[%s4381_s6 + $0x270] ss:$8 sps:$4 sm:$0xff]  }
  0x91   : > { %938 = vmatpush1.bf16.msra.mxu0 %v3370_v46  ;;  %1022 = vmatpush1.bf16.msra.mxu1 %v3370_v46  ;;  %v3447_v46 = vld [vmem:[%s4381_s6 + $0x284] ss:$8 sps:$4 sm:$0xff]  }
  0x92   : > { %1162 = vmatprep.subr.bf16.mxu0 %v3375_v47  ;;  %1222 = vmatprep.subr.bf16.mxu1 %v3375_v47  ;;  %v3445_v47 = vld [vmem:[%s4381_s6 + $0x280] ss:$8 sps:$4 sm:$0xff]  }
  0x94   : > { %956 = vmatmul.mubr.bf16.vlgmr.msra.gmra.mrb[0].mxu0 %v701_v49  ;;  %1040 = vmatmul.mubr.bf16.vlgmr.msra.gmra.mrb[0].mxu1 %v2871_v50  ;;  %v3021_v49 = vld [vmem:[%s608_s26 + $0x2] sm:$0x1] }
  0x95   : > { %1163 = vmatpush1.bf16.msra.mxu0 %v3373_v48  ;;  %1223 = vmatpush1.bf16.msra.mxu1 %v3373_v48  ;;  %v1468_v48 = vld [vmem:[%s608_s26] sm:$0x1] }
  0x96   : > { %1164 = vmatprep.subr.bf16.mxu0 %v3378_v51  ;;  %1224 = vmatprep.subr.bf16.mxu1 %v3378_v51  ;;  %v3450_v50 = vld [vmem:[%s4381_s6 + $0x294] ss:$8 sps:$4 sm:$0xff]   ;;  %v3448_v51 = vld [vmem:[%s4381_s6 + $0x290] ss:$8 sps:$4 sm:$0xff]  }
  0x97   : > { %1194 = vmatprep.mubr.bf16.mxu0 %v3613_v14  ;;  %1254 = vmatprep.mubr.bf16.mxu1 %v3613_v14 }
  0x99   : > { %1165 = vmatpush1.bf16.msra.mxu0 %v3376_v52  ;;  %1225 = vmatpush1.bf16.msra.mxu1 %v3376_v52  ;;  %v3453_v52 = vld [vmem:[%s4381_s6 + $0x2a4] ss:$8 sps:$4 sm:$0xff]  }
  0x9a   : > { %1166 = vmatprep.subr.bf16.mxu0 %v3381_v53  ;;  %1226 = vmatprep.subr.bf16.mxu1 %v3381_v53  ;;  %v3451_v53 = vld [vmem:[%s4381_s6 + $0x2a0] ss:$8 sps:$4 sm:$0xff]  }
  0x9d   : > { %1167 = vmatpush1.bf16.msra.mxu0 %v3379_v54  ;;  %1227 = vmatpush1.bf16.msra.mxu1 %v3379_v54  ;;  %v3456_v54 = vld [vmem:[%s4381_s6 + $0x2b4] ss:$8 sps:$4 sm:$0xff]  }
  0x9e   : > { %1168 = vmatprep.subr.bf16.mxu0 %v3384_v55  ;;  %1228 = vmatprep.subr.bf16.mxu1 %v3384_v55  ;;  %v3454_v55 = vld [vmem:[%s4381_s6 + $0x2b0] ss:$8 sps:$4 sm:$0xff]  }
  0xa1   : > { %1169 = vmatpush1.bf16.msra.mxu0 %v3382_v56  ;;  %1229 = vmatpush1.bf16.msra.mxu1 %v3382_v56  ;;  %v3459_v56 = vld [vmem:[%s4381_s6 + $0x2c4] ss:$8 sps:$4 sm:$0xff]  }
  0xa2   : > { %1170 = vmatprep.subr.bf16.mxu0 %v3387_v57  ;;  %1230 = vmatprep.subr.bf16.mxu1 %v3387_v57  ;;  %v3457_v57 = vld [vmem:[%s4381_s6 + $0x2c0] ss:$8 sps:$4 sm:$0xff]  }
  0xa5   : > { %1171 = vmatpush1.bf16.msra.mxu0 %v3385_v58  ;;  %1231 = vmatpush1.bf16.msra.mxu1 %v3385_v58  ;;  %v3462_v58 = vld [vmem:[%s4381_s6 + $0x2d4] ss:$8 sps:$4 sm:$0xff]  }
  0xa6   : > { %1172 = vmatprep.subr.bf16.mxu0 %v3390_v59  ;;  %1232 = vmatprep.subr.bf16.mxu1 %v3390_v59  ;;  %v3038_v59 = vld.sshfl [vmem:[%s4034_s23] sm:$0x3 pattern:$0x76325410]  ;;  %s4406_s23 = sld [smem:[#allocation18_spill]] (!%p3162_p4) }
  0xa9   : > { %1173 = vmatpush1.bf16.msra.mxu0 %v3388_v62  ;;  %1233 = vmatpush1.bf16.msra.mxu1 %v3388_v62  ;;  %v3465_v62 = vld [vmem:[%s4381_s6 + $0x2e4] ss:$8 sps:$4 sm:$0xff]  }
  0xaa   : > { %1174 = vmatprep.subr.bf16.mxu0 %v3393_v63  ;;  %1234 = vmatprep.subr.bf16.mxu1 %v3393_v63  ;;  %v1666_v63 = vshll.u32 %v3038_v59, 16 }
  0xac   : > { %v1668_v4 = vrot.slane %v1666_v63, 1  ;;  %v3535_v63 = vld [vmem:[%s4381_s6 + $0x460] ss:$8 sps:$4 sm:$0xff]  }
  0xad   : > { %1175 = vmatpush1.bf16.msra.mxu0 %v3391_v2  ;;  %1235 = vmatpush1.bf16.msra.mxu1 %v3391_v2  ;;  %v3468_v2 = vld [vmem:[%s4381_s6 + $0x2f4] ss:$8 sps:$4 sm:$0xff]  }
  0xae   : > { %1176 = vmatprep.subr.bf16.mxu0 %v3396_v3  ;;  %1236 = vmatprep.subr.bf16.mxu1 %v3396_v3  ;;  %v1664_v3 = vshrl.u32 %v3038_v59, 16  ;;  %v3157_v59 = vld.sshfl [vmem:[%s4195_s9 + $0x2] sm:$0x3 pattern:$0x76325410] }
  0xb1   : > { %1177 = vmatpush1.bf16.msra.mxu0 %v3394_v8  ;;  %1237 = vmatpush1.bf16.msra.mxu1 %v3394_v8  ;;  %v3471_v8 = vld [vmem:[%s4381_s6 + $0x304] ss:$8 sps:$4 sm:$0xff]  }
  0xb2   : > { %1363 = vmatprep.subr.bf16.mxu0 %v3399_v9  ;;  %1408 = vmatprep.subr.bf16.mxu1 %v3399_v9  ;;  %v1669_v9 = vor.u32 %v1668_v4, %v1664_v3  ;;  %v2393_v3 = vshrl.u32 %v3157_v59, 16 }
  0xb4   : > { %1195 = vmatmul.mubr.bf16.vlgmr.msra.gmra.mrb[0].mxu0 %v1080_v10  ;;  %1255 = vmatmul.mubr.bf16.vlgmr.msra.gmra.mrb[0].mxu1 %v1220_v11  ;;  %v1809_v10 = vor.u32 %v1808_v6, %v1804_v5  ;;  %v3469_v11 = vld [vmem:[%s4381_s6 + $0x300] ss:$8 sps:$4 sm:$0xff]   ;;  %v3538_v5 = vld [vmem:[%s4381_s6 + $0x470] ss:$8 sps:$4 sm:$0xff]  }
  0xb5   : > { %1364 = vmatpush1.bf16.msra.mxu0 %v3397_v12  ;;  %1409 = vmatpush1.bf16.msra.mxu1 %v3397_v12  ;;  %v3474_v12 = vld [vmem:[%s4381_s6 + $0x314] ss:$8 sps:$4 sm:$0xff]  }
  0xb6   : > { %1365 = vmatprep.subr.bf16.mxu0 %v3402_v13  ;;  %1410 = vmatprep.subr.bf16.mxu1 %v3402_v13  ;;  %v3472_v13 = vld [vmem:[%s4381_s6 + $0x310] ss:$8 sps:$4 sm:$0xff]  }
  0xb7   : > { %1395 = vmatprep.mubr.bf16.mxu0 %v3613_v14  ;;  %1440 = vmatprep.mubr.bf16.mxu1 %v3613_v14 }
  0xb9   : > { %1366 = vmatpush1.bf16.msra.mxu0 %v3400_v15  ;;  %1411 = vmatpush1.bf16.msra.mxu1 %v3400_v15  ;;  %v3477_v15 = vld [vmem:[%s4381_s6 + $0x324] ss:$8 sps:$4 sm:$0xff]  }
  0xba   : > { %1367 = vmatprep.subr.bf16.mxu0 %v3405_v16  ;;  %1412 = vmatprep.subr.bf16.mxu1 %v3405_v16  ;;  %v3475_v16 = vld [vmem:[%s4381_s6 + $0x320] ss:$8 sps:$4 sm:$0xff]  }
  0xbd   : > { %1368 = vmatpush1.bf16.msra.mxu0 %v3403_v17  ;;  %1413 = vmatpush1.bf16.msra.mxu1 %v3403_v17  ;;  %v3480_v17 = vld [vmem:[%s4381_s6 + $0x334] ss:$8 sps:$4 sm:$0xff]  }
  0xbe   : > { %1369 = vmatprep.subr.bf16.mxu0 %v3408_v18  ;;  %1414 = vmatprep.subr.bf16.mxu1 %v3408_v18  ;;  %v3478_v18 = vld [vmem:[%s4381_s6 + $0x330] ss:$8 sps:$4 sm:$0xff]  }
  0xc1   : > { %1370 = vmatpush1.bf16.msra.mxu0 %v3406_v19  ;;  %1415 = vmatpush1.bf16.msra.mxu1 %v3406_v19  ;;  %v3483_v19 = vld [vmem:[%s4381_s6 + $0x344] ss:$8 sps:$4 sm:$0xff]  }
  0xc2   : > { %1371 = vmatprep.subr.bf16.mxu0 %v3411_v20  ;;  %1416 = vmatprep.subr.bf16.mxu1 %v3411_v20  ;;  %v3481_v20 = vld [vmem:[%s4381_s6 + $0x340] ss:$8 sps:$4 sm:$0xff]  }
  0xc5   : > { %1372 = vmatpush1.bf16.msra.mxu0 %v3409_v21  ;;  %1417 = vmatpush1.bf16.msra.mxu1 %v3409_v21  ;;  %v3486_v21 = vld [vmem:[%s4381_s6 + $0x354] ss:$8 sps:$4 sm:$0xff]  }
  0xc6   : > { %1373 = vmatprep.subr.bf16.mxu0 %v3414_v22  ;;  %1418 = vmatprep.subr.bf16.mxu1 %v3414_v22  ;;  %v3484_v22 = vld [vmem:[%s4381_s6 + $0x350] ss:$8 sps:$4 sm:$0xff]  }
  0xc9   : > { %1374 = vmatpush1.bf16.msra.mxu0 %v3412_v23  ;;  %1419 = vmatpush1.bf16.msra.mxu1 %v3412_v23  ;;  %v3489_v23 = vld [vmem:[%s4381_s6 + $0x364] ss:$8 sps:$4 sm:$0xff]  }
  0xca   : > { %1375 = vmatprep.subr.bf16.mxu0 %v3417_v24  ;;  %1420 = vmatprep.subr.bf16.mxu1 %v3417_v24  ;;  %v3487_v24 = vld [vmem:[%s4381_s6 + $0x360] ss:$8 sps:$4 sm:$0xff]  }
  0xcd   : > { %1376 = vmatpush1.bf16.msra.mxu0 %v3415_v25  ;;  %1421 = vmatpush1.bf16.msra.mxu1 %v3415_v25  ;;  %v3492_v25 = vld [vmem:[%s4381_s6 + $0x374] ss:$8 sps:$4 sm:$0xff]  }
  0xce   : > { %1377 = vmatprep.subr.bf16.mxu0 %v3420_v26  ;;  %1422 = vmatprep.subr.bf16.mxu1 %v3420_v26  ;;  %v3490_v26 = vld [vmem:[%s4381_s6 + $0x370] ss:$8 sps:$4 sm:$0xff]  }
  0xd1   : > { %1378 = vmatpush1.bf16.msra.mxu0 %v3418_v27  ;;  %1423 = vmatpush1.bf16.msra.mxu1 %v3418_v27  ;;  %v3495_v27 = vld [vmem:[%s4381_s6 + $0x384] ss:$8 sps:$4 sm:$0xff]  }
  0xd2   : > { %1549 = vmatprep.subr.bf16.mxu0 %v3423_v28  ;;  %1594 = vmatprep.subr.bf16.mxu1 %v3423_v28  ;;  %v3493_v28 = vld [vmem:[%s4381_s6 + $0x380] ss:$8 sps:$4 sm:$0xff]  }
  0xd4   : > { %1396 = vmatmul.mubr.bf16.vlgmr.msra.gmra.mrb[0].mxu0 %v1282_v30  ;;  %1441 = vmatmul.mubr.bf16.vlgmr.msra.gmra.mrb[0].mxu1 %v2988_v31  ;;  %v3089_v30 = vld [vmem:[%s4195_s9 + $0x2] sm:$0x1]  ;;  %v3498_v31 = vld [vmem:[%s4381_s6 + $0x394] ss:$8 sps:$4 sm:$0xff]  }
  0xd5   : > { %1550 = vmatpush1.bf16.msra.mxu0 %v3421_v29  ;;  %1595 = vmatpush1.bf16.msra.mxu1 %v3421_v29  ;;  %v1871_v29 = vld [vmem:[%s4195_s9] sm:$0x1] }
  0xd6   : > { %1551 = vmatprep.subr.bf16.mxu0 %v3426_v32  ;;  %1596 = vmatprep.subr.bf16.mxu1 %v3426_v32  ;;  %v3496_v32 = vld [vmem:[%s4381_s6 + $0x390] ss:$8 sps:$4 sm:$0xff]  }
  0xd7   : > { %1581 = vmatprep.mubr.bf16.mxu0 %v3613_v14  ;;  %1626 = vmatprep.mubr.bf16.mxu1 %v3613_v14 }
  0xd9   : > { %1552 = vmatpush1.bf16.msra.mxu0 %v3424_v33  ;;  %1597 = vmatpush1.bf16.msra.mxu1 %v3424_v33  ;;  %v3501_v33 = vld [vmem:[%s4381_s6 + $0x3a4] ss:$8 sps:$4 sm:$0xff]  }
  0xda   : > { %1553 = vmatprep.subr.bf16.mxu0 %v3429_v34  ;;  %1598 = vmatprep.subr.bf16.mxu1 %v3429_v34  ;;  %v3499_v34 = vld [vmem:[%s4381_s6 + $0x3a0] ss:$8 sps:$4 sm:$0xff]  }
  0xdd   : > { %1554 = vmatpush1.bf16.msra.mxu0 %v3427_v35  ;;  %1599 = vmatpush1.bf16.msra.mxu1 %v3427_v35  ;;  %v3504_v35 = vld [vmem:[%s4381_s6 + $0x3b4] ss:$8 sps:$4 sm:$0xff]  }
  0xde   : > { %1555 = vmatprep.subr.bf16.mxu0 %v3432_v36  ;;  %1600 = vmatprep.subr.bf16.mxu1 %v3432_v36  ;;  %v3502_v36 = vld [vmem:[%s4381_s6 + $0x3b0] ss:$8 sps:$4 sm:$0xff]  }
  0xe1   : > { %1556 = vmatpush1.bf16.msra.mxu0 %v3430_v37  ;;  %1601 = vmatpush1.bf16.msra.mxu1 %v3430_v37  ;;  %v3507_v37 = vld [vmem:[%s4381_s6 + $0x3c4] ss:$8 sps:$4 sm:$0xff]  }
  0xe2   : > { %1557 = vmatprep.subr.bf16.mxu0 %v3435_v38  ;;  %1602 = vmatprep.subr.bf16.mxu1 %v3435_v38  ;;  %v3505_v38 = vld [vmem:[%s4381_s6 + $0x3c0] ss:$8 sps:$4 sm:$0xff]  }
  0xe5   : > { %1558 = vmatpush1.bf16.msra.mxu0 %v3433_v39  ;;  %1603 = vmatpush1.bf16.msra.mxu1 %v3433_v39  ;;  %v3510_v39 = vld [vmem:[%s4381_s6 + $0x3d4] ss:$8 sps:$4 sm:$0xff]  }
  0xe6   : > { %1559 = vmatprep.subr.bf16.mxu0 %v3438_v40  ;;  %1604 = vmatprep.subr.bf16.mxu1 %v3438_v40  ;;  %v3508_v40 = vld [vmem:[%s4381_s6 + $0x3d0] ss:$8 sps:$4 sm:$0xff]  }
  0xe9   : > { %1560 = vmatpush1.bf16.msra.mxu0 %v3436_v41  ;;  %1605 = vmatpush1.bf16.msra.mxu1 %v3436_v41  ;;  %v3513_v41 = vld [vmem:[%s4381_s6 + $0x3e4] ss:$8 sps:$4 sm:$0xff]  }
  0xea   : > { %1561 = vmatprep.subr.bf16.mxu0 %v3441_v42  ;;  %1606 = vmatprep.subr.bf16.mxu1 %v3441_v42  ;;  %v3511_v42 = vld [vmem:[%s4381_s6 + $0x3e0] ss:$8 sps:$4 sm:$0xff]  }
  0xed   : > { %1562 = vmatpush1.bf16.msra.mxu0 %v3439_v43  ;;  %1607 = vmatpush1.bf16.msra.mxu1 %v3439_v43  ;;  %v3516_v43 = vld [vmem:[%s4381_s6 + $0x3f4] ss:$8 sps:$4 sm:$0xff]  }
  0xee   : > { %1563 = vmatprep.subr.bf16.mxu0 %v3444_v44  ;;  %1608 = vmatprep.subr.bf16.mxu1 %v3444_v44  ;;  %v3514_v44 = vld [vmem:[%s4381_s6 + $0x3f0] ss:$8 sps:$4 sm:$0xff]  }
  0xf1   : > { %1564 = vmatpush1.bf16.msra.mxu0 %v3442_v45  ;;  %1609 = vmatpush1.bf16.msra.mxu1 %v3442_v45  ;;  %v3519_v45 = vld [vmem:[%s4381_s6 + $0x404] ss:$8 sps:$4 sm:$0xff]  }
  0xf2   : > { %1751 = vmatprep.subr.bf16.mxu0 %v3447_v46  ;;  %1811 = vmatprep.subr.bf16.mxu1 %v3447_v46  ;;  %v3517_v46 = vld [vmem:[%s4381_s6 + $0x400] ss:$8 sps:$4 sm:$0xff]  }
  0xf4   : > { %1582 = vmatmul.mubr.bf16.vlgmr.msra.gmra.mrb[0].mxu0 %v1468_v48  ;;  %1627 = vmatmul.mubr.bf16.vlgmr.msra.gmra.mrb[0].mxu1 %v3021_v49  ;;  %v3122_v48 = vld [vmem:[%s622_s17 + $0x2] sm:$0x1]  ;;  %v3522_v49 = vld [vmem:[%s4381_s6 + $0x414] ss:$8 sps:$4 sm:$0xff]  }
  0xf5   : > { %1752 = vmatpush1.bf16.msra.mxu0 %v3445_v47  ;;  %1812 = vmatpush1.bf16.msra.mxu1 %v3445_v47  ;;  %v2057_v47 = vld [vmem:[%s622_s17] sm:$0x1] }
  0xf6   : > { %1753 = vmatprep.subr.bf16.mxu0 %v3450_v50  ;;  %1813 = vmatprep.subr.bf16.mxu1 %v3450_v50  ;;  %v3520_v50 = vld [vmem:[%s4381_s6 + $0x410] ss:$8 sps:$4 sm:$0xff]  }
  0xf7   : > { %1783 = vmatprep.mubr.bf16.mxu0 %v3613_v14  ;;  %1843 = vmatprep.mubr.bf16.mxu1 %v3613_v14 }
  0xf9   : > { %1754 = vmatpush1.bf16.msra.mxu0 %v3448_v51  ;;  %1814 = vmatpush1.bf16.msra.mxu1 %v3448_v51  ;;  %v3525_v51 = vld [vmem:[%s4381_s6 + $0x424] ss:$8 sps:$4 sm:$0xff]  }
  0xfa   : > { %1755 = vmatprep.subr.bf16.mxu0 %v3453_v52  ;;  %1815 = vmatprep.subr.bf16.mxu1 %v3453_v52  ;;  %v3523_v52 = vld [vmem:[%s4381_s6 + $0x420] ss:$8 sps:$4 sm:$0xff]  }
  0xfd   : > { %1756 = vmatpush1.bf16.msra.mxu0 %v3451_v53  ;;  %1816 = vmatpush1.bf16.msra.mxu1 %v3451_v53  ;;  %v3528_v53 = vld [vmem:[%s4381_s6 + $0x434] ss:$8 sps:$4 sm:$0xff]  }
  0xfe   : > { %1757 = vmatprep.subr.bf16.mxu0 %v3456_v54  ;;  %1817 = vmatprep.subr.bf16.mxu1 %v3456_v54  ;;  %v3531_v54 = vld [vmem:[%s4381_s6 + $0x444] ss:$8 sps:$4 sm:$0xff]  }
 0x101   : > { %1758 = vmatpush1.bf16.msra.mxu0 %v3454_v55  ;;  %1818 = vmatpush1.bf16.msra.mxu1 %v3454_v55  ;;  %v3529_v55 = vld [vmem:[%s4381_s6 + $0x440] ss:$8 sps:$4 sm:$0xff]  }
 0x102   : > { %1759 = vmatprep.subr.bf16.mxu0 %v3459_v56  ;;  %1819 = vmatprep.subr.bf16.mxu1 %v3459_v56  ;;  %v3534_v56 = vld [vmem:[%s4381_s6 + $0x454] ss:$8 sps:$4 sm:$0xff]  }
 0x105   : > { %1760 = vmatpush1.bf16.msra.mxu0 %v3457_v57  ;;  %1820 = vmatpush1.bf16.msra.mxu1 %v3457_v57  ;;  %v3139_v57 = vld.sshfl [vmem:[%s4195_s9] sm:$0x3 pattern:$0x76325410] }
 0x106   : > { %1761 = vmatprep.subr.bf16.mxu0 %v3462_v58  ;;  %1821 = vmatprep.subr.bf16.mxu1 %v3462_v58  ;;  %v3532_v58 = vld [vmem:[%s4381_s6 + $0x450] ss:$8 sps:$4 sm:$0xff]   ;;  %v2255_v61 = vshll.u32 %v3139_v57, 16 }
 0x109   : > { %1762 = vmatpush1.bf16.msra.mxu0 %v3460_v60  ;;  %1822 = vmatpush1.bf16.msra.mxu1 %v3460_v60  ;;  %v3537_v60 = vld [vmem:[%s4381_s6 + $0x464] ss:$8 sps:$4 sm:$0xff]  }
 0x10a   : > { %1763 = vmatprep.subr.bf16.mxu0 %v3465_v62  ;;  %1823 = vmatprep.subr.bf16.mxu1 %v3465_v62  ;;  %v2395_v62 = vshll.u32 %v3157_v59, 16 }
 0x10c   : > { %v2397_v4 = vrot.slane %v2395_v62, 1 }
 0x10d   : > { %1764 = vmatpush1.bf16.msra.mxu0 %v3463_v1  ;;  %1824 = vmatpush1.bf16.msra.mxu1 %v3463_v1  ;;  %v2253_v1 = vshrl.u32 %v3139_v57, 16 }
 0x10e   : > { %1765 = vmatprep.subr.bf16.mxu0 %v3468_v2  ;;  %1825 = vmatprep.subr.bf16.mxu1 %v3468_v2  ;;  %v2257_v2 = vrot.slane %v2255_v61, 1 }
 0x110   : > { %v2258_v6 = vor.u32 %v2257_v2, %v2253_v1 }
 0x111   : > { %1766 = vmatpush1.bf16.msra.mxu0 %v3466_v7  ;;  %1826 = vmatpush1.bf16.msra.mxu1 %v3466_v7  ;;  %v2398_v7 = vor.u32 %v2397_v4, %v2393_v3 }
 0x112   : > { %1952 = vmatprep.subr.bf16.mxu0 %v3471_v8  ;;  %1997 = vmatprep.subr.bf16.mxu1 %v3471_v8  ;;  %v3614_v8 = vmov 1966171168  }
 0x114   : > { %1784 = vmatmul.mubr.bf16.vlgmr.msra.gmra.mrb[0].mxu0 %v1669_v9  ;;  %1844 = vmatmul.mubr.bf16.vlgmr.msra.gmra.mrb[0].mxu1 %v1809_v10  ;;  %v2449_v9 = vunpack.c.l.s4 %v3614_v8  ;;  %v2451_v10 = vlaneseq }
 0x115   : > { %1953 = vmatpush1.bf16.msra.mxu0 %v3469_v11  ;;  %1998 = vmatpush1.bf16.msra.mxu1 %v3469_v11 }
 0x116   : > { %1954 = vmatprep.subr.bf16.mxu0 %v3474_v12  ;;  %1999 = vmatprep.subr.bf16.mxu1 %v3474_v12  ;;  %v2450_v11 = vunpack.c.0.s8 %v2449_v9  ;;  %v2452_v12 = vshrl.u32 %v2451_v10, 7  ;;  %vm2561_vm1 = vcmp.lt.s32.totalorder (!%p3162_p4), %v2451_v10, 256 }
 0x117   : > { %1984 = vmatprep.mubr.bf16.mxu0 %v3613_v14  ;;  %2029 = vmatprep.mubr.bf16.mxu1 %v3613_v14 }
 0x119   : > { %1955 = vmatpush1.bf16.msra.mxu0 %v3472_v13  ;;  %2000 = vmatpush1.bf16.msra.mxu1 %v3472_v13 }
 0x11a   : > { %1956 = vmatprep.subr.bf16.mxu0 %v3477_v15  ;;  %2001 = vmatprep.subr.bf16.mxu1 %v3477_v15 }
 0x11d   : > { %1957 = vmatpush1.bf16.msra.mxu0 %v3475_v16  ;;  %2002 = vmatpush1.bf16.msra.mxu1 %v3475_v16  ;;  %v4298_v16 = vsub.s32 %v2450_v11, %v2452_v12 }
 0x11e   : > { %1958 = vmatprep.subr.bf16.mxu0 %v3480_v17  ;;  %2003 = vmatprep.subr.bf16.mxu1 %v3480_v17 }
 0x121   : > { %1959 = vmatpush1.bf16.msra.mxu0 %v3478_v18  ;;  %2004 = vmatpush1.bf16.msra.mxu1 %v3478_v18 }
 0x122   : > { %1960 = vmatprep.subr.bf16.mxu0 %v3483_v19  ;;  %2005 = vmatprep.subr.bf16.mxu1 %v3483_v19 }
 0x125   : > { %1961 = vmatpush1.bf16.msra.mxu0 %v3481_v20  ;;  %2006 = vmatpush1.bf16.msra.mxu1 %v3481_v20 }
 0x126   : > { %1962 = vmatprep.subr.bf16.mxu0 %v3486_v21  ;;  %2007 = vmatprep.subr.bf16.mxu1 %v3486_v21 }
 0x129   : > { %1963 = vmatpush1.bf16.msra.mxu0 %v3484_v22  ;;  %2008 = vmatpush1.bf16.msra.mxu1 %v3484_v22 }
 0x12a   : > { %1964 = vmatprep.subr.bf16.mxu0 %v3489_v23  ;;  %2009 = vmatprep.subr.bf16.mxu1 %v3489_v23 }
 0x12d   : > { %1965 = vmatpush1.bf16.msra.mxu0 %v3487_v24  ;;  %2010 = vmatpush1.bf16.msra.mxu1 %v3487_v24 }
 0x12e   : > { %1966 = vmatprep.subr.bf16.mxu0 %v3492_v25  ;;  %2011 = vmatprep.subr.bf16.mxu1 %v3492_v25 }
 0x131   : > { %1967 = vmatpush1.bf16.msra.mxu0 %v3490_v26  ;;  %2012 = vmatpush1.bf16.msra.mxu1 %v3490_v26 }
 0x132   : > { %2138 = vmatprep.subr.bf16.mxu0 %v3495_v27  ;;  %2183 = vmatprep.subr.bf16.mxu1 %v3495_v27 }
 0x134   : > { %1985 = vmatmul.mubr.bf16.vlgmr.msra.gmra.mrb[0].mxu0 %v1871_v29  ;;  %2030 = vmatmul.mubr.bf16.vlgmr.msra.gmra.mrb[0].mxu1 %v3089_v30 }
 0x135   : > { %2139 = vmatpush1.bf16.msra.mxu0 %v3493_v28  ;;  %2184 = vmatpush1.bf16.msra.mxu1 %v3493_v28 }
 0x136   : > { %2140 = vmatprep.subr.bf16.mxu0 %v3498_v31  ;;  %2185 = vmatprep.subr.bf16.mxu1 %v3498_v31 }
 0x137   : > { %2170 = vmatprep.mubr.bf16.mxu0 %v3613_v14  ;;  %2215 = vmatprep.mubr.bf16.mxu1 %v3613_v14 }
 0x139   : > { %2141 = vmatpush1.bf16.msra.mxu0 %v3496_v32  ;;  %2186 = vmatpush1.bf16.msra.mxu1 %v3496_v32 }
 0x13a   : > { %2142 = vmatprep.subr.bf16.mxu0 %v3501_v33  ;;  %2187 = vmatprep.subr.bf16.mxu1 %v3501_v33 }
 0x13d   : > { %2143 = vmatpush1.bf16.msra.mxu0 %v3499_v34  ;;  %2188 = vmatpush1.bf16.msra.mxu1 %v3499_v34 }
 0x13e   : > { %2144 = vmatprep.subr.bf16.mxu0 %v3504_v35  ;;  %2189 = vmatprep.subr.bf16.mxu1 %v3504_v35 }
 0x141   : > { %2145 = vmatpush1.bf16.msra.mxu0 %v3502_v36  ;;  %2190 = vmatpush1.bf16.msra.mxu1 %v3502_v36 }
 0x142   : > { %2146 = vmatprep.subr.bf16.mxu0 %v3507_v37  ;;  %2191 = vmatprep.subr.bf16.mxu1 %v3507_v37 }
 0x145   : > { %2147 = vmatpush1.bf16.msra.mxu0 %v3505_v38  ;;  %2192 = vmatpush1.bf16.msra.mxu1 %v3505_v38 }
 0x146   : > { %2148 = vmatprep.subr.bf16.mxu0 %v3510_v39  ;;  %2193 = vmatprep.subr.bf16.mxu1 %v3510_v39 }
 0x149   : > { %2149 = vmatpush1.bf16.msra.mxu0 %v3508_v40  ;;  %2194 = vmatpush1.bf16.msra.mxu1 %v3508_v40 }
 0x14a   : > { %2150 = vmatprep.subr.bf16.mxu0 %v3513_v41  ;;  %2195 = vmatprep.subr.bf16.mxu1 %v3513_v41 }
 0x14d   : > { %2151 = vmatpush1.bf16.msra.mxu0 %v3511_v42  ;;  %2196 = vmatpush1.bf16.msra.mxu1 %v3511_v42 }
 0x14e   : > { %2152 = vmatprep.subr.bf16.mxu0 %v3516_v43  ;;  %2197 = vmatprep.subr.bf16.mxu1 %v3516_v43 }
 0x151   : > { %2153 = vmatpush1.bf16.msra.mxu0 %v3514_v44  ;;  %2198 = vmatpush1.bf16.msra.mxu1 %v3514_v44 }
 0x152   : > { %2340 = vmatprep.subr.bf16.mxu0 %v3519_v45  ;;  %2400 = vmatprep.subr.bf16.mxu1 %v3519_v45 }
 0x154   : > { %2171 = vmatmul.mubr.bf16.vlgmr.msra.gmra.mrb[0].mxu0 %v2057_v47  ;;  %2216 = vmatmul.mubr.bf16.vlgmr.msra.gmra.mrb[0].mxu1 %v3122_v48 }
 0x155   : > { %2341 = vmatpush1.bf16.msra.mxu0 %v3517_v46  ;;  %2401 = vmatpush1.bf16.msra.mxu1 %v3517_v46 }
 0x156   : > { %2342 = vmatprep.subr.bf16.mxu0 %v3522_v49  ;;  %2402 = vmatprep.subr.bf16.mxu1 %v3522_v49 }
 0x157   : > { %2372 = vmatprep.mubr.bf16.mxu0 %v3613_v14  ;;  %2432 = vmatprep.mubr.bf16.mxu1 %v3613_v14  ;;  %v3526_v14 = vld [vmem:[%s4381_s6 + $0x430] ss:$8 sps:$4 sm:$0xff]  }
 0x159   : > { %2343 = vmatpush1.bf16.msra.mxu0 %v3520_v50  ;;  %2403 = vmatpush1.bf16.msra.mxu1 %v3520_v50 }
 0x15a   : > { %2344 = vmatprep.subr.bf16.mxu0 %v3525_v51  ;;  %2404 = vmatprep.subr.bf16.mxu1 %v3525_v51 }
 0x15d   : > { %2345 = vmatpush1.bf16.msra.mxu0 %v3523_v52  ;;  %2405 = vmatpush1.bf16.msra.mxu1 %v3523_v52 }
 0x15e   : > { %2346 = vmatprep.subr.bf16.mxu0 %v3528_v53  ;;  %2406 = vmatprep.subr.bf16.mxu1 %v3528_v53 }
 0x161   : > { %2347 = vmatpush1.bf16.msra.mxu0 %v3526_v14  ;;  %2407 = vmatpush1.bf16.msra.mxu1 %v3526_v14 }
 0x162   : > { %2348 = vmatprep.subr.bf16.mxu0 %v3531_v54  ;;  %2408 = vmatprep.subr.bf16.mxu1 %v3531_v54 }
 0x165   : > { %2349 = vmatpush1.bf16.msra.mxu0 %v3529_v55  ;;  %2409 = vmatpush1.bf16.msra.mxu1 %v3529_v55 }
 0x166   : > { %2350 = vmatprep.subr.bf16.mxu0 %v3534_v56  ;;  %2410 = vmatprep.subr.bf16.mxu1 %v3534_v56 }
 0x169   : > { %2351 = vmatpush1.bf16.msra.mxu0 %v3532_v58  ;;  %2411 = vmatpush1.bf16.msra.mxu1 %v3532_v58 }
 0x16a   : > { %2352 = vmatprep.subr.bf16.mxu0 %v3537_v60  ;;  %2412 = vmatprep.subr.bf16.mxu1 %v3537_v60 }
 0x16d   : > { %2353 = vmatpush1.bf16.msra.mxu0 %v3535_v63  ;;  %2413 = vmatpush1.bf16.msra.mxu1 %v3535_v63 }
 0x16e   : > { %2354 = vmatprep.subr.bf16.mxu0 %v3540_v0  ;;  %2414 = vmatprep.subr.bf16.mxu1 %v3540_v0 }
 0x171   : > { %2355 = vmatpush1.bf16.msra.mxu0 %v3538_v5  ;;  %2415 = vmatpush1.bf16.msra.mxu1 %v3538_v5 }
 0x174   : > { %2373 = vmatmul.mubr.bf16.vlgmr.msra.gmra.mrb[0].mxu0 %v2258_v6  ;;  %2433 = vmatmul.mubr.bf16.vlgmr.msra.gmra.mrb[0].mxu1 %v2398_v7 }
 0x247   : > { %v2374_v13 = vpop.f32.mrb[0].mxu0  ;;  %v2434_v15 = vpop.f32.mrb[0].mxu1 }
 0x248   : > { %v2465_v17 = vsel %vm2464_vm0, %v2374_v13, 0.0  ;;  %v2481_v18 = vmul.f32 %v2374_v13, %v2374_v13  ;;  %v2521_v19 = vsel %vm2464_vm0, %v2434_v15, 0.0  ;;  %v2537_v20 = vmul.f32 %v2434_v15, %v2434_v15  ;;  %v2376_v21 = vpop.f32.mrb[1].mxu0  ;;  %v2436_v22 = vpop.f32.mrb[1].mxu1 }
 0x249   : > { %v2466_v23 = vrot.slane %v2465_v17, 4  ;;  %v2522_v24 = vrot.slane %v2521_v19, 4  ;;  %v3158_v25 = vpack.c.bf16 %v2376_v21, %v2374_v13  ;;  %v2472_v26 = vsel %vm2464_vm0, %v2376_v21, 0.0  ;;  %v2378_v27 = vpop.f32.mrb[2].mxu0  ;;  %v2438_v28 = vpop.f32.mrb[2].mxu1 }
 0x24a   : > { %v2483_v29 = vsel %vm2464_vm0, %v2481_v18, 0.0  ;;  %v2539_v30 = vsel %vm2464_vm0, %v2537_v20, 0.0  ;;  %v2473_v31 = vrot.slane %v2472_v26, 4  ;;  %v2482_v32 = vmul.f32 %v2376_v21, %v2376_v21  ;;  %v2379_v33 = vpop.f32.mrb[3].mxu0  ;;  %v2439_v34 = vpop.f32.mrb[3].mxu1 }
 0x24b   : > { %v2467_v35 = vadd.f32 %v2466_v23, %v2465_v17  ;;  %v2484_v36 = vrot.slane %v2483_v29, 4  ;;  %v2523_v37 = vadd.f32 %v2522_v24, %v2521_v19  ;;  %v2540_v38 = vrot.slane %v2539_v30, 4 }
 0x24c   : > { %v2454_v39 = vrot.slane %v3158_v25, %v4298_v16  ;;  %v2474_v40 = vadd.f32 %v2473_v31, %v2472_v26  ;;  %v2490_v41 = vsel %vm2464_vm0, %v2482_v32, 0.0  ;;  %v3160_v42 = vpack.c.bf16 %v2436_v22, %v2434_v15 }
 0x24d   : > { %v2468_v43 = vrot.slane %v2467_v35, 2  ;;  %v2485_v44 = vadd.f32 %v2484_v36, %v2483_v29  ;;  %v2524_v45 = vrot.slane %v2523_v37, 2  ;;  %v2541_v46 = vadd.f32 %v2540_v38, %v2539_v30 }
 0x24e   : > { %3159 = vst.sshfl [vmem:[%s4307_s30] sm:$0x5 pattern:$0x73625140] %v2454_v39  ;;  %v2475_v47 = vrot.slane %v2474_v40, 2  ;;  %v2491_v48 = vrot.slane %v2490_v41, 4  ;;  %v2510_v49 = vrot.slane %v3160_v42, %v4298_v16  ;;  %v2528_v50 = vsel %vm2464_vm0, %v2436_v22, 0.0 }
 0x24f   : > { %v2469_v51 = vadd.f32 %v2468_v43, %v2467_v35  ;;  %v2486_v52 = vrot.slane %v2485_v44, 2  ;;  %v2525_v53 = vadd.f32 %v2524_v45, %v2523_v37  ;;  %v2542_v14 = vrot.slane %v2541_v46, 2 }
 0x250   : > { %v2476_v54 = vadd.f32 %v2475_v47, %v2474_v40  ;;  %v2492_v55 = vadd.f32 %v2491_v48, %v2490_v41  ;;  %3185 = vst.sshfl [vmem:[%s4307_s30 + $0x2] sm:$0x5 pattern:$0x73625140] %v2510_v49  ;;  %v2529_v56 = vrot.slane %v2528_v50, 4  ;;  %v2538_v57 = vmul.f32 %v2436_v22, %v2436_v22 }
 0x251   : > { %v2470_v58 = vrot.slane %v2469_v51, 1  ;;  %v2487_v59 = vadd.f32 %v2486_v52, %v2485_v44  ;;  %v2526_v60 = vrot.slane %v2525_v53, 1  ;;  %v2543_v61 = vadd.f32 %v2542_v14, %v2541_v46 }
 0x252   : > { %v2493_v62 = vrot.slane %v2492_v55, 2  ;;  %v2530_v63 = vadd.f32 %v2529_v56, %v2528_v50  ;;  %v2546_v0 = vsel %vm2464_vm0, %v2538_v57, 0.0  ;;  %v2477_v5 = vrot.slane %v2476_v54, 1 }
 0x253   : > { %v2471_v1 = vadd.f32 %v2470_v58, %v2469_v51  ;;  %v2488_v2 = vrot.slane %v2487_v59, 1  ;;  %v2527_v3 = vadd.f32 %v2526_v60, %v2525_v53  ;;  %v2544_v4 = vrot.slane %v2543_v61, 1 }
 0x254   : > { %v2494_v6 = vadd.f32 %v2493_v62, %v2492_v55  ;;  %v2531_v7 = vrot.slane %v2530_v63, 2  ;;  %v2547_v8 = vrot.slane %v2546_v0, 4  ;;  %v2478_v18 = vadd.f32 %v2477_v5, %v2476_v54 }
 0x255   : > { %v2489_v9 = vadd.f32 %v2488_v2, %v2487_v59  ;;  %v2535_v11 = vadd.f32 %v2527_v3, %v2471_v1  ;;  %v2545_v12 = vadd.f32 %v2544_v4, %v2543_v61  ;;  %v3615_v29 = vmov (!%p3162_p4), 0.0  }
 0x256   : > { %v2532_v13 = vadd.f32 %v2531_v7, %v2530_v63  ;;  %v2548_v15 = vadd.f32 %v2547_v8, %v2546_v0  ;;  %v2495_v19 = vrot.slane %v2494_v6, 1  ;;  %2563 = vst.msk [vmem:[%s4405_s24] sm:$0x3] (!%p3162_p4), %vm2561_vm1, %v3615_v29  ;;  %2564 = vst.msk [vmem:[%s4406_s23] sm:$0x3] (!%p3162_p4), %vm2561_vm1, %v3615_v29 }
 0x257   : > { %v2553_v17 = vadd.f32 %v2545_v12, %v2489_v9 }
 0x258   : > { %v2533_v20 = vrot.slane %v2532_v13, 1  ;;  %v2549_v21 = vrot.slane %v2548_v15, 2  ;;  %v2496_v24 = vadd.f32 %v2495_v19, %v2494_v6 }
 0x25a   : > { %v2534_v22 = vadd.f32 %v2533_v20, %v2532_v13  ;;  %v2550_v23 = vadd.f32 %v2549_v21, %v2548_v15  ;;  %2558 = sbr.rel (%p3162_p4) target bundleno = 609 (0x261), region = 256 }
 0x25c   : > { %v2536_v25 = vadd.f32 %v2534_v22, %v2478_v18  ;;  %v2551_v26 = vrot.slane %v2550_v23, 1 }
 0x25e   : > { %v2552_v27 = vadd.f32 %v2551_v26, %v2550_v23 }
 0x260   : > { %v2554_v28 = vadd.f32 %v2552_v27, %v2496_v24 }
 0x261 PF: > { %v2568_v30 = vcombine.low %v2535_v11, %v2536_v25  ;;  %s4407_s13 = sld [smem:[#allocation17_spill]]  ;;  %s4408_s20 = sld [smem:[#allocation18_spill]]  ;;  %vm2587_vm2 = vcmp.lt.s32.totalorder %v2451_v10, 256  ;;  %v2637_v40 = vld [vmem:[%s4307_s30 + $0x2] sm:$0x3] (%p3764_p13) }
 0x262   : > { %v2593_v31 = vcombine.low %v2553_v17, %v2554_v28  ;;  %s3164_s10 = sshll.u32 (%p3764_p13), %s3712_s18, 1  ;;  %s4410_s22 = sld [smem:[#allocation16_spill]] (%p3764_p13) }
 0x263   : > { %v2575_v32 = vrot.slane %v2568_v30, %v4298_v16 }
 0x264   : > { %v2600_v33 = vrot.slane %v2593_v31, %v4298_v16 }
 0x265   : > { %v2582_v36 = vrot.slane %v2575_v32, %v4298_v16  ;;  %2617 = sbr.rel (!%p3764_p13) target bundleno = 620 (0x26c), region = 260 }
 0x266   : > { %v2607_v37 = vrot.slane %v2600_v33, %v4298_v16  ;;  %v2635_v16 = vld [vmem:[%s4307_s30] sm:$0x3] (%p3764_p13) }
 0x267   : > { %v2565_v34 = vld [vmem:[%s4407_s13] sm:$0x3] }
 0x268   : > { %v2590_v35 = vld [vmem:[%s4408_s20] sm:$0x3]  ;;  %v2584_v38 = vadd.f32 %v2582_v36, %v2565_v34  ;;  %s2619_s24 = scalar_lea.vmem (%p3764_p13), %s4410_s22, %s3164_s10 }
 0x269   : > { %v2609_v39 = vadd.f32 %v2607_v37, %v2590_v35  ;;  %2636 = vst [vmem:[%s2619_s24] sm:$0x3] (%p3764_p13), %v2635_v16  ;;  %2638 = vst [vmem:[%s2619_s24 + $0x4] sm:$0x3] (%p3764_p13), %v2637_v40 }
 0x26a   : > { %2589 = vst.msk [vmem:[%s4407_s13] sm:$0x3] %vm2587_vm2, %v2584_v38 }
 0x26b   : > { %2610 = vst.msk [vmem:[%s4408_s20] sm:$0x3] %vm2587_vm2, %v2609_v39 }
 0x26c PF: > { %s4411_s17 = sld [smem:[#allocation10_spill]]  ;;  %s4412_s30 = sld [smem:[#allocation9_spill]] }
 0x26d   : > { %s4413_s10 = sld [smem:[#allocation14_spill]]  ;;  %s4414_s8 = sld [smem:[#allocation13_spill]] }
 0x26e   : > { %s4415_s23 = sld [smem:[#allocation12_spill]]  ;;  %s4416_s28 = sld [smem:[#allocation11_spill]] }
 0x26f   : > { %s4417_s11 = smov %s3591_s12  ;;  %s4419_s13 = smov %s3599_s14 }
 0x270   : > { %s4421_s15 = smov %s3607_s16 }
 0x272   : > { %p17_p5 = scmp.ge.s32.totalorder %s4411_s17, 4  }
 0x273   : > { %s4418_s12 = smov %s4414_s8 }
 0x274   : > { %s4420_s14 = smov %s4415_s23  ;;  %s4422_s16 = smov %s4416_s28 }
 0x275   :  { %19 = sbr.rel (!%p17_p5) target bundleno = 9 (0x9), region = 396 }

</bundles_post_ra>
